<compile_context>
chip_gen: v5e
topology: v5e:2x2
jax: 0.10.0
libtpu: 0.0.40
codegen_flags: <defaults>
</compile_context>

<pallas_src>
import functools

import jax
import jax.numpy as jnp
from jax import lax
from jax.experimental import pallas as pl
from jax.experimental.pallas import tpu as pltpu


def _round_up(x, m):
    return (x + m - 1) // m * m


def dan_kernel(idx_ref,                                   # [B_pad*S] int32 (SMEM, scalar prefetch)
               table_ref,                                 # [V_pad, D_pad] f32 (VMEM resident)
               w1_ref, b1_ref, w2_ref, b2_ref, w3_ref, b3_ref,
               out_ref,                                   # [TB, C_pad] f32
               sum_ref,                                   # [TB, D_pad] f32 scratch
               *, seq_len, row_group):
    tb, d_pad = sum_ref.shape
    tile_start = pl.program_id(0) * tb
    num_groups = tb // row_group

    # ---- fused embedding gather + sum over the sequence axis --------------------
    # (the 1/S of the PyTorch mean() is already folded into w1 by the wrapper)
    def group_body(g, carry):
        base_row = pl.multiple_of(g * row_group, row_group)
        row_sums = []
        # Python-unrolled group of `row_group` independent rows -> the LLO
        # scheduler can interleave their load/add chains.
        for r in range(row_group):
            base = (tile_start + base_row + r) * seq_len
            # Tree-sum the S token rows (no zeros init, log2(S)-deep add chain).
            toks = [table_ref[pl.ds(idx_ref[base + s], 1), :]
                    for s in range(seq_len)]
            while len(toks) > 1:
                nxt = [toks[i] + toks[i + 1] for i in range(0, len(toks) - 1, 2)]
                if len(toks) % 2:
                    nxt.append(toks[-1])
                toks = nxt
            row_sums.append(toks[0])
        # One sublane-dense [row_group, D_pad] store per group.
        sum_ref[pl.ds(base_row, row_group), :] = jnp.concatenate(row_sums, axis=0)
        return carry

    lax.fori_loop(0, num_groups, group_body, 0)

    # ---- MLP: layer1 + ReLU, layer2 + ReLU, output layer + softmax(dim=1) -------
    # bf16 feeds to the MXU, f32 accumulation / bias / activation / softmax.
    x = sum_ref[...]                                      # [TB, D_pad] f32 (mean folded into w1)
    h1 = jnp.dot(x.astype(jnp.bfloat16), w1_ref[...],
                 preferred_element_type=jnp.float32) + b1_ref[...]
    h1 = jnp.maximum(h1, 0.0)
    h2 = jnp.dot(h1.astype(jnp.bfloat16), w2_ref[...],
                 preferred_element_type=jnp.float32) + b2_ref[...]
    h2 = jnp.maximum(h2, 0.0)
    logits = jnp.dot(h2.astype(jnp.bfloat16), w3_ref[...],
                     preferred_element_type=jnp.float32) + b3_ref[...]

    # padded class lanes carry a -1e30 bias -> exp() == 0, so softmax over the
    # full lane-dense slab equals softmax over the real C classes.
    m = jnp.max(logits, axis=1, keepdims=True)
    e = jnp.exp(logits - m)
    denom = jnp.sum(e, axis=1, keepdims=True)
    out_ref[...] = e * pl.reciprocal(denom, approx=True)


def dan_forward(word_indices, emb_table, w1, b1, w2, b2, w3, b3, *,
                batch_tile=None, row_group=8):
    B, S = word_indices.shape
    V, D = emb_table.shape
    H1 = w1.shape[1]
    H2 = w2.shape[1]
    C = w3.shape[1]

    if batch_tile is None:
        # 256 fills v6e's 256-deep MXU; only use it when the grid still has
        # >= 2 steps so both v7x TensorCores get work. Otherwise 128 (v5e MXU).
        batch_tile = 256 if B >= 512 else 128
    assert batch_tile % row_group == 0

    f32 = jnp.float32
    bf16 = jnp.bfloat16
    D_pad = _round_up(D, 128)
    H1_pad = _round_up(H1, 128)
    H2_pad = _round_up(H2, 128)
    C_pad = 128                                  # lane-dense output slab
    V_pad = _round_up(V, 8)
    B_pad = _round_up(B, batch_tile)

    # ---- pad parameters once in the wrapper (zeros are exact no-ops) ------------
    # Table stays f32 (exact gather accumulation); MLP weights go bf16 for the MXU.
    table_p = jnp.zeros((V_pad, D_pad), f32).at[:V, :D].set(emb_table.astype(f32))
    w1_p = (jnp.zeros((D_pad, H1_pad), f32)
            .at[:D, :H1].set(w1.astype(f32) / S)          # fold mean scale (S exact)
            .astype(bf16))
    b1_p = jnp.zeros((1, H1_pad), f32).at[:, :H1].set(b1.astype(f32))
    w2_p = jnp.zeros((H1_pad, H2_pad), f32).at[:H1, :H2].set(w2.astype(f32)).astype(bf16)
    b2_p = jnp.zeros((1, H2_pad), f32).at[:, :H2].set(b2.astype(f32))
    w3_p = jnp.zeros((H2_pad, C_pad), f32).at[:H2, :C].set(w3.astype(f32)).astype(bf16)
    b3_p = jnp.full((1, C_pad), -1e30, f32).at[:, :C].set(b3.astype(f32))

    # Flattened (1-D) indices -> compact SMEM footprint for scalar prefetch.
    idx_flat = (jnp.zeros((B_pad * S,), jnp.int32)
                .at[:B * S].set(word_indices.astype(jnp.int32).reshape(-1)))

    grid = (B_pad // batch_tile,)

    # ---- generation-aware VMEM budget (~72% of physical per-core capacity) ------
    try:
        vmem_cap = int(pltpu.get_tpu_info().vmem_capacity_bytes)
    except Exception:
        vmem_cap = 128 << 20
    vmem_limit = max(int(vmem_cap * 0.72), 16 << 20)

    kernel = functools.partial(dan_kernel, seq_len=S, row_group=row_group)

    out = pl.pallas_call(
        kernel,
        out_shape=jax.ShapeDtypeStruct((B_pad, C_pad), jnp.float32),
        grid_spec=pltpu.PrefetchScalarGridSpec(
            num_scalar_prefetch=1,
            grid=grid,
            in_specs=[
                pl.BlockSpec((V_pad, D_pad), lambda i, idx: (0, 0)),    # embedding table (resident)
                pl.BlockSpec((D_pad, H1_pad), lambda i, idx: (0, 0)),   # w1 bf16 (mean-scaled)
                pl.BlockSpec((1, H1_pad), lambda i, idx: (0, 0)),       # b1 f32
                pl.BlockSpec((H1_pad, H2_pad), lambda i, idx: (0, 0)),  # w2 bf16
                pl.BlockSpec((1, H2_pad), lambda i, idx: (0, 0)),       # b2 f32
                pl.BlockSpec((H2_pad, C_pad), lambda i, idx: (0, 0)),   # w3 bf16
                pl.BlockSpec((1, C_pad), lambda i, idx: (0, 0)),        # b3 f32 (-1e30 pad)
            ],
            out_specs=pl.BlockSpec((batch_tile, C_pad), lambda i, idx: (i, 0)),
            scratch_shapes=[pltpu.VMEM((batch_tile, D_pad), jnp.float32)],
        ),
        compiler_params=pltpu.CompilerParams(
            dimension_semantics=("parallel",),
            vmem_limit_bytes=vmem_limit,
        ),
    )(idx_flat, table_p, w1_p, b1_p, w2_p, b2_p, w3_p, b3_p)

    return out[:B, :C]


if __name__ == "__main__":
    # Small shapes consistent with the module defaults (embed/size1/size2 = 300,
    # 2 classes); vocab and batch scaled down from 14923 / full dataset.
    B, S = 200, 8
    V, D = 512, 300
    H1, H2 = 300, 300
    C = 2

    key = jax.random.PRNGKey(0)
    k_idx, k_emb, k_w1, k_b1, k_w2, k_b2, k_w3, k_b3 = jax.random.split(key, 8)

    word_indices = jax.random.randint(k_idx, (B, S), 0, V, dtype=jnp.int32)
    emb_table = jax.random.normal(k_emb, (V, D), dtype=jnp.float32) * 0.1

    # Weights stored [in, out] = torch Linear weight.T
    w1 = jax.random.normal(k_w1, (D, H1), dtype=jnp.float32) * 0.05
    b1 = jax.random.normal(k_b1, (1, H1), dtype=jnp.float32) * 0.01
    w2 = jax.random.normal(k_w2, (H1, H2), dtype=jnp.float32) * 0.05
    b2 = jax.random.normal(k_b2, (1, H2), dtype=jnp.float32) * 0.01
    w3 = jax.random.normal(k_w3, (H2, C), dtype=jnp.float32) * 0.05
    b3 = jax.random.normal(k_b3, (1, C), dtype=jnp.float32) * 0.01

    probs = dan_forward(word_indices, emb_table, w1, b1, w2, b2, w3, b3)
    probs = jax.block_until_ready(probs)

    # Reference in plain JAX f32 (eval mode: dropout = identity; the module's
    # "log_softmax" attribute is nn.Softmax(dim=1)).
    emb = jnp.take(emb_table, word_indices, axis=0)
    mv = emb.mean(axis=1)
    h1 = jnp.maximum(mv @ w1 + b1, 0.0)
    h2 = jnp.maximum(h1 @ w2 + b2, 0.0)
    logits = h2 @ w3 + b3
    ref = jax.nn.softmax(logits, axis=1)

    assert probs.shape == (B, C)
    max_err = float(jnp.max(jnp.abs(probs - ref)))
    # Tolerance accounts for bf16 MXU matmuls (f32 accumulation) + approx
    # reciprocal in the softmax; probabilities are O(1) so 2e-3 is tight.
    assert jnp.allclose(probs, ref, atol=2e-3, rtol=2e-3), f"max abs err = {max_err}"
    print("KERNEL_OK")
</pallas_src>

<mosaic_0001>
module attributes {stable_mosaic.version = 11 : i64} {
  func.func @dan_kernel(%arg0: i32, %arg1: memref<2048xi32, #tpu.memory_space<smem>>, %arg2: memref<512x384xf32, #tpu.memory_space<vmem>>, %arg3: memref<384x384xbf16, #tpu.memory_space<vmem>>, %arg4: memref<1x384xf32, #tpu.memory_space<vmem>>, %arg5: memref<384x384xbf16, #tpu.memory_space<vmem>>, %arg6: memref<1x384xf32, #tpu.memory_space<vmem>>, %arg7: memref<384x128xbf16, #tpu.memory_space<vmem>>, %arg8: memref<1x128xf32, #tpu.memory_space<vmem>>, %arg9: memref<128x128xf32, #tpu.memory_space<vmem>>, %arg10: memref<128x384xf32, #tpu.memory_space<vmem>>) attributes {dimension_semantics = [#tpu.dimension_semantics<parallel>], iteration_bounds = array<i64: 2>, scalar_prefetch = 1 : i64, scratch_operands = 1 : i64, tpu.core_type = #tpu.core_type<tc>, window_params = [{pipeline_mode = #tpu.pipeline_mode<synchronous>, transform_indices = @transform_0, window_bounds = array<i64: 512, 384>}, {pipeline_mode = #tpu.pipeline_mode<synchronous>, transform_indices = @transform_1, window_bounds = array<i64: 384, 384>}, {pipeline_mode = #tpu.pipeline_mode<synchronous>, transform_indices = @transform_2, window_bounds = array<i64: 1, 384>}, {pipeline_mode = #tpu.pipeline_mode<synchronous>, transform_indices = @transform_3, window_bounds = array<i64: 384, 384>}, {pipeline_mode = #tpu.pipeline_mode<synchronous>, transform_indices = @transform_4, window_bounds = array<i64: 1, 384>}, {pipeline_mode = #tpu.pipeline_mode<synchronous>, transform_indices = @transform_5, window_bounds = array<i64: 384, 128>}, {pipeline_mode = #tpu.pipeline_mode<synchronous>, transform_indices = @transform_6, window_bounds = array<i64: 1, 128>}, {transform_indices = @transform_7, window_bounds = array<i64: 128, 128>}]} {
    %c128_i32 = arith.constant 128 : i32
    %0 = arith.muli %arg0, %c128_i32 : i32
    %c0_i32 = arith.constant 0 : i32
    %c16_i32 = arith.constant 16 : i32
    %1 = arith.addi %c0_i32, %c16_i32 : i32
    %c1_i32 = arith.constant 1 : i32
    scf.for %arg11 = %c0_i32 to %1 step %c1_i32  : i32 {
      %c8_i32 = arith.constant 8 : i32
      %36 = arith.muli %arg11, %c8_i32 : i32
      %37 = tpu.assume_multiple %36, 8 : i32
      %38 = arith.addi %0, %37 : i32
      %c0_i32_22 = arith.constant 0 : i32
      %39 = arith.addi %38, %c0_i32_22 : i32
      %c8_i32_23 = arith.constant 8 : i32
      %40 = arith.muli %39, %c8_i32_23 : i32
      %c0_i32_24 = arith.constant 0 : i32
      %41 = arith.addi %40, %c0_i32_24 : i32
      %42 = arith.index_cast %41 : i32 to index
      %43 = memref.load %arg1[%42] : memref<2048xi32, #tpu.memory_space<smem>>
      %44 = arith.index_cast %43 : i32 to index
      %c0_25 = arith.constant 0 : index
      %45 = vector.load %arg2[%44, %c0_25] : memref<512x384xf32, #tpu.memory_space<vmem>>, vector<1x384xf32>
      %c1_i32_26 = arith.constant 1 : i32
      %46 = arith.addi %40, %c1_i32_26 : i32
      %47 = arith.index_cast %46 : i32 to index
      %48 = memref.load %arg1[%47] : memref<2048xi32, #tpu.memory_space<smem>>
      %49 = arith.index_cast %48 : i32 to index
      %c0_27 = arith.constant 0 : index
      %50 = vector.load %arg2[%49, %c0_27] : memref<512x384xf32, #tpu.memory_space<vmem>>, vector<1x384xf32>
      %c2_i32 = arith.constant 2 : i32
      %51 = arith.addi %40, %c2_i32 : i32
      %52 = arith.index_cast %51 : i32 to index
      %53 = memref.load %arg1[%52] : memref<2048xi32, #tpu.memory_space<smem>>
      %54 = arith.index_cast %53 : i32 to index
      %c0_28 = arith.constant 0 : index
      %55 = vector.load %arg2[%54, %c0_28] : memref<512x384xf32, #tpu.memory_space<vmem>>, vector<1x384xf32>
      %c3_i32 = arith.constant 3 : i32
      %56 = arith.addi %40, %c3_i32 : i32
      %57 = arith.index_cast %56 : i32 to index
      %58 = memref.load %arg1[%57] : memref<2048xi32, #tpu.memory_space<smem>>
      %59 = arith.index_cast %58 : i32 to index
      %c0_29 = arith.constant 0 : index
      %60 = vector.load %arg2[%59, %c0_29] : memref<512x384xf32, #tpu.memory_space<vmem>>, vector<1x384xf32>
      %c4_i32 = arith.constant 4 : i32
      %61 = arith.addi %40, %c4_i32 : i32
      %62 = arith.index_cast %61 : i32 to index
      %63 = memref.load %arg1[%62] : memref<2048xi32, #tpu.memory_space<smem>>
      %64 = arith.index_cast %63 : i32 to index
      %c0_30 = arith.constant 0 : index
      %65 = vector.load %arg2[%64, %c0_30] : memref<512x384xf32, #tpu.memory_space<vmem>>, vector<1x384xf32>
      %c5_i32 = arith.constant 5 : i32
      %66 = arith.addi %40, %c5_i32 : i32
      %67 = arith.index_cast %66 : i32 to index
      %68 = memref.load %arg1[%67] : memref<2048xi32, #tpu.memory_space<smem>>
      %69 = arith.index_cast %68 : i32 to index
      %c0_31 = arith.constant 0 : index
      %70 = vector.load %arg2[%69, %c0_31] : memref<512x384xf32, #tpu.memory_space<vmem>>, vector<1x384xf32>
      %c6_i32 = arith.constant 6 : i32
      %71 = arith.addi %40, %c6_i32 : i32
      %72 = arith.index_cast %71 : i32 to index
      %73 = memref.load %arg1[%72] : memref<2048xi32, #tpu.memory_space<smem>>
      %74 = arith.index_cast %73 : i32 to index
      %c0_32 = arith.constant 0 : index
      %75 = vector.load %arg2[%74, %c0_32] : memref<512x384xf32, #tpu.memory_space<vmem>>, vector<1x384xf32>
      %c7_i32 = arith.constant 7 : i32
      %76 = arith.addi %40, %c7_i32 : i32
      %77 = arith.index_cast %76 : i32 to index
      %78 = memref.load %arg1[%77] : memref<2048xi32, #tpu.memory_space<smem>>
      %79 = arith.index_cast %78 : i32 to index
      %c0_33 = arith.constant 0 : index
      %80 = vector.load %arg2[%79, %c0_33] : memref<512x384xf32, #tpu.memory_space<vmem>>, vector<1x384xf32>
      %81 = arith.addf %45, %50 : vector<1x384xf32>
      %82 = arith.addf %55, %60 : vector<1x384xf32>
      %83 = arith.addf %65, %70 : vector<1x384xf32>
      %84 = arith.addf %75, %80 : vector<1x384xf32>
      %85 = arith.addf %81, %82 : vector<1x384xf32>
      %86 = arith.addf %83, %84 : vector<1x384xf32>
      %87 = arith.addf %85, %86 : vector<1x384xf32>
      %88 = arith.addi %0, %37 : i32
      %c1_i32_34 = arith.constant 1 : i32
      %89 = arith.addi %88, %c1_i32_34 : i32
      %c8_i32_35 = arith.constant 8 : i32
      %90 = arith.muli %89, %c8_i32_35 : i32
      %c0_i32_36 = arith.constant 0 : i32
      %91 = arith.addi %90, %c0_i32_36 : i32
      %92 = arith.index_cast %91 : i32 to index
      %93 = memref.load %arg1[%92] : memref<2048xi32, #tpu.memory_space<smem>>
      %94 = arith.index_cast %93 : i32 to index
      %c0_37 = arith.constant 0 : index
      %95 = vector.load %arg2[%94, %c0_37] : memref<512x384xf32, #tpu.memory_space<vmem>>, vector<1x384xf32>
      %c1_i32_38 = arith.constant 1 : i32
      %96 = arith.addi %90, %c1_i32_38 : i32
      %97 = arith.index_cast %96 : i32 to index
      %98 = memref.load %arg1[%97] : memref<2048xi32, #tpu.memory_space<smem>>
      %99 = arith.index_cast %98 : i32 to index
      %c0_39 = arith.constant 0 : index
      %100 = vector.load %arg2[%99, %c0_39] : memref<512x384xf32, #tpu.memory_space<vmem>>, vector<1x384xf32>
      %c2_i32_40 = arith.constant 2 : i32
      %101 = arith.addi %90, %c2_i32_40 : i32
      %102 = arith.index_cast %101 : i32 to index
      %103 = memref.load %arg1[%102] : memref<2048xi32, #tpu.memory_space<smem>>
      %104 = arith.index_cast %103 : i32 to index
      %c0_41 = arith.constant 0 : index
      %105 = vector.load %arg2[%104, %c0_41] : memref<512x384xf32, #tpu.memory_space<vmem>>, vector<1x384xf32>
      %c3_i32_42 = arith.constant 3 : i32
      %106 = arith.addi %90, %c3_i32_42 : i32
      %107 = arith.index_cast %106 : i32 to index
      %108 = memref.load %arg1[%107] : memref<2048xi32, #tpu.memory_space<smem>>
      %109 = arith.index_cast %108 : i32 to index
      %c0_43 = arith.constant 0 : index
      %110 = vector.load %arg2[%109, %c0_43] : memref<512x384xf32, #tpu.memory_space<vmem>>, vector<1x384xf32>
      %c4_i32_44 = arith.constant 4 : i32
      %111 = arith.addi %90, %c4_i32_44 : i32
      %112 = arith.index_cast %111 : i32 to index
      %113 = memref.load %arg1[%112] : memref<2048xi32, #tpu.memory_space<smem>>
      %114 = arith.index_cast %113 : i32 to index
      %c0_45 = arith.constant 0 : index
      %115 = vector.load %arg2[%114, %c0_45] : memref<512x384xf32, #tpu.memory_space<vmem>>, vector<1x384xf32>
      %c5_i32_46 = arith.constant 5 : i32
      %116 = arith.addi %90, %c5_i32_46 : i32
      %117 = arith.index_cast %116 : i32 to index
      %118 = memref.load %arg1[%117] : memref<2048xi32, #tpu.memory_space<smem>>
      %119 = arith.index_cast %118 : i32 to index
      %c0_47 = arith.constant 0 : index
      %120 = vector.load %arg2[%119, %c0_47] : memref<512x384xf32, #tpu.memory_space<vmem>>, vector<1x384xf32>
      %c6_i32_48 = arith.constant 6 : i32
      %121 = arith.addi %90, %c6_i32_48 : i32
      %122 = arith.index_cast %121 : i32 to index
      %123 = memref.load %arg1[%122] : memref<2048xi32, #tpu.memory_space<smem>>
      %124 = arith.index_cast %123 : i32 to index
      %c0_49 = arith.constant 0 : index
      %125 = vector.load %arg2[%124, %c0_49] : memref<512x384xf32, #tpu.memory_space<vmem>>, vector<1x384xf32>
      %c7_i32_50 = arith.constant 7 : i32
      %126 = arith.addi %90, %c7_i32_50 : i32
      %127 = arith.index_cast %126 : i32 to index
      %128 = memref.load %arg1[%127] : memref<2048xi32, #tpu.memory_space<smem>>
      %129 = arith.index_cast %128 : i32 to index
      %c0_51 = arith.constant 0 : index
      %130 = vector.load %arg2[%129, %c0_51] : memref<512x384xf32, #tpu.memory_space<vmem>>, vector<1x384xf32>
      %131 = arith.addf %95, %100 : vector<1x384xf32>
      %132 = arith.addf %105, %110 : vector<1x384xf32>
      %133 = arith.addf %115, %120 : vector<1x384xf32>
      %134 = arith.addf %125, %130 : vector<1x384xf32>
      %135 = arith.addf %131, %132 : vector<1x384xf32>
      %136 = arith.addf %133, %134 : vector<1x384xf32>
      %137 = arith.addf %135, %136 : vector<1x384xf32>
      %138 = arith.addi %0, %37 : i32
      %c2_i32_52 = arith.constant 2 : i32
      %139 = arith.addi %138, %c2_i32_52 : i32
      %c8_i32_53 = arith.constant 8 : i32
      %140 = arith.muli %139, %c8_i32_53 : i32
      %c0_i32_54 = arith.constant 0 : i32
      %141 = arith.addi %140, %c0_i32_54 : i32
      %142 = arith.index_cast %141 : i32 to index
      %143 = memref.load %arg1[%142] : memref<2048xi32, #tpu.memory_space<smem>>
      %144 = arith.index_cast %143 : i32 to index
      %c0_55 = arith.constant 0 : index
      %145 = vector.load %arg2[%144, %c0_55] : memref<512x384xf32, #tpu.memory_space<vmem>>, vector<1x384xf32>
      %c1_i32_56 = arith.constant 1 : i32
      %146 = arith.addi %140, %c1_i32_56 : i32
      %147 = arith.index_cast %146 : i32 to index
      %148 = memref.load %arg1[%147] : memref<2048xi32, #tpu.memory_space<smem>>
      %149 = arith.index_cast %148 : i32 to index
      %c0_57 = arith.constant 0 : index
      %150 = vector.load %arg2[%149, %c0_57] : memref<512x384xf32, #tpu.memory_space<vmem>>, vector<1x384xf32>
      %c2_i32_58 = arith.constant 2 : i32
      %151 = arith.addi %140, %c2_i32_58 : i32
      %152 = arith.index_cast %151 : i32 to index
      %153 = memref.load %arg1[%152] : memref<2048xi32, #tpu.memory_space<smem>>
      %154 = arith.index_cast %153 : i32 to index
      %c0_59 = arith.constant 0 : index
      %155 = vector.load %arg2[%154, %c0_59] : memref<512x384xf32, #tpu.memory_space<vmem>>, vector<1x384xf32>
      %c3_i32_60 = arith.constant 3 : i32
      %156 = arith.addi %140, %c3_i32_60 : i32
      %157 = arith.index_cast %156 : i32 to index
      %158 = memref.load %arg1[%157] : memref<2048xi32, #tpu.memory_space<smem>>
      %159 = arith.index_cast %158 : i32 to index
      %c0_61 = arith.constant 0 : index
      %160 = vector.load %arg2[%159, %c0_61] : memref<512x384xf32, #tpu.memory_space<vmem>>, vector<1x384xf32>
      %c4_i32_62 = arith.constant 4 : i32
      %161 = arith.addi %140, %c4_i32_62 : i32
      %162 = arith.index_cast %161 : i32 to index
      %163 = memref.load %arg1[%162] : memref<2048xi32, #tpu.memory_space<smem>>
      %164 = arith.index_cast %163 : i32 to index
      %c0_63 = arith.constant 0 : index
      %165 = vector.load %arg2[%164, %c0_63] : memref<512x384xf32, #tpu.memory_space<vmem>>, vector<1x384xf32>
      %c5_i32_64 = arith.constant 5 : i32
      %166 = arith.addi %140, %c5_i32_64 : i32
      %167 = arith.index_cast %166 : i32 to index
      %168 = memref.load %arg1[%167] : memref<2048xi32, #tpu.memory_space<smem>>
      %169 = arith.index_cast %168 : i32 to index
      %c0_65 = arith.constant 0 : index
      %170 = vector.load %arg2[%169, %c0_65] : memref<512x384xf32, #tpu.memory_space<vmem>>, vector<1x384xf32>
      %c6_i32_66 = arith.constant 6 : i32
      %171 = arith.addi %140, %c6_i32_66 : i32
      %172 = arith.index_cast %171 : i32 to index
      %173 = memref.load %arg1[%172] : memref<2048xi32, #tpu.memory_space<smem>>
      %174 = arith.index_cast %173 : i32 to index
      %c0_67 = arith.constant 0 : index
      %175 = vector.load %arg2[%174, %c0_67] : memref<512x384xf32, #tpu.memory_space<vmem>>, vector<1x384xf32>
      %c7_i32_68 = arith.constant 7 : i32
      %176 = arith.addi %140, %c7_i32_68 : i32
      %177 = arith.index_cast %176 : i32 to index
      %178 = memref.load %arg1[%177] : memref<2048xi32, #tpu.memory_space<smem>>
      %179 = arith.index_cast %178 : i32 to index
      %c0_69 = arith.constant 0 : index
      %180 = vector.load %arg2[%179, %c0_69] : memref<512x384xf32, #tpu.memory_space<vmem>>, vector<1x384xf32>
      %181 = arith.addf %145, %150 : vector<1x384xf32>
      %182 = arith.addf %155, %160 : vector<1x384xf32>
      %183 = arith.addf %165, %170 : vector<1x384xf32>
      %184 = arith.addf %175, %180 : vector<1x384xf32>
      %185 = arith.addf %181, %182 : vector<1x384xf32>
      %186 = arith.addf %183, %184 : vector<1x384xf32>
      %187 = arith.addf %185, %186 : vector<1x384xf32>
      %188 = arith.addi %0, %37 : i32
      %c3_i32_70 = arith.constant 3 : i32
      %189 = arith.addi %188, %c3_i32_70 : i32
      %c8_i32_71 = arith.constant 8 : i32
      %190 = arith.muli %189, %c8_i32_71 : i32
      %c0_i32_72 = arith.constant 0 : i32
      %191 = arith.addi %190, %c0_i32_72 : i32
      %192 = arith.index_cast %191 : i32 to index
      %193 = memref.load %arg1[%192] : memref<2048xi32, #tpu.memory_space<smem>>
      %194 = arith.index_cast %193 : i32 to index
      %c0_73 = arith.constant 0 : index
      %195 = vector.load %arg2[%194, %c0_73] : memref<512x384xf32, #tpu.memory_space<vmem>>, vector<1x384xf32>
      %c1_i32_74 = arith.constant 1 : i32
      %196 = arith.addi %190, %c1_i32_74 : i32
      %197 = arith.index_cast %196 : i32 to index
      %198 = memref.load %arg1[%197] : memref<2048xi32, #tpu.memory_space<smem>>
      %199 = arith.index_cast %198 : i32 to index
      %c0_75 = arith.constant 0 : index
      %200 = vector.load %arg2[%199, %c0_75] : memref<512x384xf32, #tpu.memory_space<vmem>>, vector<1x384xf32>
      %c2_i32_76 = arith.constant 2 : i32
      %201 = arith.addi %190, %c2_i32_76 : i32
      %202 = arith.index_cast %201 : i32 to index
      %203 = memref.load %arg1[%202] : memref<2048xi32, #tpu.memory_space<smem>>
      %204 = arith.index_cast %203 : i32 to index
      %c0_77 = arith.constant 0 : index
      %205 = vector.load %arg2[%204, %c0_77] : memref<512x384xf32, #tpu.memory_space<vmem>>, vector<1x384xf32>
      %c3_i32_78 = arith.constant 3 : i32
      %206 = arith.addi %190, %c3_i32_78 : i32
      %207 = arith.index_cast %206 : i32 to index
      %208 = memref.load %arg1[%207] : memref<2048xi32, #tpu.memory_space<smem>>
      %209 = arith.index_cast %208 : i32 to index
      %c0_79 = arith.constant 0 : index
      %210 = vector.load %arg2[%209, %c0_79] : memref<512x384xf32, #tpu.memory_space<vmem>>, vector<1x384xf32>
      %c4_i32_80 = arith.constant 4 : i32
      %211 = arith.addi %190, %c4_i32_80 : i32
      %212 = arith.index_cast %211 : i32 to index
      %213 = memref.load %arg1[%212] : memref<2048xi32, #tpu.memory_space<smem>>
      %214 = arith.index_cast %213 : i32 to index
      %c0_81 = arith.constant 0 : index
      %215 = vector.load %arg2[%214, %c0_81] : memref<512x384xf32, #tpu.memory_space<vmem>>, vector<1x384xf32>
      %c5_i32_82 = arith.constant 5 : i32
      %216 = arith.addi %190, %c5_i32_82 : i32
      %217 = arith.index_cast %216 : i32 to index
      %218 = memref.load %arg1[%217] : memref<2048xi32, #tpu.memory_space<smem>>
      %219 = arith.index_cast %218 : i32 to index
      %c0_83 = arith.constant 0 : index
      %220 = vector.load %arg2[%219, %c0_83] : memref<512x384xf32, #tpu.memory_space<vmem>>, vector<1x384xf32>
      %c6_i32_84 = arith.constant 6 : i32
      %221 = arith.addi %190, %c6_i32_84 : i32
      %222 = arith.index_cast %221 : i32 to index
      %223 = memref.load %arg1[%222] : memref<2048xi32, #tpu.memory_space<smem>>
      %224 = arith.index_cast %223 : i32 to index
      %c0_85 = arith.constant 0 : index
      %225 = vector.load %arg2[%224, %c0_85] : memref<512x384xf32, #tpu.memory_space<vmem>>, vector<1x384xf32>
      %c7_i32_86 = arith.constant 7 : i32
      %226 = arith.addi %190, %c7_i32_86 : i32
      %227 = arith.index_cast %226 : i32 to index
      %228 = memref.load %arg1[%227] : memref<2048xi32, #tpu.memory_space<smem>>
      %229 = arith.index_cast %228 : i32 to index
      %c0_87 = arith.constant 0 : index
      %230 = vector.load %arg2[%229, %c0_87] : memref<512x384xf32, #tpu.memory_space<vmem>>, vector<1x384xf32>
      %231 = arith.addf %195, %200 : vector<1x384xf32>
      %232 = arith.addf %205, %210 : vector<1x384xf32>
      %233 = arith.addf %215, %220 : vector<1x384xf32>
      %234 = arith.addf %225, %230 : vector<1x384xf32>
      %235 = arith.addf %231, %232 : vector<1x384xf32>
      %236 = arith.addf %233, %234 : vector<1x384xf32>
      %237 = arith.addf %235, %236 : vector<1x384xf32>
      %238 = arith.addi %0, %37 : i32
      %c4_i32_88 = arith.constant 4 : i32
      %239 = arith.addi %238, %c4_i32_88 : i32
      %c8_i32_89 = arith.constant 8 : i32
      %240 = arith.muli %239, %c8_i32_89 : i32
      %c0_i32_90 = arith.constant 0 : i32
      %241 = arith.addi %240, %c0_i32_90 : i32
      %242 = arith.index_cast %241 : i32 to index
      %243 = memref.load %arg1[%242] : memref<2048xi32, #tpu.memory_space<smem>>
      %244 = arith.index_cast %243 : i32 to index
      %c0_91 = arith.constant 0 : index
      %245 = vector.load %arg2[%244, %c0_91] : memref<512x384xf32, #tpu.memory_space<vmem>>, vector<1x384xf32>
      %c1_i32_92 = arith.constant 1 : i32
      %246 = arith.addi %240, %c1_i32_92 : i32
      %247 = arith.index_cast %246 : i32 to index
      %248 = memref.load %arg1[%247] : memref<2048xi32, #tpu.memory_space<smem>>
      %249 = arith.index_cast %248 : i32 to index
      %c0_93 = arith.constant 0 : index
      %250 = vector.load %arg2[%249, %c0_93] : memref<512x384xf32, #tpu.memory_space<vmem>>, vector<1x384xf32>
      %c2_i32_94 = arith.constant 2 : i32
      %251 = arith.addi %240, %c2_i32_94 : i32
      %252 = arith.index_cast %251 : i32 to index
      %253 = memref.load %arg1[%252] : memref<2048xi32, #tpu.memory_space<smem>>
      %254 = arith.index_cast %253 : i32 to index
      %c0_95 = arith.constant 0 : index
      %255 = vector.load %arg2[%254, %c0_95] : memref<512x384xf32, #tpu.memory_space<vmem>>, vector<1x384xf32>
      %c3_i32_96 = arith.constant 3 : i32
      %256 = arith.addi %240, %c3_i32_96 : i32
      %257 = arith.index_cast %256 : i32 to index
      %258 = memref.load %arg1[%257] : memref<2048xi32, #tpu.memory_space<smem>>
      %259 = arith.index_cast %258 : i32 to index
      %c0_97 = arith.constant 0 : index
      %260 = vector.load %arg2[%259, %c0_97] : memref<512x384xf32, #tpu.memory_space<vmem>>, vector<1x384xf32>
      %c4_i32_98 = arith.constant 4 : i32
      %261 = arith.addi %240, %c4_i32_98 : i32
      %262 = arith.index_cast %261 : i32 to index
      %263 = memref.load %arg1[%262] : memref<2048xi32, #tpu.memory_space<smem>>
      %264 = arith.index_cast %263 : i32 to index
      %c0_99 = arith.constant 0 : index
      %265 = vector.load %arg2[%264, %c0_99] : memref<512x384xf32, #tpu.memory_space<vmem>>, vector<1x384xf32>
      %c5_i32_100 = arith.constant 5 : i32
      %266 = arith.addi %240, %c5_i32_100 : i32
      %267 = arith.index_cast %266 : i32 to index
      %268 = memref.load %arg1[%267] : memref<2048xi32, #tpu.memory_space<smem>>
      %269 = arith.index_cast %268 : i32 to index
      %c0_101 = arith.constant 0 : index
      %270 = vector.load %arg2[%269, %c0_101] : memref<512x384xf32, #tpu.memory_space<vmem>>, vector<1x384xf32>
      %c6_i32_102 = arith.constant 6 : i32
      %271 = arith.addi %240, %c6_i32_102 : i32
      %272 = arith.index_cast %271 : i32 to index
      %273 = memref.load %arg1[%272] : memref<2048xi32, #tpu.memory_space<smem>>
      %274 = arith.index_cast %273 : i32 to index
      %c0_103 = arith.constant 0 : index
      %275 = vector.load %arg2[%274, %c0_103] : memref<512x384xf32, #tpu.memory_space<vmem>>, vector<1x384xf32>
      %c7_i32_104 = arith.constant 7 : i32
      %276 = arith.addi %240, %c7_i32_104 : i32
      %277 = arith.index_cast %276 : i32 to index
      %278 = memref.load %arg1[%277] : memref<2048xi32, #tpu.memory_space<smem>>
      %279 = arith.index_cast %278 : i32 to index
      %c0_105 = arith.constant 0 : index
      %280 = vector.load %arg2[%279, %c0_105] : memref<512x384xf32, #tpu.memory_space<vmem>>, vector<1x384xf32>
      %281 = arith.addf %245, %250 : vector<1x384xf32>
      %282 = arith.addf %255, %260 : vector<1x384xf32>
      %283 = arith.addf %265, %270 : vector<1x384xf32>
      %284 = arith.addf %275, %280 : vector<1x384xf32>
      %285 = arith.addf %281, %282 : vector<1x384xf32>
      %286 = arith.addf %283, %284 : vector<1x384xf32>
      %287 = arith.addf %285, %286 : vector<1x384xf32>
      %288 = arith.addi %0, %37 : i32
      %c5_i32_106 = arith.constant 5 : i32
      %289 = arith.addi %288, %c5_i32_106 : i32
      %c8_i32_107 = arith.constant 8 : i32
      %290 = arith.muli %289, %c8_i32_107 : i32
      %c0_i32_108 = arith.constant 0 : i32
      %291 = arith.addi %290, %c0_i32_108 : i32
      %292 = arith.index_cast %291 : i32 to index
      %293 = memref.load %arg1[%292] : memref<2048xi32, #tpu.memory_space<smem>>
      %294 = arith.index_cast %293 : i32 to index
      %c0_109 = arith.constant 0 : index
      %295 = vector.load %arg2[%294, %c0_109] : memref<512x384xf32, #tpu.memory_space<vmem>>, vector<1x384xf32>
      %c1_i32_110 = arith.constant 1 : i32
      %296 = arith.addi %290, %c1_i32_110 : i32
      %297 = arith.index_cast %296 : i32 to index
      %298 = memref.load %arg1[%297] : memref<2048xi32, #tpu.memory_space<smem>>
      %299 = arith.index_cast %298 : i32 to index
      %c0_111 = arith.constant 0 : index
      %300 = vector.load %arg2[%299, %c0_111] : memref<512x384xf32, #tpu.memory_space<vmem>>, vector<1x384xf32>
      %c2_i32_112 = arith.constant 2 : i32
      %301 = arith.addi %290, %c2_i32_112 : i32
      %302 = arith.index_cast %301 : i32 to index
      %303 = memref.load %arg1[%302] : memref<2048xi32, #tpu.memory_space<smem>>
      %304 = arith.index_cast %303 : i32 to index
      %c0_113 = arith.constant 0 : index
      %305 = vector.load %arg2[%304, %c0_113] : memref<512x384xf32, #tpu.memory_space<vmem>>, vector<1x384xf32>
      %c3_i32_114 = arith.constant 3 : i32
      %306 = arith.addi %290, %c3_i32_114 : i32
      %307 = arith.index_cast %306 : i32 to index
      %308 = memref.load %arg1[%307] : memref<2048xi32, #tpu.memory_space<smem>>
      %309 = arith.index_cast %308 : i32 to index
      %c0_115 = arith.constant 0 : index
      %310 = vector.load %arg2[%309, %c0_115] : memref<512x384xf32, #tpu.memory_space<vmem>>, vector<1x384xf32>
      %c4_i32_116 = arith.constant 4 : i32
      %311 = arith.addi %290, %c4_i32_116 : i32
      %312 = arith.index_cast %311 : i32 to index
      %313 = memref.load %arg1[%312] : memref<2048xi32, #tpu.memory_space<smem>>
      %314 = arith.index_cast %313 : i32 to index
      %c0_117 = arith.constant 0 : index
      %315 = vector.load %arg2[%314, %c0_117] : memref<512x384xf32, #tpu.memory_space<vmem>>, vector<1x384xf32>
      %c5_i32_118 = arith.constant 5 : i32
      %316 = arith.addi %290, %c5_i32_118 : i32
      %317 = arith.index_cast %316 : i32 to index
      %318 = memref.load %arg1[%317] : memref<2048xi32, #tpu.memory_space<smem>>
      %319 = arith.index_cast %318 : i32 to index
      %c0_119 = arith.constant 0 : index
      %320 = vector.load %arg2[%319, %c0_119] : memref<512x384xf32, #tpu.memory_space<vmem>>, vector<1x384xf32>
      %c6_i32_120 = arith.constant 6 : i32
      %321 = arith.addi %290, %c6_i32_120 : i32
      %322 = arith.index_cast %321 : i32 to index
      %323 = memref.load %arg1[%322] : memref<2048xi32, #tpu.memory_space<smem>>
      %324 = arith.index_cast %323 : i32 to index
      %c0_121 = arith.constant 0 : index
      %325 = vector.load %arg2[%324, %c0_121] : memref<512x384xf32, #tpu.memory_space<vmem>>, vector<1x384xf32>
      %c7_i32_122 = arith.constant 7 : i32
      %326 = arith.addi %290, %c7_i32_122 : i32
      %327 = arith.index_cast %326 : i32 to index
      %328 = memref.load %arg1[%327] : memref<2048xi32, #tpu.memory_space<smem>>
      %329 = arith.index_cast %328 : i32 to index
      %c0_123 = arith.constant 0 : index
      %330 = vector.load %arg2[%329, %c0_123] : memref<512x384xf32, #tpu.memory_space<vmem>>, vector<1x384xf32>
      %331 = arith.addf %295, %300 : vector<1x384xf32>
      %332 = arith.addf %305, %310 : vector<1x384xf32>
      %333 = arith.addf %315, %320 : vector<1x384xf32>
      %334 = arith.addf %325, %330 : vector<1x384xf32>
      %335 = arith.addf %331, %332 : vector<1x384xf32>
      %336 = arith.addf %333, %334 : vector<1x384xf32>
      %337 = arith.addf %335, %336 : vector<1x384xf32>
      %338 = arith.addi %0, %37 : i32
      %c6_i32_124 = arith.constant 6 : i32
      %339 = arith.addi %338, %c6_i32_124 : i32
      %c8_i32_125 = arith.constant 8 : i32
      %340 = arith.muli %339, %c8_i32_125 : i32
      %c0_i32_126 = arith.constant 0 : i32
      %341 = arith.addi %340, %c0_i32_126 : i32
      %342 = arith.index_cast %341 : i32 to index
      %343 = memref.load %arg1[%342] : memref<2048xi32, #tpu.memory_space<smem>>
      %344 = arith.index_cast %343 : i32 to index
      %c0_127 = arith.constant 0 : index
      %345 = vector.load %arg2[%344, %c0_127] : memref<512x384xf32, #tpu.memory_space<vmem>>, vector<1x384xf32>
      %c1_i32_128 = arith.constant 1 : i32
      %346 = arith.addi %340, %c1_i32_128 : i32
      %347 = arith.index_cast %346 : i32 to index
      %348 = memref.load %arg1[%347] : memref<2048xi32, #tpu.memory_space<smem>>
      %349 = arith.index_cast %348 : i32 to index
      %c0_129 = arith.constant 0 : index
      %350 = vector.load %arg2[%349, %c0_129] : memref<512x384xf32, #tpu.memory_space<vmem>>, vector<1x384xf32>
      %c2_i32_130 = arith.constant 2 : i32
      %351 = arith.addi %340, %c2_i32_130 : i32
      %352 = arith.index_cast %351 : i32 to index
      %353 = memref.load %arg1[%352] : memref<2048xi32, #tpu.memory_space<smem>>
      %354 = arith.index_cast %353 : i32 to index
      %c0_131 = arith.constant 0 : index
      %355 = vector.load %arg2[%354, %c0_131] : memref<512x384xf32, #tpu.memory_space<vmem>>, vector<1x384xf32>
      %c3_i32_132 = arith.constant 3 : i32
      %356 = arith.addi %340, %c3_i32_132 : i32
      %357 = arith.index_cast %356 : i32 to index
      %358 = memref.load %arg1[%357] : memref<2048xi32, #tpu.memory_space<smem>>
      %359 = arith.index_cast %358 : i32 to index
      %c0_133 = arith.constant 0 : index
      %360 = vector.load %arg2[%359, %c0_133] : memref<512x384xf32, #tpu.memory_space<vmem>>, vector<1x384xf32>
      %c4_i32_134 = arith.constant 4 : i32
      %361 = arith.addi %340, %c4_i32_134 : i32
      %362 = arith.index_cast %361 : i32 to index
      %363 = memref.load %arg1[%362] : memref<2048xi32, #tpu.memory_space<smem>>
      %364 = arith.index_cast %363 : i32 to index
      %c0_135 = arith.constant 0 : index
      %365 = vector.load %arg2[%364, %c0_135] : memref<512x384xf32, #tpu.memory_space<vmem>>, vector<1x384xf32>
      %c5_i32_136 = arith.constant 5 : i32
      %366 = arith.addi %340, %c5_i32_136 : i32
      %367 = arith.index_cast %366 : i32 to index
      %368 = memref.load %arg1[%367] : memref<2048xi32, #tpu.memory_space<smem>>
      %369 = arith.index_cast %368 : i32 to index
      %c0_137 = arith.constant 0 : index
      %370 = vector.load %arg2[%369, %c0_137] : memref<512x384xf32, #tpu.memory_space<vmem>>, vector<1x384xf32>
      %c6_i32_138 = arith.constant 6 : i32
      %371 = arith.addi %340, %c6_i32_138 : i32
      %372 = arith.index_cast %371 : i32 to index
      %373 = memref.load %arg1[%372] : memref<2048xi32, #tpu.memory_space<smem>>
      %374 = arith.index_cast %373 : i32 to index
      %c0_139 = arith.constant 0 : index
      %375 = vector.load %arg2[%374, %c0_139] : memref<512x384xf32, #tpu.memory_space<vmem>>, vector<1x384xf32>
      %c7_i32_140 = arith.constant 7 : i32
      %376 = arith.addi %340, %c7_i32_140 : i32
      %377 = arith.index_cast %376 : i32 to index
      %378 = memref.load %arg1[%377] : memref<2048xi32, #tpu.memory_space<smem>>
      %379 = arith.index_cast %378 : i32 to index
      %c0_141 = arith.constant 0 : index
      %380 = vector.load %arg2[%379, %c0_141] : memref<512x384xf32, #tpu.memory_space<vmem>>, vector<1x384xf32>
      %381 = arith.addf %345, %350 : vector<1x384xf32>
      %382 = arith.addf %355, %360 : vector<1x384xf32>
      %383 = arith.addf %365, %370 : vector<1x384xf32>
      %384 = arith.addf %375, %380 : vector<1x384xf32>
      %385 = arith.addf %381, %382 : vector<1x384xf32>
      %386 = arith.addf %383, %384 : vector<1x384xf32>
      %387 = arith.addf %385, %386 : vector<1x384xf32>
      %388 = arith.addi %0, %37 : i32
      %c7_i32_142 = arith.constant 7 : i32
      %389 = arith.addi %388, %c7_i32_142 : i32
      %c8_i32_143 = arith.constant 8 : i32
      %390 = arith.muli %389, %c8_i32_143 : i32
      %c0_i32_144 = arith.constant 0 : i32
      %391 = arith.addi %390, %c0_i32_144 : i32
      %392 = arith.index_cast %391 : i32 to index
      %393 = memref.load %arg1[%392] : memref<2048xi32, #tpu.memory_space<smem>>
      %394 = arith.index_cast %393 : i32 to index
      %c0_145 = arith.constant 0 : index
      %395 = vector.load %arg2[%394, %c0_145] : memref<512x384xf32, #tpu.memory_space<vmem>>, vector<1x384xf32>
      %c1_i32_146 = arith.constant 1 : i32
      %396 = arith.addi %390, %c1_i32_146 : i32
      %397 = arith.index_cast %396 : i32 to index
      %398 = memref.load %arg1[%397] : memref<2048xi32, #tpu.memory_space<smem>>
      %399 = arith.index_cast %398 : i32 to index
      %c0_147 = arith.constant 0 : index
      %400 = vector.load %arg2[%399, %c0_147] : memref<512x384xf32, #tpu.memory_space<vmem>>, vector<1x384xf32>
      %c2_i32_148 = arith.constant 2 : i32
      %401 = arith.addi %390, %c2_i32_148 : i32
      %402 = arith.index_cast %401 : i32 to index
      %403 = memref.load %arg1[%402] : memref<2048xi32, #tpu.memory_space<smem>>
      %404 = arith.index_cast %403 : i32 to index
      %c0_149 = arith.constant 0 : index
      %405 = vector.load %arg2[%404, %c0_149] : memref<512x384xf32, #tpu.memory_space<vmem>>, vector<1x384xf32>
      %c3_i32_150 = arith.constant 3 : i32
      %406 = arith.addi %390, %c3_i32_150 : i32
      %407 = arith.index_cast %406 : i32 to index
      %408 = memref.load %arg1[%407] : memref<2048xi32, #tpu.memory_space<smem>>
      %409 = arith.index_cast %408 : i32 to index
      %c0_151 = arith.constant 0 : index
      %410 = vector.load %arg2[%409, %c0_151] : memref<512x384xf32, #tpu.memory_space<vmem>>, vector<1x384xf32>
      %c4_i32_152 = arith.constant 4 : i32
      %411 = arith.addi %390, %c4_i32_152 : i32
      %412 = arith.index_cast %411 : i32 to index
      %413 = memref.load %arg1[%412] : memref<2048xi32, #tpu.memory_space<smem>>
      %414 = arith.index_cast %413 : i32 to index
      %c0_153 = arith.constant 0 : index
      %415 = vector.load %arg2[%414, %c0_153] : memref<512x384xf32, #tpu.memory_space<vmem>>, vector<1x384xf32>
      %c5_i32_154 = arith.constant 5 : i32
      %416 = arith.addi %390, %c5_i32_154 : i32
      %417 = arith.index_cast %416 : i32 to index
      %418 = memref.load %arg1[%417] : memref<2048xi32, #tpu.memory_space<smem>>
      %419 = arith.index_cast %418 : i32 to index
      %c0_155 = arith.constant 0 : index
      %420 = vector.load %arg2[%419, %c0_155] : memref<512x384xf32, #tpu.memory_space<vmem>>, vector<1x384xf32>
      %c6_i32_156 = arith.constant 6 : i32
      %421 = arith.addi %390, %c6_i32_156 : i32
      %422 = arith.index_cast %421 : i32 to index
      %423 = memref.load %arg1[%422] : memref<2048xi32, #tpu.memory_space<smem>>
      %424 = arith.index_cast %423 : i32 to index
      %c0_157 = arith.constant 0 : index
      %425 = vector.load %arg2[%424, %c0_157] : memref<512x384xf32, #tpu.memory_space<vmem>>, vector<1x384xf32>
      %c7_i32_158 = arith.constant 7 : i32
      %426 = arith.addi %390, %c7_i32_158 : i32
      %427 = arith.index_cast %426 : i32 to index
      %428 = memref.load %arg1[%427] : memref<2048xi32, #tpu.memory_space<smem>>
      %429 = arith.index_cast %428 : i32 to index
      %c0_159 = arith.constant 0 : index
      %430 = vector.load %arg2[%429, %c0_159] : memref<512x384xf32, #tpu.memory_space<vmem>>, vector<1x384xf32>
      %431 = arith.addf %395, %400 : vector<1x384xf32>
      %432 = arith.addf %405, %410 : vector<1x384xf32>
      %433 = arith.addf %415, %420 : vector<1x384xf32>
      %434 = arith.addf %425, %430 : vector<1x384xf32>
      %435 = arith.addf %431, %432 : vector<1x384xf32>
      %436 = arith.addf %433, %434 : vector<1x384xf32>
      %437 = arith.addf %435, %436 : vector<1x384xf32>
      %438 = tpu.concatenate %87, %137, %187, %237, %287, %337, %387, %437 in 0 : vector<1x384xf32>, vector<1x384xf32>, vector<1x384xf32>, vector<1x384xf32>, vector<1x384xf32>, vector<1x384xf32>, vector<1x384xf32>, vector<1x384xf32> -> vector<8x384xf32>
      %439 = arith.index_cast %37 : i32 to index
      %c0_160 = arith.constant 0 : index
      %440 = vector.load %arg10[%439, %c0_160] : memref<128x384xf32, #tpu.memory_space<vmem>>, vector<8x384xf32>
      tpu.vector_store %arg10[%439, %c0_160], %438 {strides = array<i32>} : memref<128x384xf32, #tpu.memory_space<vmem>>, vector<8x384xf32>,
    }
    %c16_i32_0 = arith.constant 16 : i32
    %c0 = arith.constant 0 : index
    %c0_1 = arith.constant 0 : index
    %2 = vector.load %arg10[%c0, %c0_1] : memref<128x384xf32, #tpu.memory_space<vmem>>, vector<128x384xf32>
    %3 = arith.truncf %2 : vector<128x384xf32> to vector<128x384xbf16>
    %c0_2 = arith.constant 0 : index
    %c0_3 = arith.constant 0 : index
    %4 = vector.load %arg3[%c0_2, %c0_3] : memref<384x384xbf16, #tpu.memory_space<vmem>>, vector<384x384xbf16>
    %cst = arith.constant dense<0.000000e+00> : vector<128x384xf32>
    %5 = tpu.matmul %3, %4, %cst {dimension_numbers = #tpu.dot_dimension_numbers<[1], [0], [0], [1], [0, 0, 1, 1], [], []>} : vector<128x384xbf16>, vector<384x384xbf16>, vector<128x384xf32> -> vector<128x384xf32>
    %c0_4 = arith.constant 0 : index
    %c0_5 = arith.constant 0 : index
    %6 = vector.load %arg4[%c0_4, %c0_5] : memref<1x384xf32, #tpu.memory_space<vmem>>, vector<1x384xf32>
    %7 = vector.broadcast %6 : vector<1x384xf32> to vector<128x384xf32>
    %8 = arith.addf %5, %7 : vector<128x384xf32>
    %cst_6 = arith.constant 0.000000e+00 : f32
    %9 = vector.broadcast %cst_6 : f32 to vector<128x384xf32>
    %10 = arith.maximumf %8, %9 : vector<128x384xf32>
    %11 = arith.truncf %10 : vector<128x384xf32> to vector<128x384xbf16>
    %c0_7 = arith.constant 0 : index
    %c0_8 = arith.constant 0 : index
    %12 = vector.load %arg5[%c0_7, %c0_8] : memref<384x384xbf16, #tpu.memory_space<vmem>>, vector<384x384xbf16>
    %cst_9 = arith.constant dense<0.000000e+00> : vector<128x384xf32>
    %13 = tpu.matmul %11, %12, %cst_9 {dimension_numbers = #tpu.dot_dimension_numbers<[1], [0], [0], [1], [0, 0, 1, 1], [], []>} : vector<128x384xbf16>, vector<384x384xbf16>, vector<128x384xf32> -> vector<128x384xf32>
    %c0_10 = arith.constant 0 : index
    %c0_11 = arith.constant 0 : index
    %14 = vector.load %arg6[%c0_10, %c0_11] : memref<1x384xf32, #tpu.memory_space<vmem>>, vector<1x384xf32>
    %15 = vector.broadcast %14 : vector<1x384xf32> to vector<128x384xf32>
    %16 = arith.addf %13, %15 : vector<128x384xf32>
    %cst_12 = arith.constant 0.000000e+00 : f32
    %17 = vector.broadcast %cst_12 : f32 to vector<128x384xf32>
    %18 = arith.maximumf %16, %17 : vector<128x384xf32>
    %19 = arith.truncf %18 : vector<128x384xf32> to vector<128x384xbf16>
    %c0_13 = arith.constant 0 : index
    %c0_14 = arith.constant 0 : index
    %20 = vector.load %arg7[%c0_13, %c0_14] : memref<384x128xbf16, #tpu.memory_space<vmem>>, vector<384x128xbf16>
    %cst_15 = arith.constant dense<0.000000e+00> : vector<128x128xf32>
    %21 = tpu.matmul %19, %20, %cst_15 {dimension_numbers = #tpu.dot_dimension_numbers<[1], [0], [0], [1], [0, 0, 1, 1], [], []>} : vector<128x384xbf16>, vector<384x128xbf16>, vector<128x128xf32> -> vector<128x128xf32>
    %c0_16 = arith.constant 0 : index
    %c0_17 = arith.constant 0 : index
    %22 = vector.load %arg8[%c0_16, %c0_17] : memref<1x128xf32, #tpu.memory_space<vmem>>, vector<1x128xf32>
    %23 = vector.broadcast %22 : vector<1x128xf32> to vector<128x128xf32>
    %24 = arith.addf %21, %23 : vector<128x128xf32>
    %cst_18 = arith.constant dense<0xFF800000> : vector<128xf32>
    %25 = vector.multi_reduction <maximumf>, %24, %cst_18 [1] : vector<128x128xf32> to vector<128xf32>
    %26 = vector.shape_cast %25 : vector<128xf32> to vector<128x1xf32>
    %27 = vector.broadcast %26 : vector<128x1xf32> to vector<128x128xf32>
    %28 = arith.subf %24, %27 : vector<128x128xf32>
    %29 = math.exp %28 : vector<128x128xf32>
    %cst_19 = arith.constant dense<0.000000e+00> : vector<128xf32>
    %30 = vector.multi_reduction <add>, %29, %cst_19 [1] : vector<128x128xf32> to vector<128xf32>
    %31 = vector.shape_cast %30 : vector<128xf32> to vector<128x1xf32>
    %32 = tpu.reciprocal %31 {approx = true} : vector<128x1xf32> -> vector<128x1xf32>
    %33 = vector.broadcast %32 : vector<128x1xf32> to vector<128x128xf32>
    %34 = arith.mulf %29, %33 : vector<128x128xf32>
    %c0_20 = arith.constant 0 : index
    %c0_21 = arith.constant 0 : index
    %35 = vector.load %arg9[%c0_20, %c0_21] : memref<128x128xf32, #tpu.memory_space<vmem>>, vector<128x128xf32>
    tpu.vector_store %arg9[%c0_20, %c0_21], %34 {strides = array<i32>} : memref<128x128xf32, #tpu.memory_space<vmem>>, vector<128x128xf32>,
    return
  }
  func.func @transform_0(%arg0: i32, %arg1: memref<2048xi32, #tpu.memory_space<smem>>) -> (i32, i32) {
    %c0_i32 = arith.constant 0 : i32
    %c0_i32_0 = arith.constant 0 : i32
    %c0_i32_1 = arith.constant 0 : i32
    return %c0_i32, %c0_i32_0 : i32, i32
  }
  func.func @transform_1(%arg0: i32, %arg1: memref<2048xi32, #tpu.memory_space<smem>>) -> (i32, i32) {
    %c0_i32 = arith.constant 0 : i32
    %c0_i32_0 = arith.constant 0 : i32
    %c0_i32_1 = arith.constant 0 : i32
    return %c0_i32, %c0_i32_0 : i32, i32
  }
  func.func @transform_2(%arg0: i32, %arg1: memref<2048xi32, #tpu.memory_space<smem>>) -> (i32, i32) {
    %c0_i32 = arith.constant 0 : i32
    %c0_i32_0 = arith.constant 0 : i32
    %c0_i32_1 = arith.constant 0 : i32
    return %c0_i32, %c0_i32_0 : i32, i32
  }
  func.func @transform_3(%arg0: i32, %arg1: memref<2048xi32, #tpu.memory_space<smem>>) -> (i32, i32) {
    %c0_i32 = arith.constant 0 : i32
    %c0_i32_0 = arith.constant 0 : i32
    %c0_i32_1 = arith.constant 0 : i32
    return %c0_i32, %c0_i32_0 : i32, i32
  }
  func.func @transform_4(%arg0: i32, %arg1: memref<2048xi32, #tpu.memory_space<smem>>) -> (i32, i32) {
    %c0_i32 = arith.constant 0 : i32
    %c0_i32_0 = arith.constant 0 : i32
    %c0_i32_1 = arith.constant 0 : i32
    return %c0_i32, %c0_i32_0 : i32, i32
  }
  func.func @transform_5(%arg0: i32, %arg1: memref<2048xi32, #tpu.memory_space<smem>>) -> (i32, i32) {
    %c0_i32 = arith.constant 0 : i32
    %c0_i32_0 = arith.constant 0 : i32
    %c0_i32_1 = arith.constant 0 : i32
    return %c0_i32, %c0_i32_0 : i32, i32
  }
  func.func @transform_6(%arg0: i32, %arg1: memref<2048xi32, #tpu.memory_space<smem>>) -> (i32, i32) {
    %c0_i32 = arith.constant 0 : i32
    %c0_i32_0 = arith.constant 0 : i32
    %c0_i32_1 = arith.constant 0 : i32
    return %c0_i32, %c0_i32_0 : i32, i32
  }
  func.func @transform_7(%arg0: i32, %arg1: memref<2048xi32, #tpu.memory_space<smem>>) -> (i32, i32) {
    %c0_i32 = arith.constant 0 : i32
    %c0_i32_0 = arith.constant 0 : i32
    return %arg0, %c0_i32 : i32, i32
  }
}

</mosaic_0001>

<bundles_post_ra>
// kernel: tpu_custom_call.1
= control target key start
LH: loop header
LB: loop body
LE: loop exit
PB: predicated region body
PF: predicated region fallthrough
CT: control target
= control target key end

     0   :  { %s5502_s30 = smov [#allocation4]   ;;  %s6893_s0 = inlined_call_operand.hbm [shape: s32[2048], index: 0, kind: input, shape index: {}]   ;;  %s6894_s1 = inlined_call_operand.hbm [shape: f32[512,384], index: 1, kind: input, shape index: {}]   ;;  %s6895_s2 = inlined_call_operand.hbm [shape: bf16[384,384], index: 2, kind: input, shape index: {}]   ;;  %s6896_s3 = inlined_call_operand.hbm [shape: f32[1,384], index: 3, kind: input, shape index: {}]   ;;  %s6897_s4 = inlined_call_operand.hbm [shape: bf16[384,384], index: 4, kind: input, shape index: {}]   ;;  %s6898_s5 = inlined_call_operand.vmem [shape: f32[1,384], index: 5, kind: input, shape index: {}]   ;;  %s6899_s6 = inlined_call_operand.hbm [shape: bf16[384,128], index: 6, kind: input, shape index: {}]   ;;  %s6900_s7 = inlined_call_operand.vmem [shape: f32[1,128], index: 7, kind: input, shape index: {}]   ;;  %s6901_s8 = inlined_call_operand.hbm [shape: f32[256,128], index: 8, kind: output, shape index: {}]  }
   0x1   :  { %6918 = sst [smem:[#allocation77_spill]] %s6894_s1  ;;  %s14_s29 = sshll.u32 %s6893_s0, 4  ;;  %s15_s29 = int_to_ptr.hbm [resolvable:$true] %s14_s29 }
   0x2   :  { %6919 = sst [smem:[#allocation78_spill]] %s6895_s2 }
   0x3   :  { %6920 = sst [smem:[#allocation79_spill]] %s6896_s3 }
   0x4   :  { %6921 = sst [smem:[#allocation80_spill]] %s6897_s4 }
   0x5   :  { %6922 = sst [smem:[#allocation81_spill]] %s6898_s5 }
   0x6   :  { %6923 = sst [smem:[#allocation82_spill]] %s6899_s6 }
   0x7   :  { %6924 = sst [smem:[#allocation83_spill]] %s6900_s7 }
   0x8   :  { %6925 = sst [smem:[#allocation84_spill]] %s6901_s8 }
   0x9   :  { %17 = dma.hbm_to_smem %s15_s29, 256, %s5502_s30, [#allocation3] }
   0xa   :  { %5464 = dma.done.wait [#allocation3], 256 }
   0xb   :  { %5465 = vsyncadd [#allocation3], 4294967040 }
   0xc   :  { %20 = sfence }
   0xd   :  { %21 = vsyncpa [#allocation6], 0 }
   0xe   :  { %22 = vsyncpa [#allocation9], 0 }
   0xf   :  { %23 = vsyncpa [#allocation12], 0 }
  0x10   :  { %24 = vsyncpa [#allocation7], 0 }
  0x11   :  { %26 = vsyncpa [#allocation7 + $0x1], 0  ;;  %s5564_s9 = smov 0   ;;  %s5566_s10 = smov 0  }
  0x12   :  { %s5568_s11 = smov 0   ;;  %s5570_s12 = smov 0  }
  0x13 LB: > { %6926 = sst [smem:[#allocation20_spill]] %s5484_s9  ;;  %s5585_s0 = sadd.s32 4294967295, %s5496_s12   ;;  %s5496_s12 = sphi %s5570_s12, %s7060_s12   ;;  %s5492_s11 = sphi %s5568_s11, %s7063_s11   ;;  %s5488_s10 = sphi %s5566_s10, %s7062_s10   ;;  %s5484_s9 = sphi %s5564_s9, %s7061_s9  }
  0x14   : > { %6927 = sst [smem:[#allocation21_spill]] %s5488_s10  ;;  %s4108_s13 = sadd.s32 4294967294, %s5496_s12  }
  0x15   : > { %6928 = sst [smem:[#allocation22_spill]] %s5492_s11  ;;  %s5589_s14 = sadd.s32 1, %s5496_s12  }
  0x16   : > { %6929 = sst [smem:[#allocation23_spill]] %s5496_s12  ;;  %s186_s15 = sadd.s32 1, %s5492_s11 }
  0x17   : > { %6930 = sst [smem:[#allocation24_spill]] %s5585_s0  ;;  %s183_s16 = ssub.s32 %s5496_s12, %s5589_s14 }
  0x18   : > { %6931 = sst [smem:[#allocation25_spill]] %s5589_s14  ;;  %p196_p0 = scmp.ne.s32.totalorder %s5492_s11, %s5488_s10 }
  0x19   : > { %p184_p1 = scmp.eq.s32.totalorder %s183_s16, 0  ;;  %p197_p2 = scmp.eq.s32.totalorder %s5585_s0, 1 }
  0x1a   : > { %p202_p3 = scmp.ne.s32.totalorder %s5488_s10, %s5484_s9  ;;  %p203_p4 = scmp.eq.s32.totalorder %s4108_s13, 1 }
  0x1b   : > { %s5600_s17 = scalar_select %p184_p1, %s5492_s11, %s186_s15  }
  0x1c   : > { %p5602_p5 = por %p197_p2, %p196_p0  ;;  %p5606_p6 = por %p203_p4, %p202_p3 }
  0x1d   : > { %6932 = sst [smem:[#allocation26_spill]] %s5600_s17  ;;  %p4109_p7 = scmp.ge.s32.totalorder %s5496_s12, 1 }
  0x1e   : > { %s6933_s18 = scalar_select %p5602_p5, 1, 0 }
  0x1f   : > { %s6935_s19 = scalar_select %p5606_p6, 1, 0 }
  0x20   : > { %6934 = sst [smem:[#allocation27_spill]] %s6933_s18  ;;  %p210_p8 = scmp.lt.s32.totalorder %s5496_s12, 3 }
  0x21   : > { %6936 = sst [smem:[#allocation28_spill]] %s6935_s19  ;;  %p5124_p9 = scmp.eq.s32.totalorder %s5585_s0, 0 }
  0x22   : > { %p5613_p10 = pnand %p4109_p7, %p210_p8  ;;  %s6938_s2 = sld [smem:[#allocation78_spill]] }
  0x23   : > { %s5503_s24 = smov [#allocation8]   ;;  %s6940_s4 = sld [smem:[#allocation80_spill]] }
  0x24   : > { %p5104_p11 = pneg %p5613_p10  ;;  %s237_s25 = sshll.u32 %s5503_s24, 4  ;;  %s238_s25 = int_to_ptr.vmem [resolvable:$true] %s237_s25 }
  0x25   : > { %s5504_s30 = smov 192   ;;  %s5505_s13 = smov 12  }
  0x26   : > { %p5624_p12 = pnand %p5124_p9, %p5104_p11  ;;  %s5506_s15 = smov [#allocation11]  }
  0x27   : > { %s263_s16 = sshll.u32 %s5506_s15, 4  ;;  %s6941_s1 = sld [smem:[#allocation77_spill]]  ;;  %s264_s16 = int_to_ptr.vmem [resolvable:$true] %s263_s16 }
  0x28   : > { %s235_s23 = sshll.u32 %s6938_s2, 4  ;;  %s5507_s27 = smov [#allocation5]   ;;  %s236_s23 = int_to_ptr.hbm [resolvable:$true] %s235_s23 }
  0x29   : > { %s261_s29 = sshll.u32 %s6940_s4, 4  ;;  %s223_s28 = sshll.u32 %s5507_s27, 4  ;;  %s262_s29 = int_to_ptr.hbm [resolvable:$true] %s261_s29  ;;  %s224_s28 = int_to_ptr.vmem [resolvable:$true] %s223_s28 }
  0x2a   : > { %5110 = dma.hbm_to_vmem [thread:$0]  (!%p5624_p12), %s236_s23, 9216, %s238_s25, [#allocation9], %s5504_s30, %s5504_s30, %s5505_s13  }
  0x2b   : > { %5116 = dma.hbm_to_vmem [thread:$0]  (!%p5624_p12), %s262_s29, 9216, %s264_s16, [#allocation12], %s5504_s30, %s5504_s30, %s5505_s13  }
  0x2c   : > { %s6942_s3 = sld [smem:[#allocation79_spill]]  ;;  %s5508_s23 = smov 384  }
  0x2d   : > { %s221_s24 = sshll.u32 %s6941_s1, 4  ;;  %s5509_s25 = smov 24   ;;  %s222_s24 = int_to_ptr.hbm [resolvable:$true] %s221_s24 }
  0x2e   : > { %5107 = dma.hbm_to_vmem [thread:$0]  (!%p5624_p12), %s222_s24, 24576, %s224_s28, [#allocation6], %s5508_s23, %s5508_s23, %s5509_s25  }
  0x2f   : > { %s5510_s15 = smov [#allocation10]   ;;  %s6943_s6 = sld [smem:[#allocation82_spill]] }
  0x30   : > { %s252_s21 = sshll.u32 %s5510_s15, 4  ;;  %s5511_s29 = smov [#allocation13]   ;;  %s253_s21 = int_to_ptr.vmem [resolvable:$true] %s252_s21 }
  0x31   : > { %s280_s30 = sshll.u32 %s5511_s29, 4  ;;  %s5512_s2 = smov 64   ;;  %s281_s30 = int_to_ptr.vmem [resolvable:$true] %s280_s30 }
  0x32   : > { %s250_s17 = sshll.u32 %s6942_s3, 4  ;;  %s5513_s4 = smov 4   ;;  %s251_s17 = int_to_ptr.hbm [resolvable:$true] %s250_s17 }
  0x33   : > { %5113 = dma.hbm_to_vmem [thread:$0]  (!%p5624_p12), %s251_s17, 48, %s253_s21, [#allocation9]  }
  0x34   : > { %299 = sbr.rel (%p5613_p10) target bundleno = 1577 (0x629), region = 48 }
  0x35   : > { %s278_s11 = sshll.u32 %s6943_s6, 4  ;;  %s279_s11 = int_to_ptr.hbm [resolvable:$true] %s278_s11 }
  0x36   : > { %5119 = dma.hbm_to_vmem [thread:$0]  (!%p5624_p12), %s279_s11, 3072, %s281_s30, [#allocation12], %s5512_s2, %s5512_s2, %s5513_s4  }
  0x39   : > { %5467 = dma.done.wait (%p5124_p9), [#allocation6], 24576  }
  0x3a   : > { %5469 = vsyncadd (%p5124_p9), [#allocation6], 4294942720 }
  0x3b   : > { %5471 = dma.done.wait (%p5124_p9), [#allocation9], 9264  }
  0x3c   : > { %5473 = vsyncadd (%p5124_p9), [#allocation9], 4294958032 }
  0x3d   : > { %5475 = dma.done.wait (%p5124_p9), [#allocation12], 12288  }
  0x3e   : > { %5477 = vsyncadd (%p5124_p9), [#allocation12], 4294955008  ;;  %s6903_s1 = sand.u32 1, %s5488_s10   ;;  %s5670_s26 = smov 0  }
  0x3f   : > { %s4121_s17 = sshll.u32 %s6903_s1, 7 }
  0x40   : > { %s5668_s20 = scalar_lea.vmem [#allocation14], %s4121_s17 }
  0x41   : > { %6944 = sst [smem:[#allocation29_spill]] %s5668_s20 }
  0x42 LB: >> { %s6945_s0 = sld [smem:[#allocation24_spill]]  ;;  %s6904_s13 = sshll.u32 %s5500_s26, 3  ;;  %vm1180_vm0 = vcmask 1040384   ;;  %vm1184_vm1 = vcmask 1041408   ;;  %vm1188_vm2 = vcmask 1042432   ;;  %vm1192_vm3 = vcmask 1043456   ;;  %s5500_s26 = sphi %s5670_s26, %s354_s26  }
  0x43   : >> { %6946 = sst [smem:[#allocation30_spill]] %s5500_s26  ;;  %vm1196_vm4 = vcmask 1044480   ;;  %vm1200_vm5 = vcmask 1045504   ;;  %vm1204_vm6 = vcmask 1046528  }
  0x48   : >> { %s6947_s11 = sshll.u32 %s6945_s0, 7 }
  0x49   : >> { %s356_s16 = sadd.s32 %s6904_s13, %s6947_s11 }
  0x4a   : >> { %s5680_s24 = sshll.u32 %s356_s16, 3 }
  0x4b   : >> { %s358_s27 = sld [smem:[#allocation4 + %s5680_s24]]  ;;  %s368_s28 = sadd.s32 1, %s5680_s24 }
  0x4c   : >> { %s369_s23 = sld [smem:[#allocation4 + %s368_s28]]  ;;  %s379_s25 = sadd.s32 2, %s5680_s24 }
  0x4d   : >> { %s380_s15 = sld [smem:[#allocation4 + %s379_s25]]  ;;  %s390_s21 = sadd.s32 3, %s5680_s24 }
  0x4e   : >> { %s401_s22 = sadd.s32 4, %s5680_s24  ;;  %s391_s29 = sld [smem:[#allocation4 + %s390_s21]] }
  0x4f   : >> { %s402_s30 = sld [smem:[#allocation4 + %s401_s22]]  ;;  %s412_s4 = sadd.s32 5, %s5680_s24 }
  0x50   : >> { %s5688_s13 = sld [smem:[#allocation4 + %s412_s4]]  ;;  %s423_s3 = sadd.s32 6, %s5680_s24 }
  0x51   : >> { %s359_s2 = sshra.s32 %s358_s27, 3  ;;  %s362_s16 = sand.u32 7, %s358_s27 }
  0x52   : >> { %s4125_s17 = smul.u32 24, %s359_s2  ;;  %s370_s1 = sshra.s32 %s369_s23, 3 }
  0x53   : >> { %s381_s11 = sshra.s32 %s380_s15, 3  ;;  %s4126_s14 = smul.u32 24, %s370_s1 }
  0x54   : >> { %s5691_s6 = sadd.s32 %s4125_s17, %s362_s16  ;;  %s373_s28 = sand.u32 7, %s369_s23 }
  0x55   : >> { %s4127_s25 = smul.u32 24, %s381_s11  ;;  %s384_s19 = sand.u32 7, %s380_s15 }
  0x56   : >> { %s392_s21 = sshra.s32 %s391_s29, 3  ;;  %s403_s22 = sshra.s32 %s402_s30, 3 }
  0x57   : >> { %s5693_s9 = sadd.s32 %s4126_s14, %s373_s28  ;;  %s395_s27 = sand.u32 7, %s391_s29 }
  0x58   : >> { %s5695_s2 = sadd.s32 %s4127_s25, %s384_s19  ;;  %s4128_s4 = smul.u32 24, %s392_s21 }
  0x59   : >> { %s4129_s12 = smul.u32 24, %s403_s22  ;;  %s414_s8 = sshra.s32 %s5688_s13, 3 }
  0x5a   : >> { %s406_s18 = sand.u32 7, %s402_s30  ;;  %s424_s17 = sld [smem:[#allocation4 + %s423_s3]] }
  0x5b   : >> { %s5698_s16 = sadd.s32 %s4128_s4, %s395_s27  ;;  %s4130_s1 = smul.u32 24, %s414_s8 }
  0x5c   : >> { %s5700_s23 = sadd.s32 %s4129_s12, %s406_s18  ;;  %s434_s11 = sadd.s32 7, %s5680_s24 }
  0x5d   : >> { %6948 = sst [smem:[#allocation31_spill]] %s5700_s23  ;;  %s5704_s10 = sadd.s32 8, %s5680_s24 }
  0x5e   : >> { %s435_s15 = sld [smem:[#allocation4 + %s434_s11]]  ;;  %s464_s19 = sadd.s32 1, %s5704_s10 }
  0x5f   : >> { %s454_s14 = sld [smem:[#allocation4 + %s5704_s10]]  ;;  %s417_s29 = sand.u32 7, %s5688_s13 }
  0x60   : >> { %s475_s28 = sadd.s32 2, %s5704_s10  ;;  %s425_s25 = sshra.s32 %s424_s17, 3 }
  0x61   : >> { %s465_s3 = sld [smem:[#allocation4 + %s464_s19]]  ;;  %s5710_s30 = sadd.s32 %s4130_s1, %s417_s29 }
  0x62   : >> { %6949 = sst [smem:[#allocation32_spill]] %s5710_s30  ;;  %s4131_s12 = smul.u32 24, %s425_s25 }
  0x63   : >> { %s476_s8 = sld [smem:[#allocation4 + %s475_s28]]  ;;  %s428_s21 = sand.u32 7, %s424_s17 }
  0x64   : >> { %s436_s18 = sshra.s32 %s435_s15, 3  ;;  %s439_s22 = sand.u32 7, %s435_s15 }
  0x65   : >> { %s4132_s27 = smul.u32 24, %s436_s18  ;;  %s455_s4 = sshra.s32 %s454_s14, 3 }
  0x66   : >> { %s486_s11 = sadd.s32 3, %s5704_s10  ;;  %s5713_s0 = sadd.s32 %s4131_s12, %s428_s21 }
  0x67   : >> { %s4134_s20 = smul.u32 24, %s455_s4  ;;  %s5715_s13 = sadd.s32 %s4132_s27, %s439_s22 }
  0x68   : >> { %6950 = sst [smem:[#allocation33_spill]] %s5715_s13  ;;  %s458_s7 = sand.u32 7, %s454_s14 }
  0x69   : >> { %s466_s19 = sshra.s32 %s465_s3, 3  ;;  %s497_s1 = sadd.s32 4, %s5704_s10 }
  0x6a   : >> { %s477_s29 = sshra.s32 %s476_s8, 3  ;;  %s5718_s28 = sadd.s32 %s4134_s20, %s458_s7 }
  0x6b   : >> { %6951 = sst [smem:[#allocation34_spill]] %s5718_s28  ;;  %s4135_s25 = smul.u32 24, %s466_s19 }
  0x6c   : >> { %s487_s17 = sld [smem:[#allocation4 + %s486_s11]]  ;;  %s469_s15 = sand.u32 7, %s465_s3 }
  0x6d   : >> { %s4136_s18 = smul.u32 24, %s477_s29  ;;  %s480_s5 = sand.u32 7, %s476_s8 }
  0x6e   : >> { %s498_s26 = sld [smem:[#allocation4 + %s497_s1]]  ;;  %s508_s30 = sadd.s32 5, %s5704_s10 }
  0x6f   : >> { %s519_s23 = sadd.s32 6, %s5704_s10  ;;  %s5722_s12 = sadd.s32 %s4135_s25, %s469_s15 }
  0x70   : >> { %6952 = sst [smem:[#allocation35_spill]] %s5722_s12  ;;  %s5724_s22 = sadd.s32 %s4136_s18, %s480_s5 }
  0x71   : >> { %s509_s21 = sld [smem:[#allocation4 + %s508_s30]]  ;;  %s530_s14 = sadd.s32 7, %s5704_s10 }
  0x72   : >> { %6953 = sst [smem:[#allocation36_spill]] %s5724_s22  ;;  %s488_s27 = sshra.s32 %s487_s17, 3 }
  0x73   : >> { %s520_s4 = sld [smem:[#allocation4 + %s519_s23]]  ;;  %s491_s13 = sand.u32 7, %s487_s17 }
  0x74   : >> { %s4137_s7 = smul.u32 24, %s488_s27  ;;  %s499_s20 = sshra.s32 %s498_s26, 3 }
  0x75   : >> { %s531_s19 = sld [smem:[#allocation4 + %s530_s14]]  ;;  %s502_s11 = sand.u32 7, %s498_s26 }
  0x76   : >> { %s4138_s3 = smul.u32 24, %s499_s20  ;;  %s5727_s8 = sadd.s32 %s4137_s7, %s491_s13 }
  0x77   : >> { %s510_s29 = sshra.s32 %s509_s21, 3  ;;  %6954 = sst [smem:[#allocation37_spill]] %s5727_s8 }
  0x78   : >> { %s5729_s1 = sadd.s32 %s4138_s3, %s502_s11  ;;  %s4139_s25 = smul.u32 24, %s510_s29 }
  0x79   : >> { %6955 = sst [smem:[#allocation38_spill]] %s5729_s1  ;;  %s5732_s15 = sadd.s32 16, %s5680_s24 }
  0x7a   : >> { %s513_s5 = sand.u32 7, %s509_s21  ;;  %s521_s10 = sshra.s32 %s520_s4, 3 }
  0x7b   : >> { %s524_s23 = sand.u32 7, %s520_s4  ;;  %s532_s30 = sshra.s32 %s531_s19, 3 }
  0x7c   : >> { %s5734_s17 = sadd.s32 %s4139_s25, %s513_s5  ;;  %s4140_s26 = smul.u32 24, %s521_s10 }
  0x7d   : >> { %6956 = sst [smem:[#allocation39_spill]] %s5734_s17  ;;  %s560_s13 = sadd.s32 1, %s5732_s15 }
  0x7e   : >> { %s550_s18 = sld [smem:[#allocation4 + %s5732_s15]]  ;;  %s4141_s14 = smul.u32 24, %s532_s30 }
  0x7f   : >> { %s561_s27 = sld [smem:[#allocation4 + %s560_s13]]  ;;  %s535_s7 = sand.u32 7, %s531_s19 }
  0x80   : >> { %s571_s20 = sadd.s32 2, %s5732_s15  ;;  %s582_s3 = sadd.s32 3, %s5732_s15 }
  0x81   : >> { %s572_s11 = sld [smem:[#allocation4 + %s571_s20]]  ;;  %s5740_s29 = sadd.s32 %s4140_s26, %s524_s23 }
  0x82   : >> { %6957 = sst [smem:[#allocation40_spill]] %s5740_s29  ;;  %s593_s1 = sadd.s32 4, %s5732_s15 }
  0x83   : >> { %s5743_s8 = sadd.s32 %s4141_s14, %s535_s7  ;;  %s583_s21 = sld [smem:[#allocation4 + %s582_s3]] }
  0x84   : >> { %6958 = sst [smem:[#allocation41_spill]] %s5743_s8  ;;  %s551_s4 = sshra.s32 %s550_s18, 3 }
  0x85   : >> { %s5745_s22 = sld [smem:[#allocation4 + %s593_s1]]  ;;  %s4143_s25 = smul.u32 24, %s551_s4 }
  0x86   : >> { %s562_s5 = sshra.s32 %s561_s27, 3  ;;  %s554_s10 = sand.u32 7, %s550_s18 }
  0x87   : >> { %s4144_s19 = smul.u32 24, %s562_s5  ;;  %s565_s30 = sand.u32 7, %s561_s27 }
  0x88   : >> { %s573_s13 = sshra.s32 %s572_s11, 3  ;;  %s5747_s20 = sadd.s32 %s4143_s25, %s554_s10 }
  0x89   : >> { %6959 = sst [smem:[#allocation42_spill]] %s5747_s20  ;;  %s5749_s23 = sadd.s32 %s4144_s19, %s565_s30 }
  0x8a   : >> { %6960 = sst [smem:[#allocation43_spill]] %s5749_s23  ;;  %s4145_s26 = smul.u32 24, %s573_s13 }
  0x8b   : >> { %s576_s14 = sand.u32 7, %s572_s11  ;;  %s584_s7 = sshra.s32 %s583_s21, 3 }
  0x8c   : >> { %s604_s1 = sadd.s32 5, %s5732_s15  ;;  %s587_s3 = sand.u32 7, %s583_s21 }
  0x8d   : >> { %s5752_s8 = sadd.s32 %s4145_s26, %s576_s14  ;;  %s4146_s4 = smul.u32 24, %s584_s7 }
  0x8e   : >> { %6961 = sst [smem:[#allocation44_spill]] %s5752_s8  ;;  %s595_s29 = sshra.s32 %s5745_s22, 3 }
  0x8f   : >> { %s605_s18 = sld [smem:[#allocation4 + %s604_s1]]  ;;  %s615_s17 = sadd.s32 6, %s5732_s15 }
  0x90   : >> { %s626_s5 = sadd.s32 7, %s5732_s15  ;;  %s616_s27 = sld [smem:[#allocation4 + %s615_s17]] }
  0x91   : >> { %s5757_s12 = sadd.s32 %s4146_s4, %s587_s3  ;;  %s627_s25 = sld [smem:[#allocation4 + %s626_s5]] }
  0x92   : >> { %6962 = sst [smem:[#allocation45_spill]] %s5757_s12  ;;  %s598_s10 = sand.u32 7, %s5745_s22 }
  0x93   : >> { %s5761_s19 = sadd.s32 24, %s5680_s24  ;;  %s4147_s11 = smul.u32 24, %s595_s29 }
  0x94   : >> { %s656_s30 = sadd.s32 1, %s5761_s19  ;;  %s5765_s13 = sld [smem:[#allocation4 + %s5761_s19]] }
  0x95   : >> { %s606_s21 = sshra.s32 %s605_s18, 3  ;;  %s609_s26 = sand.u32 7, %s605_s18 }
  0x96   : >> { %s4148_s14 = smul.u32 24, %s606_s21  ;;  %s617_s15 = sshra.s32 %s616_s27, 3 }
  0x97   : >> { %s657_s17 = sld [smem:[#allocation4 + %s656_s30]]  ;;  %s620_s7 = sand.u32 7, %s616_s27 }
  0x98   : >> { %s4149_s22 = smul.u32 24, %s617_s15  ;;  %s5767_s1 = sadd.s32 %s4147_s11, %s598_s10 }
  0x99   : >> { %6963 = sst [smem:[#allocation46_spill]] %s5767_s1  ;;  %s628_s3 = sshra.s32 %s627_s25, 3 }
  0x9a   : >> { %s5769_s4 = sadd.s32 %s4148_s14, %s609_s26  ;;  %s5771_s29 = sadd.s32 %s4149_s22, %s620_s7 }
  0x9b   : >> { %6964 = sst [smem:[#allocation47_spill]] %s5769_s4  ;;  %s4150_s5 = smul.u32 24, %s628_s3 }
  0x9c   : >> { %6965 = sst [smem:[#allocation48_spill]] %s5771_s29  ;;  %s631_s12 = sand.u32 7, %s627_s25 }
  0x9d   : >> { %s647_s18 = sshra.s32 %s5765_s13, 3  ;;  %s5775_s21 = sadd.s32 32, %s5680_s24 }
  0x9e   : >> { %s5777_s8 = sadd.s32 %s4150_s5, %s631_s12  ;;  %s650_s30 = sand.u32 7, %s5765_s13 }
  0x9f   : >> { %6966 = sst [smem:[#allocation49_spill]] %s5777_s8  ;;  %s4152_s27 = smul.u32 24, %s647_s18 }
  0xa0   : >> { %s658_s15 = sshra.s32 %s657_s17, 3  ;;  %s667_s10 = sadd.s32 2, %s5761_s19 }
  0xa1   : >> { %s678_s11 = sadd.s32 3, %s5761_s19  ;;  %s661_s1 = sand.u32 7, %s657_s17 }
  0xa2   : >> { %s668_s26 = sld [smem:[#allocation4 + %s667_s10]]  ;;  %s4153_s14 = smul.u32 24, %s658_s15 }
  0xa3   : >> { %s679_s4 = sld [smem:[#allocation4 + %s678_s11]]  ;;  %s689_s7 = sadd.s32 4, %s5761_s19 }
  0xa4   : >> { %s700_s22 = sadd.s32 5, %s5761_s19  ;;  %s690_s3 = sld [smem:[#allocation4 + %s689_s7]] }
  0xa5   : >> { %s711_s25 = sadd.s32 6, %s5761_s19  ;;  %s5785_s29 = sadd.s32 %s4152_s27, %s650_s30 }
  0xa6   : >> { %6967 = sst [smem:[#allocation50_spill]] %s5785_s29  ;;  %s5787_s12 = sadd.s32 %s4153_s14, %s661_s1 }
  0xa7   : >> { %s701_s23 = sld [smem:[#allocation4 + %s700_s22]]  ;;  %s722_s30 = sadd.s32 7, %s5761_s19 }
  0xa8   : >> { %6968 = sst [smem:[#allocation51_spill]] %s5787_s12  ;;  %s669_s5 = sshra.s32 %s668_s26, 3 }
  0xa9   : >> { %s5789_s13 = sld [smem:[#allocation4 + %s711_s25]]  ;;  %s672_s18 = sand.u32 7, %s668_s26 }
  0xaa   : >> { %s4154_s17 = smul.u32 24, %s669_s5  ;;  %s680_s10 = sshra.s32 %s679_s4, 3 }
  0xab   : >> { %s683_s15 = sand.u32 7, %s679_s4  ;;  %s4155_s11 = smul.u32 24, %s680_s10 }
  0xac   : >> { %s5791_s8 = sadd.s32 %s4154_s17, %s672_s18  ;;  %s691_s27 = sshra.s32 %s690_s3, 3 }
  0xad   : >> { %6969 = sst [smem:[#allocation52_spill]] %s5791_s8  ;;  %s5793_s7 = sadd.s32 %s4155_s11, %s683_s15 }
  0xae   : >> { %6970 = sst [smem:[#allocation53_spill]] %s5793_s7  ;;  %s752_s1 = sadd.s32 1, %s5775_s21 }
  0xaf   : >> { %s702_s14 = sshra.s32 %s701_s23, 3  ;;  %s713_s22 = sshra.s32 %s5789_s13, 3 }
  0xb0   : >> { %s694_s25 = sand.u32 7, %s690_s3  ;;  %s4156_s12 = smul.u32 24, %s691_s27 }
  0xb1   : >> { %s705_s26 = sand.u32 7, %s701_s23  ;;  %s4157_s5 = smul.u32 24, %s702_s14 }
  0xb2   : >> { %s4158_s29 = smul.u32 24, %s713_s22  ;;  %s723_s20 = sld [smem:[#allocation4 + %s722_s30]] }
  0xb3   : >> { %s742_s4 = sld [smem:[#allocation4 + %s5775_s21]]  ;;  %s763_s28 = sadd.s32 2, %s5775_s21 }
  0xb4   : >> { %s5800_s10 = sadd.s32 %s4156_s12, %s694_s25  ;;  %s716_s18 = sand.u32 7, %s5789_s13 }
  0xb5   : >> { %6971 = sst [smem:[#allocation54_spill]] %s5800_s10  ;;  %s5803_s17 = sadd.s32 %s4157_s5, %s705_s26 }
  0xb6   : >> { %6972 = sst [smem:[#allocation55_spill]] %s5803_s17  ;;  %s774_s3 = sadd.s32 3, %s5775_s21 }
  0xb7   : >> { %s5805_s19 = sld [smem:[#allocation4 + %s752_s1]]  ;;  %s5810_s23 = sadd.s32 %s4158_s29, %s716_s18 }
  0xb8   : >> { %s5807_s15 = sld [smem:[#allocation4 + %s763_s28]]  ;;  %s724_s12 = sshra.s32 %s723_s20, 3 }
  0xb9   : >> { %6973 = sst [smem:[#allocation56_spill]] %s5810_s23  ;;  %s727_s30 = sand.u32 7, %s723_s20 }
  0xba   : >> { %s5812_s11 = sld [smem:[#allocation4 + %s774_s3]]  ;;  %s4159_s13 = smul.u32 24, %s724_s12 }
  0xbb   : >> { %s743_s27 = sshra.s32 %s742_s4, 3  ;;  %s746_s14 = sand.u32 7, %s742_s4 }
  0xbc   : >> { %s4161_s1 = smul.u32 24, %s743_s27  ;;  %s5814_s22 = sadd.s32 %s4159_s13, %s727_s30 }
  0xbd   : >> { %6974 = sst [smem:[#allocation57_spill]] %s5814_s22  ;;  %s785_s25 = sadd.s32 4, %s5775_s21 }
  0xbe   : >> { %s5816_s28 = sadd.s32 %s4161_s1, %s746_s14  ;;  %s754_s29 = sshra.s32 %s5805_s19, 3 }
  0xbf   : >> { %6975 = sst [smem:[#allocation58_spill]] %s5816_s28  ;;  %s796_s26 = sadd.s32 5, %s5775_s21 }
  0xc0   : >> { %s765_s5 = sshra.s32 %s5807_s15, 3  ;;  %s776_s18 = sshra.s32 %s5812_s11, 3 }
  0xc1   : >> { %s757_s3 = sand.u32 7, %s5805_s19  ;;  %s4162_s23 = smul.u32 24, %s754_s29 }
  0xc2   : >> { %s768_s20 = sand.u32 7, %s5807_s15  ;;  %s4163_s12 = smul.u32 24, %s765_s5 }
  0xc3   : >> { %s4164_s17 = smul.u32 24, %s776_s18  ;;  %s786_s4 = sld [smem:[#allocation4 + %s785_s25]] }
  0xc4   : >> { %s797_s10 = sld [smem:[#allocation4 + %s796_s26]]  ;;  %s807_s27 = sadd.s32 6, %s5775_s21 }
  0xc5   : >> { %s779_s7 = sand.u32 7, %s5812_s11  ;;  %s808_s30 = sld [smem:[#allocation4 + %s807_s27]] }
  0xc6   : >> { %s5827_s13 = sadd.s32 %s4162_s23, %s757_s3  ;;  %s818_s14 = sadd.s32 7, %s5775_s21 }
  0xc7   : >> { %6976 = sst [smem:[#allocation59_spill]] %s5827_s13  ;;  %s5830_s1 = sadd.s32 %s4163_s12, %s768_s20 }
  0xc8   : >> { %6977 = sst [smem:[#allocation60_spill]] %s5830_s1  ;;  %s5833_s28 = sadd.s32 40, %s5680_s24 }
  0xc9   : >> { %s5835_s22 = sadd.s32 %s4164_s17, %s779_s7  ;;  %s5837_s19 = sld [smem:[#allocation4 + %s818_s14]] }
  0xca   : >> { %6978 = sst [smem:[#allocation61_spill]] %s5835_s22  ;;  %s787_s15 = sshra.s32 %s786_s4, 3 }
  0xcb   : >> { %s5840_s25 = sld [smem:[#allocation4 + %s5833_s28]]  ;;  %s4165_s11 = smul.u32 24, %s787_s15 }
  0xcc   : >> { %s798_s23 = sshra.s32 %s797_s10, 3  ;;  %s790_s21 = sand.u32 7, %s786_s4 }
  0xcd   : >> { %s4166_s29 = smul.u32 24, %s798_s23  ;;  %s801_s26 = sand.u32 7, %s797_s10 }
  0xce   : >> { %s809_s5 = sshra.s32 %s808_s30, 3  ;;  %s5842_s18 = sadd.s32 %s4165_s11, %s790_s21 }
  0xcf   : >> { %6979 = sst [smem:[#allocation62_spill]] %s5842_s18  ;;  %s5844_s7 = sadd.s32 %s4166_s29, %s801_s26 }
  0xd0   : >> { %6980 = sst [smem:[#allocation63_spill]] %s5844_s7  ;;  %s4167_s17 = smul.u32 24, %s809_s5 }
  0xd1   : >> { %s812_s3 = sand.u32 7, %s808_s30  ;;  %s820_s20 = sshra.s32 %s5837_s19, 3 }
  0xd2   : >> { %s848_s12 = sadd.s32 1, %s5833_s28  ;;  %s823_s27 = sand.u32 7, %s5837_s19 }
  0xd3   : >> { %s5849_s14 = sadd.s32 %s4167_s17, %s812_s3  ;;  %s4168_s15 = smul.u32 24, %s820_s20 }
  0xd4   : >> { %6981 = sst [smem:[#allocation64_spill]] %s5849_s14  ;;  %s839_s4 = sshra.s32 %s5840_s25, 3 }
  0xd5   : >> { %s849_s22 = sld [smem:[#allocation4 + %s848_s12]]  ;;  %s859_s23 = sadd.s32 2, %s5833_s28 }
  0xd6   : >> { %s870_s10 = sadd.s32 3, %s5833_s28  ;;  %s860_s1 = sld [smem:[#allocation4 + %s859_s23]] }
  0xd7   : >> { %s4170_s11 = smul.u32 24, %s839_s4  ;;  %s871_s21 = sld [smem:[#allocation4 + %s870_s10]] }
  0xd8   : >> { %s842_s18 = sand.u32 7, %s5840_s25  ;;  %s881_s29 = sadd.s32 4, %s5833_s28 }
  0xd9   : >> { %s882_s26 = sld [smem:[#allocation4 + %s881_s29]]  ;;  %s892_s7 = sadd.s32 5, %s5833_s28 }
  0xda   : >> { %s5857_s5 = sadd.s32 %s4168_s15, %s823_s27  ;;  %s5859_s13 = sadd.s32 %s4170_s11, %s842_s18 }
  0xdb   : >> { %6982 = sst [smem:[#allocation65_spill]] %s5857_s5  ;;  %s850_s30 = sshra.s32 %s849_s22, 3 }
  0xdc   : >> { %s4171_s19 = smul.u32 24, %s850_s30  ;;  %s853_s17 = sand.u32 7, %s849_s22 }
  0xdd   : >> { %s893_s3 = sld [smem:[#allocation4 + %s892_s7]]  ;;  %s861_s20 = sshra.s32 %s860_s1, 3 }
  0xde   : >> { %s872_s12 = sshra.s32 %s871_s21, 3  ;;  %s5861_s14 = sadd.s32 %s4171_s19, %s853_s17 }
  0xdf   : >> { %6983 = sst [smem:[#allocation66_spill]] %s5861_s14  ;;  %s864_s4 = sand.u32 7, %s860_s1 }
  0xe0   : >> { %s4172_s23 = smul.u32 24, %s861_s20  ;;  %s875_s25 = sand.u32 7, %s871_s21 }
  0xe1   : >> { %s4173_s10 = smul.u32 24, %s872_s12  ;;  %s883_s29 = sshra.s32 %s882_s26, 3 }
  0xe2   : >> { %s886_s27 = sand.u32 7, %s882_s26  ;;  %s4174_s15 = smul.u32 24, %s883_s29 }
  0xe3   : >> { %s903_s5 = sadd.s32 6, %s5833_s28  ;;  %s5864_s8 = sadd.s32 %s4172_s23, %s864_s4 }
  0xe4   : >> { %6984 = sst [smem:[#allocation67_spill]] %s5864_s8  ;;  %s894_s18 = sshra.s32 %s893_s3, 3 }
  0xe5   : >> { %s5866_s11 = sadd.s32 %s4173_s10, %s875_s25  ;;  %s5868_s22 = sadd.s32 %s4174_s15, %s886_s27 }
  0xe6   : >> { %6985 = sst [smem:[#allocation68_spill]] %s5866_s11  ;;  %s914_s30 = sadd.s32 7, %s5833_s28 }
  0xe7   : >> { %6986 = sst [smem:[#allocation69_spill]] %s5868_s22  ;;  %s4175_s19 = smul.u32 24, %s894_s18 }
  0xe8   : >> { %s904_s7 = sld [smem:[#allocation4 + %s903_s5]]  ;;  %s897_s1 = sand.u32 7, %s893_s3 }
  0xe9   : >> { %s915_s17 = sld [smem:[#allocation4 + %s914_s30]]  ;;  %s5872_s20 = sadd.s32 48, %s5680_s24 }
  0xea   : >> { %s5875_s21 = sld [smem:[#allocation4 + %s5872_s20]]  ;;  %s944_s26 = sadd.s32 1, %s5872_s20 }
  0xeb   : >> { %s5878_s12 = sld [smem:[#allocation4 + %s944_s26]]  ;;  %s955_s4 = sadd.s32 2, %s5872_s20 }
  0xec   : >> { %s5881_s5 = sadd.s32 %s4175_s19, %s897_s1  ;;  %s956_s28 = sld [smem:[#allocation4 + %s955_s4]] }
  0xed   : >> { %6987 = sst [smem:[#allocation70_spill]] %s5881_s5  ;;  %s966_s26 = sadd.s32 3, %s5872_s20 }
  0xee   : >> { %s905_s3 = sshra.s32 %s904_s7, 3  ;;  %s908_s23 = sand.u32 7, %s904_s7 }
  0xef   : >> { %s4176_s25 = smul.u32 24, %s905_s3  ;;  %s916_s10 = sshra.s32 %s915_s17, 3 }
  0xf0   : >> { %s919_s29 = sand.u32 7, %s915_s17  ;;  %s4177_s27 = smul.u32 24, %s916_s10 }
  0xf1   : >> { %s5883_s15 = sadd.s32 %s4176_s25, %s908_s23  ;;  %s935_s30 = sshra.s32 %s5875_s21, 3 }
  0xf2   : >> { %6988 = sst [smem:[#allocation71_spill]] %s5883_s15  ;;  %s5885_s18 = sadd.s32 %s4177_s27, %s919_s29 }
  0xf3   : >> { %6989 = sst [smem:[#allocation72_spill]] %s5885_s18  ;;  %s946_s22 = sshra.s32 %s5878_s12, 3 }
  0xf4   : >> { %s957_s19 = sshra.s32 %s956_s28, 3  ;;  %s938_s1 = sand.u32 7, %s5875_s21 }
  0xf5   : >> { %s4179_s4 = smul.u32 24, %s935_s30  ;;  %s949_s5 = sand.u32 7, %s5878_s12 }
  0xf6   : >> { %s4180_s7 = smul.u32 24, %s946_s22  ;;  %s967_s11 = sld [smem:[#allocation4 + %s966_s26]] }
  0xf7   : >> { %s4181_s3 = smul.u32 24, %s957_s19  ;;  %s977_s8 = sadd.s32 4, %s5872_s20 }
  0xf8   : >> { %s988_s14 = sadd.s32 5, %s5872_s20  ;;  %s960_s17 = sand.u32 7, %s956_s28 }
  0xf9   : >> { %s978_s10 = sld [smem:[#allocation4 + %s977_s8]]  ;;  %s5894_s23 = sadd.s32 %s4179_s4, %s938_s1 }
  0xfa   : >> { %6990 = sst [smem:[#allocation73_spill]] %s5894_s23  ;;  %s5898_s29 = sadd.s32 %s4180_s7, %s949_s5 }
  0xfb   : >> { %s5896_s25 = sld [smem:[#allocation4 + %s988_s14]]  ;;  %s999_s27 = sadd.s32 6, %s5872_s20 }
  0xfc   : >> { %6991 = sst [smem:[#allocation74_spill]] %s5898_s29  ;;  %s5901_s21 = sadd.s32 %s4181_s3, %s960_s17 }
  0xfd   : >> { %6992 = sst [smem:[#allocation75_spill]] %s5901_s21  ;;  %s1010_s12 = sadd.s32 7, %s5872_s20 }
  0xfe   : >> { %s968_s22 = sshra.s32 %s967_s11, 3  ;;  %s5904_s30 = sld [smem:[#allocation4 + %s999_s27]] }
  0xff   : >> { %s971_s8 = sand.u32 7, %s967_s11  ;;  %s4182_s28 = smul.u32 24, %s968_s22 }
 0x100   : >> { %s979_s14 = sshra.s32 %s978_s10, 3  ;;  %s5906_s26 = sld [smem:[#allocation4 + %s1010_s12]] }
 0x101   : >> { %s982_s5 = sand.u32 7, %s978_s10  ;;  %s4183_s19 = smul.u32 24, %s979_s14 }
 0x102   : >> { %s990_s1 = sshra.s32 %s5896_s25, 3  ;;  %s5909_s4 = sadd.s32 %s4182_s28, %s971_s8 }
 0x103   : >> { %6993 = sst [smem:[#allocation76_spill]] %s5909_s4  ;;  %s5911_s7 = sadd.s32 %s4183_s19, %s982_s5 }
 0x104   : >> { %s6994_s20 = sld [smem:[#allocation31_spill]]  ;;  %s4184_s3 = smul.u32 24, %s990_s1 }
 0x105   : >> { %6995 = sst [smem:[#allocation31_spill]] %s5911_s7  ;;  %s5914_s27 = sadd.s32 56, %s5680_s24 }
 0x106   : >> { %s6996_s17 = sld [smem:[#allocation32_spill]]  ;;  %s993_s11 = sand.u32 7, %s5896_s25 }
 0x107   : >> { %s1001_s22 = sshra.s32 %s5904_s30, 3  ;;  %s1012_s12 = sshra.s32 %s5906_s26, 3 }
 0x108   : >> { %s366_s29 = scalar_lea.vmem [#allocation5], %s5691_s6  ;;  %s377_s10 = scalar_lea.vmem [#allocation5], %s5693_s9 }
 0x109   : >> { %v367_v0 = vld [vmem:[%s366_s29] ss:$8 sm:$0x7]  ;;  %s6997_s14 = sld [smem:[#allocation33_spill]]  ;;  %s388_s8 = scalar_lea.vmem [#allocation5], %s5695_s2 }
 0x10a   : >> { %v378_v1 = vld [vmem:[%s377_s10] ss:$8 sm:$0x7]  ;;  %s399_s28 = scalar_lea.vmem [#allocation5], %s5698_s16  ;;  %s6998_s5 = sld [smem:[#allocation34_spill]] }
 0x10b   : >> { %v389_v2 = vld [vmem:[%s388_s8] ss:$8 sm:$0x7]  ;;  %s410_s19 = scalar_lea.vmem [#allocation5], %s6994_s20  ;;  %s6999_s24 = sld [smem:[#allocation35_spill]]  ;;  %v445_v16 = vadd.f32 %v378_v1, %v367_v0 }
 0x10c   : >> { %v400_v3 = vld [vmem:[%s399_s28] ss:$8 sm:$0x7]  ;;  %s421_s25 = scalar_lea.vmem [#allocation5], %s6996_s17  ;;  %s7000_s1 = sld [smem:[#allocation36_spill]] }
 0x10d   : >> { %v411_v4 = vld [vmem:[%s410_s19] ss:$8 sm:$0x7]  ;;  %s5926_s21 = sadd.s32 %s4184_s3, %s993_s11  ;;  %s7002_s6 = sld [smem:[#allocation37_spill]]  ;;  %v446_v17 = vadd.f32 %v400_v3, %v389_v2 }
 0x10e   : >> { %v422_v5 = vld [vmem:[%s421_s25] ss:$8 sm:$0x7]  ;;  %7001 = sst [smem:[#allocation32_spill]] %s5926_s21  ;;  %s5928_s7 = smul.u32 24, %s1001_s22 }
 0x10f   : >> { %s432_s29 = scalar_lea.vmem [#allocation5], %s5713_s0  ;;  %s7003_s9 = sld [smem:[#allocation38_spill]]  ;;  %v447_v18 = vadd.f32 %v422_v5, %v411_v4  ;;  %v449_v40 = vadd.f32 %v446_v17, %v445_v16 }
 0x110   : >> { %v433_v6 = vld [vmem:[%s432_s29] ss:$8 sm:$0x7]  ;;  %s5932_s10 = sld [smem:[#allocation4 + %s5914_s27]]  ;;  %s1040_s16 = sadd.s32 1, %s5914_s27 }
 0x111   : >> { %s7004_s2 = sld [smem:[#allocation39_spill]]  ;;  %s443_s8 = scalar_lea.vmem [#allocation5], %s6997_s14 }
 0x112   : >> { %s7005_s28 = sld [smem:[#allocation40_spill]]  ;;  %v444_v7 = vld [vmem:[%s443_s8] ss:$8 sm:$0x7]  ;;  %s5936_s20 = smul.u32 24, %s1012_s12 }
 0x113   : >> { %s5938_s17 = sld [smem:[#allocation4 + %s1040_s16]]  ;;  %s462_s3 = scalar_lea.vmem [#allocation5], %s6998_s5  ;;  %v448_v19 = vadd.f32 %v444_v7, %v433_v6 }
 0x114   : >> { %s7006_s11 = sld [smem:[#allocation41_spill]]  ;;  %v463_v8 = vld [vmem:[%s462_s3] ss:$8 sm:$0x7]  ;;  %s473_s22 = scalar_lea.vmem [#allocation5], %s6999_s24 }
 0x115   : >> { %v474_v9 = vld [vmem:[%s473_s22] ss:$8 sm:$0x7]  ;;  %s484_s0 = scalar_lea.vmem [#allocation5], %s7000_s1  ;;  %s495_s19 = scalar_lea.vmem [#allocation5], %s7002_s6  ;;  %v450_v41 = vadd.f32 %v448_v19, %v447_v18 }
 0x116   : >> { %v485_v10 = vld [vmem:[%s484_s0] ss:$8 sm:$0x7]  ;;  %s506_s25 = scalar_lea.vmem [#allocation5], %s7003_s9  ;;  %s7007_s14 = sld [smem:[#allocation42_spill]]  ;;  %v541_v35 = vadd.f32 %v474_v9, %v463_v8 }
 0x117   : >> { %v496_v11 = vld [vmem:[%s495_s19] ss:$8 sm:$0x7]  ;;  %s517_s29 = scalar_lea.vmem [#allocation5], %s7004_s2  ;;  %s7008_s12 = sld [smem:[#allocation43_spill]]  ;;  %v6004_v60 = vadd.f32 %v450_v41, %v449_v40 }
 0x118   : >> { %v507_v12 = vld [vmem:[%s506_s25] ss:$8 sm:$0x7]  ;;  %s528_s8 = scalar_lea.vmem [#allocation5], %s7005_s28  ;;  %s7009_s16 = sld [smem:[#allocation44_spill]]  ;;  %v542_v36 = vadd.f32 %v496_v11, %v485_v10 }
 0x119   : >> { %v518_v13 = vld [vmem:[%s517_s29] ss:$8 sm:$0x7]  ;;  %s7010_s5 = sld [smem:[#allocation45_spill]]  ;;  %s1051_s4 = sadd.s32 2, %s5914_s27 }
 0x11a   : >> { %v529_v14 = vld [vmem:[%s528_s8] ss:$8 sm:$0x7]  ;;  %s539_s3 = scalar_lea.vmem [#allocation5], %s7006_s11  ;;  %s7011_s24 = sld [smem:[#allocation46_spill]]  ;;  %v543_v37 = vadd.f32 %v518_v13, %v507_v12  ;;  %v545_v58 = vadd.f32 %v542_v36, %v541_v35 }
 0x11b   : >> { %v540_v15 = vld [vmem:[%s539_s3] ss:$8 sm:$0x7]  ;;  %s5950_s22 = sld [smem:[#allocation4 + %s1051_s4]]  ;;  %s1062_s6 = sadd.s32 3, %s5914_s27 }
 0x11c   : >> { %s7012_s1 = sld [smem:[#allocation47_spill]]  ;;  %s558_s0 = scalar_lea.vmem [#allocation5], %s7007_s14  ;;  %v544_v38 = vadd.f32 %v540_v15, %v529_v14 }
 0x11d   : >> { %s7013_s9 = sld [smem:[#allocation48_spill]]  ;;  %v559_v20 = vld [vmem:[%s558_s0] ss:$8 sm:$0x7]  ;;  %s569_s28 = scalar_lea.vmem [#allocation5], %s7008_s12 }
 0x11e   : >> { %s7014_s2 = sld [smem:[#allocation49_spill]]  ;;  %v570_v21 = vld [vmem:[%s569_s28] ss:$8 sm:$0x7]  ;;  %s580_s25 = scalar_lea.vmem [#allocation5], %s7009_s16  ;;  %v546_v59 = vadd.f32 %v544_v38, %v543_v37 }
 0x11f   : >> { %s7015_s19 = sld [smem:[#allocation50_spill]]  ;;  %v581_v22 = vld [vmem:[%s580_s25] ss:$8 sm:$0x7]  ;;  %s591_s29 = scalar_lea.vmem [#allocation5], %s7010_s5  ;;  %v637_v48 = vadd.f32 %v570_v21, %v559_v20 }
 0x120   : >> { %s7016_s11 = sld [smem:[#allocation51_spill]]  ;;  %v592_v23 = vld [vmem:[%s591_s29] ss:$8 sm:$0x7]  ;;  %s602_s8 = scalar_lea.vmem [#allocation5], %s7011_s24  ;;  %v6026_v12 = vadd.f32 %v546_v59, %v545_v58 }
 0x121   : >> { %s7017_s4 = sld [smem:[#allocation52_spill]]  ;;  %v603_v24 = vld [vmem:[%s602_s8] ss:$8 sm:$0x7]  ;;  %s1073_s5 = sadd.s32 4, %s5914_s27  ;;  %v638_v49 = vadd.f32 %v592_v23, %v581_v22 }
 0x122   : >> { %s7018_s3 = sld [smem:[#allocation53_spill]]  ;;  %s613_s21 = scalar_lea.vmem [#allocation5], %s7012_s1  ;;  %v1134_v35 = vperm.slane %v6026_v12, 2 }
 0x123   : >> { %s7019_s23 = sld [smem:[#allocation54_spill]]  ;;  %v614_v25 = vld [vmem:[%s613_s21] ss:$8 sm:$0x7]  ;;  %s624_s18 = scalar_lea.vmem [#allocation5], %s7013_s9  ;;  %v641_v5 = vadd.f32 %v638_v49, %v637_v48 }
 0x124   : >> { %s7020_s15 = sld [smem:[#allocation55_spill]]  ;;  %v625_v26 = vld [vmem:[%s624_s18] ss:$8 sm:$0x7]  ;;  %s635_s14 = scalar_lea.vmem [#allocation5], %s7014_s2  ;;  %v639_v50 = vadd.f32 %v614_v25, %v603_v24 }
 0x125   : >> { %v636_v27 = vld [vmem:[%s635_s14] ss:$8 sm:$0x7]  ;;  %s5961_s12 = sld [smem:[#allocation4 + %s1062_s6]]  ;;  %s654_s0 = scalar_lea.vmem [#allocation5], %s7015_s19 }
 0x126   : >> { %s7021_s16 = sld [smem:[#allocation56_spill]]  ;;  %v655_v28 = vld [vmem:[%s654_s0] ss:$8 sm:$0x7]  ;;  %s665_s24 = scalar_lea.vmem [#allocation5], %s7016_s11  ;;  %v640_v51 = vadd.f32 %v636_v27, %v625_v26  ;;  %v1125_v27 = vperm.slane %v6004_v60, 0 }
 0x127   : >> { %v666_v29 = vld [vmem:[%s665_s24] ss:$8 sm:$0x7]  ;;  %s676_s1 = scalar_lea.vmem [#allocation5], %s7017_s4  ;;  %s7022_s9 = sld [smem:[#allocation57_spill]] }
 0x128   : >> { %v677_v30 = vld [vmem:[%s676_s1] ss:$8 sm:$0x7]  ;;  %s687_s21 = scalar_lea.vmem [#allocation5], %s7018_s3  ;;  %s7023_s28 = sand.u32 7, %s5904_s30  ;;  %v733_v53 = vadd.f32 %v666_v29, %v655_v28  ;;  %v642_v6 = vadd.f32 %v640_v51, %v639_v50 }
 0x129   : >> { %v688_v31 = vld [vmem:[%s687_s21] ss:$8 sm:$0x7]  ;;  %s698_s18 = scalar_lea.vmem [#allocation5], %s7019_s23  ;;  %s7024_s6 = sld [smem:[#allocation58_spill]] }
 0x12a   : >> { %v699_v32 = vld [vmem:[%s698_s18] ss:$8 sm:$0x7]  ;;  %s709_s2 = scalar_lea.vmem [#allocation5], %s7020_s15  ;;  %s5973_s25 = sadd.s32 %s5928_s7, %s7023_s28  ;;  %v734_v54 = vadd.f32 %v688_v31, %v677_v30  ;;  %v643_v24 = vadd.f32 %v642_v6, %v641_v5  ;;  %v1126_v31 = vperm.slane %v6004_v60, 1 }
 0x12b   : >> { %v710_v33 = vld [vmem:[%s709_s2] ss:$8 sm:$0x7]  ;;  %s7025_s29 = sand.u32 7, %s5906_s26  ;;  %s7026_s8 = sld [smem:[#allocation59_spill]] }
 0x12c   : >> { %s5978_s19 = sadd.s32 %s5936_s20, %s7025_s29  ;;  %s720_s11 = scalar_lea.vmem [#allocation5], %s7021_s16  ;;  %v735_v55 = vadd.f32 %v710_v33, %v699_v32  ;;  %v737_v7 = vadd.f32 %v734_v54, %v733_v53  ;;  %v1132_v32 = vperm.slane %v6026_v12, 0  ;;  %v1127_v33 = vperm.slane %v6004_v60, 2 }
 0x12d   : >> { %v721_v34 = vld [vmem:[%s720_s11] ss:$8 sm:$0x7]  ;;  %s7027_s4 = sld [smem:[#allocation60_spill]]  ;;  %s1031_s14 = sshra.s32 %s5932_s10, 3 }
 0x12e   : >> { %s5982_s3 = sld [smem:[#allocation4 + %s1073_s5]]  ;;  %s731_s30 = scalar_lea.vmem [#allocation5], %s7022_s9  ;;  %v1183_v49 = vsel %vm1180_vm0, %v1127_v33, %v1134_v35 }
 0x12f   : >> { %s7028_s0 = sld [smem:[#allocation61_spill]]  ;;  %v732_v39 = vld [vmem:[%s731_s30] ss:$8 sm:$0x7]  ;;  %s1042_s7 = sshra.s32 %s5938_s17, 3 }
 0x130   : >> { %s7029_s23 = sld [smem:[#allocation62_spill]]  ;;  %s750_s26 = scalar_lea.vmem [#allocation5], %s7024_s6  ;;  %v736_v56 = vadd.f32 %v732_v39, %v721_v34  ;;  %v1133_v34 = vperm.slane %v6026_v12, 1 }
 0x131   : >> { %s7030_s15 = sld [smem:[#allocation63_spill]]  ;;  %v751_v42 = vld [vmem:[%s750_s26] ss:$8 sm:$0x7]  ;;  %s761_s16 = scalar_lea.vmem [#allocation5], %s7026_s8 }
 0x132   : >> { %s7031_s20 = sld [smem:[#allocation64_spill]]  ;;  %v762_v43 = vld [vmem:[%s761_s16] ss:$8 sm:$0x7]  ;;  %s5993_s2 = smul.u32 24, %s1031_s14  ;;  %v738_v8 = vadd.f32 %v736_v56, %v735_v55  ;;  %v1182_v48 = vsel %vm1180_vm0, %v1126_v31, %v1133_v34 }
 0x133   : >> { %s772_s5 = scalar_lea.vmem [#allocation5], %s7027_s4  ;;  %s7032_s21 = sld [smem:[#allocation65_spill]]  ;;  %v829_v0 = vadd.f32 %v762_v43, %v751_v42  ;;  %v1139_v42 = vperm.slane %v643_v24, 0  ;;  %v1140_v43 = vperm.slane %v643_v24, 1 }
 0x134   : >> { %v773_v44 = vld [vmem:[%s772_s5] ss:$8 sm:$0x7]  ;;  %s1053_s28 = sshra.s32 %s5950_s22, 3  ;;  %s7033_s6 = sld [smem:[#allocation66_spill]]  ;;  %v6046_v25 = vadd.f32 %v738_v8, %v737_v7 }
 0x135   : >> { %s783_s24 = scalar_lea.vmem [#allocation5], %s7028_s0  ;;  %s7034_s29 = sld [smem:[#allocation67_spill]]  ;;  %v1186_v60 = vsel %vm1184_vm1, %v1182_v48, %v1140_v43 }
 0x136   : >> { %v784_v45 = vld [vmem:[%s783_s24] ss:$8 sm:$0x7]  ;;  %s794_s1 = scalar_lea.vmem [#allocation5], %s7029_s23  ;;  %s1034_s11 = sand.u32 7, %s5932_s10  ;;  %v1148_v55 = vperm.slane %v6046_v25, 2 }
 0x137   : >> { %v795_v46 = vld [vmem:[%s794_s1] ss:$8 sm:$0x7]  ;;  %s805_s18 = scalar_lea.vmem [#allocation5], %s7030_s15  ;;  %s6000_s4 = smul.u32 24, %s1042_s7  ;;  %v830_v1 = vadd.f32 %v784_v45, %v773_v44  ;;  %v1141_v44 = vperm.slane %v643_v24, 2  ;;  %v1181_v45 = vsel %vm1180_vm0, %v1125_v27, %v1132_v32 }
 0x138   : >> { %v806_v47 = vld [vmem:[%s805_s18] ss:$8 sm:$0x7]  ;;  %s816_s9 = scalar_lea.vmem [#allocation5], %s7031_s20  ;;  %s7035_s0 = sld [smem:[#allocation68_spill]]  ;;  %v1185_v56 = vsel %vm1184_vm1, %v1181_v45, %v1139_v42 }
 0x139   : >> { %v817_v52 = vld [vmem:[%s816_s9] ss:$8 sm:$0x7]  ;;  %s827_s8 = scalar_lea.vmem [#allocation5], %s7032_s21  ;;  %s1045_s23 = sand.u32 7, %s5938_s17  ;;  %v831_v2 = vadd.f32 %v806_v47, %v795_v46  ;;  %v833_v16 = vadd.f32 %v830_v1, %v829_v0  ;;  %v1146_v47 = vperm.slane %v6046_v25, 0 }
 0x13a   : >> { %v828_v57 = vld [vmem:[%s827_s8] ss:$8 sm:$0x7]  ;;  %s1084_s14 = sadd.s32 5, %s5914_s27  ;;  %s846_s15 = scalar_lea.vmem [#allocation5], %s5859_s13 }
 0x13b   : >> { %v847_v61 = vld [vmem:[%s846_s15] ss:$8 sm:$0x7]  ;;  %s857_s30 = scalar_lea.vmem [#allocation5], %s7033_s6  ;;  %s868_s26 = scalar_lea.vmem [#allocation5], %s7034_s29  ;;  %v832_v3 = vadd.f32 %v828_v57, %v817_v52  ;;  %v1147_v52 = vperm.slane %v6046_v25, 1 }
 0x13c   : >> { %v858_v62 = vld [vmem:[%s857_s30] ss:$8 sm:$0x7]  ;;  %s7036_s20 = sld [smem:[#allocation69_spill]]  ;;  %s6009_s10 = smul.u32 24, %s1053_s28 }
 0x13d   : >> { %v869_v63 = vld [vmem:[%s868_s26] ss:$8 sm:$0x7]  ;;  %s7037_s7 = sld [smem:[#allocation70_spill]]  ;;  %s1064_s16 = sshra.s32 %s5961_s12, 3  ;;  %v834_v17 = vadd.f32 %v832_v3, %v831_v2  ;;  %v925_v18 = vadd.f32 %v858_v62, %v847_v61  ;;  %v1187_v61 = vsel %vm1184_vm1, %v1183_v49, %v1141_v44  ;;  %v1189_v3 = vsel %vm1188_vm2, %v1185_v56, %v1146_v47 }
 0x13e   : >> { %s7038_s5 = sld [smem:[#allocation71_spill]]  ;;  %s879_s24 = scalar_lea.vmem [#allocation5], %s7035_s0  ;;  %v1190_v6 = vsel %vm1188_vm2, %v1186_v60, %v1147_v52  ;;  %v1191_v7 = vsel %vm1188_vm2, %v1187_v61, %v1148_v55 }
 0x13f   : >> { %v880_v4 = vld [vmem:[%s879_s24] ss:$8 sm:$0x7]  ;;  %s7039_s13 = sld [smem:[#allocation72_spill]]  ;;  %s6014_s1 = sadd.s32 %s5993_s2, %s1034_s11  ;;  %v6067_v36 = vadd.f32 %v834_v17, %v833_v16 }
 0x140   : >> { %s1056_s21 = sand.u32 7, %s5950_s22  ;;  %s7040_s18 = sld [smem:[#allocation73_spill]]  ;;  %v926_v19 = vadd.f32 %v880_v4, %v869_v63 }
 0x141   : >> { %s7041_s9 = sld [smem:[#allocation74_spill]]  ;;  %s6023_s8 = sadd.s32 %s6000_s4, %s1045_s23  ;;  %v1153_v59 = vperm.slane %v6067_v36, 0  ;;  %v1154_v0 = vperm.slane %v6067_v36, 1  ;;  %v1155_v1 = vperm.slane %v6067_v36, 2 }
 0x142   : >> { %s890_s28 = scalar_lea.vmem [#allocation5], %s7036_s20  ;;  %s1075_s2 = sshra.s32 %s5982_s3, 3  ;;  %v929_v37 = vadd.f32 %v926_v19, %v925_v18 }
 0x143   : >> { %v891_v9 = vld [vmem:[%s890_s28] ss:$8 sm:$0x7]  ;;  %s901_s6 = scalar_lea.vmem [#allocation5], %s7037_s7  ;;  %s7042_s22 = sld [smem:[#allocation75_spill]]  ;;  %v1194_v16 = vsel %vm1192_vm3, %v1190_v6, %v1154_v0  ;;  %v1195_v17 = vsel %vm1192_vm3, %v1191_v7, %v1155_v1 }
 0x144   : >> { %v902_v10 = vld [vmem:[%s901_s6] ss:$8 sm:$0x7]  ;;  %s912_s29 = scalar_lea.vmem [#allocation5], %s7038_s5  ;;  %s7043_s0 = sld [smem:[#allocation76_spill]] }
 0x145   : >> { %v913_v11 = vld [vmem:[%s912_s29] ss:$8 sm:$0x7]  ;;  %s923_s11 = scalar_lea.vmem [#allocation5], %s7039_s13  ;;  %s1067_s15 = sand.u32 7, %s5961_s12  ;;  %v927_v28 = vadd.f32 %v902_v10, %v891_v9 }
 0x146   : >> { %v924_v13 = vld [vmem:[%s923_s11] ss:$8 sm:$0x7]  ;;  %s7044_s30 = sld [smem:[#allocation31_spill]]  ;;  %s6030_s26 = smul.u32 24, %s1064_s16 }
 0x147   : >> { %s942_s20 = scalar_lea.vmem [#allocation5], %s7040_s18  ;;  %s7045_s7 = sld [smem:[#allocation32_spill]]  ;;  %v928_v29 = vadd.f32 %v924_v13, %v913_v11 }
 0x148   : >> { %v943_v14 = vld [vmem:[%s942_s20] ss:$8 sm:$0x7]  ;;  %s953_s24 = scalar_lea.vmem [#allocation5], %s7041_s9  ;;  %s6035_s17 = sadd.s32 %s6009_s10, %s1056_s21 }
 0x149   : >> { %v954_v15 = vld [vmem:[%s953_s24] ss:$8 sm:$0x7]  ;;  %s1078_s4 = sand.u32 7, %s5982_s3  ;;  %s964_s23 = scalar_lea.vmem [#allocation5], %s7042_s22  ;;  %v930_v46 = vadd.f32 %v928_v29, %v927_v28 }
 0x14a   : >> { %v965_v20 = vld [vmem:[%s964_s23] ss:$8 sm:$0x7]  ;;  %s975_s16 = scalar_lea.vmem [#allocation5], %s7043_s0  ;;  %s4192_s10 = smul.u32 24, %s1075_s2  ;;  %v1021_v38 = vadd.f32 %v954_v15, %v943_v14  ;;  %v1193_v15 = vsel %vm1192_vm3, %v1189_v3, %v1153_v59 }
 0x14b   : >> { %v976_v21 = vld [vmem:[%s975_s16] ss:$8 sm:$0x7]  ;;  %s6044_s21 = sld [smem:[#allocation4 + %s1084_s14]]  ;;  %s1008_s18 = scalar_lea.vmem [#allocation5], %s5973_s25  ;;  %v931_v62 = vadd.f32 %v930_v46, %v929_v37 }
 0x14c   : >> { %s986_s5 = scalar_lea.vmem [#allocation5], %s7044_s30  ;;  %v1009_v26 = vld [vmem:[%s1008_s18] ss:$8 sm:$0x7]  ;;  %s1095_s9 = sadd.s32 6, %s5914_s27  ;;  %v1022_v39 = vadd.f32 %v976_v21, %v965_v20 }
 0x14d   : >> { %v987_v22 = vld [vmem:[%s986_s5] ss:$8 sm:$0x7]  ;;  %s997_s13 = scalar_lea.vmem [#allocation5], %s7045_s7  ;;  %s1106_s28 = sadd.s32 7, %s5914_s27  ;;  %v1160_v11 = vperm.slane %v931_v62, 0 }
 0x14e   : >> { %v998_v23 = vld [vmem:[%s997_s13] ss:$8 sm:$0x7]  ;;  %s1019_s6 = scalar_lea.vmem [#allocation5], %s5978_s19  ;;  %s6056_s29 = sadd.s32 %s6030_s26, %s1067_s15  ;;  %v1025_v53 = vadd.f32 %v1022_v39, %v1021_v38  ;;  %v1161_v12 = vperm.slane %v931_v62, 1  ;;  %v1162_v13 = vperm.slane %v931_v62, 2 }
 0x14f   : >> { %v1020_v30 = vld [vmem:[%s1019_s6] ss:$8 sm:$0x7]  ;;  %s6058_s2 = sld [smem:[#allocation4 + %s1095_s9]]  ;;  %s6071_s27 = sadd.s32 %s4192_s10, %s1078_s4  ;;  %v1023_v40 = vadd.f32 %v998_v23, %v987_v22  ;;  %v1197_v24 = vsel %vm1196_vm4, %v1193_v15, %v1160_v11 }
 0x150   : >> { %s6062_s25 = sld [smem:[#allocation4 + %s1106_s28]]  ;;  %v1024_v41 = vadd.f32 %v1020_v30, %v1009_v26  ;;  %s1038_s14 = scalar_lea.vmem [#allocation5], %s6014_s1  ;;  %v1198_v25 = vsel %vm1196_vm4, %v1194_v16, %v1161_v12  ;;  %v1199_v26 = vsel %vm1196_vm4, %v1195_v17, %v1162_v13 }
 0x151   : >> { %s1086_s12 = sshra.s32 %s6044_s21, 3  ;;  %s1089_s19 = sand.u32 7, %s6044_s21  ;;  %v1039_v50 = vld [vmem:[%s1038_s14] ss:$8 sm:$0x7] }
 0x152   : >> { %s4193_s3 = smul.u32 24, %s1086_s12  ;;  %s1049_s22 = scalar_lea.vmem [#allocation5], %s6023_s8  ;;  %v1026_v57 = vadd.f32 %v1024_v41, %v1023_v40 }
 0x153   : >> { %v1050_v51 = vld [vmem:[%s1049_s22] ss:$8 sm:$0x7]  ;;  %s1060_s15 = scalar_lea.vmem [#allocation5], %s6035_s17  ;;  %s1071_s1 = scalar_lea.vmem [#allocation5], %s6056_s29 }
 0x154   : >> { %v1061_v54 = vld [vmem:[%s1060_s15] ss:$8 sm:$0x7]  ;;  %s1092_s30 = sadd.s32 %s4193_s3, %s1089_s19  ;;  %s1082_s20 = scalar_lea.vmem [#allocation5], %s6071_s27  ;;  %v1117_v4 = vadd.f32 %v1050_v51, %v1039_v50  ;;  %v1027_v8 = vadd.f32 %v1026_v57, %v1025_v53 }
 0x155   : >> { %s1097_s11 = sshra.s32 %s6058_s2, 3  ;;  %s1100_s0 = sand.u32 7, %s6058_s2  ;;  %v1072_v58 = vld [vmem:[%s1071_s1] ss:$8 sm:$0x7] }
 0x156   : >> { %s4194_s26 = smul.u32 24, %s1097_s11  ;;  %s1108_s8 = sshra.s32 %s6062_s25, 3  ;;  %v1083_v63 = vld [vmem:[%s1082_s20] ss:$8 sm:$0x7]  ;;  %v1118_v5 = vadd.f32 %v1072_v58, %v1061_v54  ;;  %v1167_v20 = vperm.slane %v1027_v8, 0 }
 0x157   : >> { %s1111_s24 = sand.u32 7, %s6062_s25  ;;  %s1093_s17 = scalar_lea.vmem [#allocation5], %s1092_s30  ;;  %v1168_v21 = vperm.slane %v1027_v8, 1  ;;  %v1169_v22 = vperm.slane %v1027_v8, 2 }
 0x158   : >> { %s1103_s7 = sadd.s32 %s4194_s26, %s1100_s0  ;;  %v1094_v2 = vld [vmem:[%s1093_s17] ss:$8 sm:$0x7]  ;;  %s4195_s4 = smul.u32 24, %s1108_s8  ;;  %v1121_v19 = vadd.f32 %v1118_v5, %v1117_v4  ;;  %v1201_v28 = vsel %vm1200_vm5, %v1197_v24, %v1167_v20 }
 0x159   : >> { %s7046_s23 = sld [smem:[#allocation30_spill]]  ;;  %s1104_s16 = scalar_lea.vmem [#allocation5], %s1103_s7  ;;  %v1119_v10 = vadd.f32 %v1094_v2, %v1083_v63  ;;  %v1202_v29 = vsel %vm1200_vm5, %v1198_v25, %v1168_v21  ;;  %v1203_v30 = vsel %vm1200_vm5, %v1199_v26, %v1169_v22 }
 0x15a   : >> { %v1105_v9 = vld [vmem:[%s1104_s16] ss:$8 sm:$0x7]  ;;  %s1114_s5 = sadd.s32 %s4195_s4, %s1111_s24 }
 0x15b   : >> { %s1115_s13 = scalar_lea.vmem [#allocation5], %s1114_s5 }
 0x15c   : >> { %v1116_v14 = vld [vmem:[%s1115_s13] ss:$8 sm:$0x7] }
 0x15d   : >> { %v1120_v18 = vadd.f32 %v1116_v14, %v1105_v9 }
 0x15f   : >> { %s7047_s10 = sshll.u32 %s7046_s23, 3  ;;  %v1122_v23 = vadd.f32 %v1120_v18, %v1119_v10  ;;  %s354_s26 = sadd.s32 1, %s7046_s23  }
 0x160   : >> { %s1208_s21 = sshra.s32 %s7047_s10, 3  ;;  %p351_p13 = scmp.ge.s32.totalorder %s354_s26, 16  }
 0x161   : >> { %s4888_s18 = smul.u32 24, %s1208_s21  ;;  %v1123_v27 = vadd.f32 %v1122_v23, %v1121_v19  ;;  %v4283_v37 = vld [vmem:[#allocation8 + $0xa8] sm:$0xf] (%p351_p13)  ;;  %v4911_v38 = vld [vmem:[#allocation8 + $0xb0] sm:$0xf0] (%p351_p13)  ;;  %s7048_s29 = sld [smem:[#allocation81_spill]] (%p351_p13) }
 0x162   : > { %v4271_v39 = vld [vmem:[#allocation8 + $0x90] sm:$0xf] (%p351_p13)  ;;  %v4284_v40 = vor.u32 (%p351_p13), %v4911_v38, %v4283_v37  ;;  %v4908_v41 = vld [vmem:[#allocation8 + $0x98] sm:$0xf0] (%p351_p13)  ;;  %v4259_v43 = vld [vmem:[#allocation8 + $0x78] sm:$0xf] (%p351_p13) }
 0x163   : >> { %v1174_v31 = vperm.slane %v1123_v27, 0  ;;  %v1175_v32 = vperm.slane %v1123_v27, 1  ;;  %v1176_v33 = vperm.slane %v1123_v27, 2  ;;  %s1212_s9 = scalar_lea.vmem [#allocation2], %s4888_s18  ;;  %v4272_v42 = vor.u32 (%p351_p13), %v4908_v41, %v4271_v39  ;;  %v4905_v44 = vld [vmem:[#allocation8 + $0x80] sm:$0xf0] (%p351_p13) }
 0x164   : > { %353 = sbr.rel (!%p351_p13) target bundleno = 66 (0x42), region = 173  ;;  %1776 = vmatpush.bf16.msra.mxu0 (%p351_p13), %v4284_v40  ;;  %5058 = vmatpush.bf16.msra.mxu1 (%p351_p13), %v4284_v40  ;;  %v4260_v45 = vor.u32 (%p351_p13), %v4905_v44, %v4259_v43  ;;  %v4247_v46 = vld [vmem:[#allocation8 + $0x60] sm:$0xf] (%p351_p13)  ;;  %v4902_v47 = vld [vmem:[#allocation8 + $0x68] sm:$0xf0] (%p351_p13)  ;;  %s7049_s27 = sld [smem:[#allocation83_spill]] (%p351_p13) }
 0x165   : >> { %v1205_v34 = vsel %vm1204_vm6, %v1201_v28, %v1174_v31  ;;  %v1206_v35 = vsel %vm1204_vm6, %v1202_v29, %v1175_v32  ;;  %v1207_v36 = vsel %vm1204_vm6, %v1203_v30, %v1176_v33  ;;  %5059 = vmatpush.bf16.msra.mxu2 (%p351_p13), %v4284_v40  ;;  %5060 = vmatpush.bf16.msra.mxu3 (%p351_p13), %v4284_v40  ;;  %v4235_v49 = vld [vmem:[#allocation8 + $0x48] sm:$0xf] (%p351_p13)  ;;  %v4899_v50 = vld [vmem:[#allocation8 + $0x50] sm:$0xf0] (%p351_p13)  ;;  %v4223_v52 = vld [vmem:[#allocation8 + $0x30] sm:$0xf] (%p351_p13) }
 0x166   : >> { %1213 = vst [vmem:[%s1212_s9] sm:$0xff] %v1205_v34  ;;  %v4248_v48 = vor.u32 (%p351_p13), %v4902_v47, %v4247_v46  ;;  %v4236_v51 = vor.u32 (%p351_p13), %v4899_v50, %v4235_v49  ;;  %v4896_v53 = vld [vmem:[#allocation8 + $0x38] sm:$0xf0] (%p351_p13)  ;;  %v4211_v55 = vld [vmem:[#allocation8 + $0x18] sm:$0xf] (%p351_p13)  ;;  %v4893_v56 = vld [vmem:[#allocation8 + $0x20] sm:$0xf0] (%p351_p13) }
 0x167   : >> { %1214 = vst [vmem:[%s1212_s9 + $0x8] sm:$0xff] %v1206_v35  ;;  %v4224_v54 = vor.u32 (%p351_p13), %v4896_v53, %v4223_v52  ;;  %v4212_v57 = vor.u32 (%p351_p13), %v4893_v56, %v4211_v55  ;;  %v4199_v58 = vld [vmem:[#allocation8] sm:$0xf] (%p351_p13)  ;;  %v4890_v59 = vld [vmem:[#allocation8 + $0x8] sm:$0xf0] (%p351_p13)  ;;  %s7050_s12 = sld [smem:[#allocation29_spill]] (%p351_p13) }
 0x168   : >> { %1215 = vst [vmem:[%s1212_s9 + $0x10] sm:$0xff] %v1207_v36  ;;  %1777 = vmatpush.bf16.msra.mxu0 (%p351_p13), %v4272_v42  ;;  %5061 = vmatpush.bf16.msra.mxu1 (%p351_p13), %v4272_v42  ;;  %v4379_v62 = vld [vmem:[#allocation8 + $0x168] sm:$0xf] (%p351_p13)  ;;  %v4935_v63 = vld [vmem:[#allocation8 + $0x170] sm:$0xf0] (%p351_p13)  ;;  %v4200_v2 = vor.u32 (%p351_p13), %v4890_v59, %v4199_v58  ;;  %s7051_s19 = sld [smem:[#allocation24_spill]] (%p351_p13) }
 0x169   : > { %5062 = vmatpush.bf16.msra.mxu2 %v4272_v42  ;;  %5063 = vmatpush.bf16.msra.mxu3 %v4272_v42  ;;  %v4475_v0 = vld [vmem:[#allocation8 + $0x228] sm:$0xf]  ;;  %v4959_v1 = vld [vmem:[#allocation8 + $0x230] sm:$0xf0]  ;;  %v4934_v7 = vld [vmem:[#allocation8 + $0x16c] sm:$0xf]  ;;  %v4380_v9 = vor.u32 %v4935_v63, %v4379_v62 }
 0x16a   : > { %v4381_v8 = vld [vmem:[#allocation8 + $0x174] sm:$0xf0]  ;;  %v4476_v10 = vor.u32 %v4959_v1, %v4475_v0  ;;  %v4910_v13 = vld [vmem:[#allocation8 + $0xac] sm:$0xf]  ;;  %v4367_v17 = vld [vmem:[#allocation8 + $0x150] sm:$0xf] }
 0x16b   : > { %v4285_v16 = vld [vmem:[#allocation8 + $0xb4] sm:$0xf0]  ;;  %v4932_v18 = vld [vmem:[#allocation8 + $0x158] sm:$0xf0]  ;;  %v4384_v20 = vor.u32 %v4934_v7, %v4381_v8  ;;  %v4463_v21 = vld [vmem:[#allocation8 + $0x210] sm:$0xf] }
 0x16c   : > { %1778 = vmatpush.bf16.msra.mxu0 %v4260_v45  ;;  %5064 = vmatpush.bf16.msra.mxu1 %v4260_v45  ;;  %v4956_v22 = vld [vmem:[#allocation8 + $0x218] sm:$0xf0]  ;;  %v4931_v24 = vld [vmem:[#allocation8 + $0x154] sm:$0xf]  ;;  %v4369_v25 = vld [vmem:[#allocation8 + $0x15c] sm:$0xf0]  ;;  %v4288_v26 = vor.u32 %v4910_v13, %v4285_v16  ;;  %v4368_v27 = vor.u32 %v4932_v18, %v4367_v17 }
 0x16d   : > { %5065 = vmatpush.bf16.msra.mxu2 %v4260_v45  ;;  %5066 = vmatpush.bf16.msra.mxu3 %v4260_v45  ;;  %v4907_v28 = vld [vmem:[#allocation8 + $0x94] sm:$0xf]  ;;  %v4464_v29 = vor.u32 %v4956_v22, %v4463_v21  ;;  %v4273_v30 = vld [vmem:[#allocation8 + $0x9c] sm:$0xf0]  ;;  %v4355_v31 = vld [vmem:[#allocation8 + $0x138] sm:$0xf]  ;;  %v4372_v33 = vor.u32 %v4931_v24, %v4369_v25 }
 0x16e   : > { %v4929_v32 = vld [vmem:[#allocation8 + $0x140] sm:$0xf0]  ;;  %v4451_v34 = vld [vmem:[#allocation8 + $0x1f8] sm:$0xf]  ;;  %v4928_v36 = vld [vmem:[#allocation8 + $0x13c] sm:$0xf]  ;;  %v4276_v38 = vor.u32 %v4907_v28, %v4273_v30 }
 0x16f   : > { %v1216_v60 = vld [vmem:[#allocation2] sm:$0xff]  ;;  %v1219_v61 = vld [vmem:[#allocation2 + $0x18] sm:$0xff]  ;;  %v4357_v37 = vld [vmem:[#allocation8 + $0x144] sm:$0xf0]  ;;  %v4356_v39 = vor.u32 %v4929_v32, %v4355_v31  ;;  %s7052_s3 = sld [smem:[#allocation21_spill]]  ;;  %s7054_s22 = sshll.u32 %s7051_s19, 7 }
 0x170   : > { %1779 = vmatpush.bf16.msra.mxu0 %v4248_v48  ;;  %5067 = vmatpush.bf16.msra.mxu1 %v4248_v48  ;;  %v1228_v3 = vld [vmem:[#allocation2 + $0x60] sm:$0xff]  ;;  %v1231_v4 = vld [vmem:[#allocation2 + $0x78] sm:$0xff]  ;;  %v6107_v14 = vpack.c.bf16 %v1219_v61, %v1216_v60  ;;  %v4261_v42 = vld [vmem:[#allocation8 + $0x84] sm:$0xf0]  ;;  %v4360_v45 = vor.u32 %v4928_v36, %v4357_v37  ;;  %s7055_s15 = sld [smem:[#allocation84_spill]]  ;;  %s3806_s26 = sshll.u32 %s7050_s12, 4  ;;  %s3807_s26 = int_to_ptr.vmem [resolvable:$true] %s3806_s26 }
 0x171   : > { %5068 = vmatpush.bf16.msra.mxu2 %v4248_v48  ;;  %5069 = vmatpush.bf16.msra.mxu3 %v4248_v48  ;;  %v1240_v5 = vld [vmem:[#allocation2 + $0xc0] sm:$0xff]  ;;  %v1243_v6 = vld [vmem:[#allocation2 + $0xd8] sm:$0xff]  ;;  %v6109_v15 = vpack.c.bf16 %v1231_v4, %v1228_v3  ;;  %v4926_v44 = vld [vmem:[#allocation8 + $0x128] sm:$0xf0] }
 0x172   : > { %v1252_v11 = vld [vmem:[#allocation2 + $0x120] sm:$0xff]  ;;  %v1255_v12 = vld [vmem:[#allocation2 + $0x138] sm:$0xff]  ;;  %v6111_v19 = vpack.c.bf16 %v1243_v6, %v1240_v5  ;;  %v4950_v47 = vld [vmem:[#allocation8 + $0x1e8] sm:$0xf0] }
 0x173   : > { %v6113_v23 = vpack.c.bf16 %v1255_v12, %v1252_v11  ;;  %v4953_v35 = vld [vmem:[#allocation8 + $0x200] sm:$0xf0]  ;;  %v4904_v40 = vld [vmem:[#allocation8 + $0x7c] sm:$0xf]  ;;  %v4343_v43 = vld [vmem:[#allocation8 + $0x120] sm:$0xf] }
 0x174   : > { %1780 = vmatpush.bf16.msra.mxu0 %v4236_v51  ;;  %5070 = vmatpush.bf16.msra.mxu1 %v4236_v51  ;;  %v4452_v41 = vor.u32 %v4953_v35, %v4451_v34  ;;  %v4439_v46 = vld [vmem:[#allocation8 + $0x1e0] sm:$0xf]  ;;  %v4925_v48 = vld [vmem:[#allocation8 + $0x124] sm:$0xf]  ;;  %v4345_v49 = vld [vmem:[#allocation8 + $0x12c] sm:$0xf0]  ;;  %v4264_v52 = vor.u32 %v4904_v40, %v4261_v42  ;;  %v4344_v53 = vor.u32 %v4926_v44, %v4343_v43 }
 0x175   : > { %5071 = vmatpush.bf16.msra.mxu2 %v4236_v51  ;;  %5072 = vmatpush.bf16.msra.mxu3 %v4236_v51  ;;  %v4901_v50 = vld [vmem:[#allocation8 + $0x64] sm:$0xf]  ;;  %v4249_v51 = vld [vmem:[#allocation8 + $0x6c] sm:$0xf0]  ;;  %v1225_v55 = vld [vmem:[#allocation2 + $0x48] sm:$0xff]  ;;  %v4348_v61 = vor.u32 %v4925_v48, %v4345_v49  ;;  %s7056_s8 = sand.u32 1, %s7052_s3  }
 0x176   : > { %v1234_v56 = vld [vmem:[#allocation2 + $0x90] sm:$0xff]  ;;  %v1237_v58 = vld [vmem:[#allocation2 + $0xa8] sm:$0xff]  ;;  %v4333_v3 = vld [vmem:[#allocation8 + $0x114] sm:$0xf0]  ;;  %v4252_v4 = vor.u32 %v4901_v50, %v4249_v51  ;;  %s3805_s30 = scalar_lea.hbm %s7055_s15, %s7054_s22  ;;  %s3794_s20 = scalar_lea.sflag [#allocation7], %s7056_s8 }
 0x177   : > { %v4331_v59 = vld [vmem:[#allocation8 + $0x108] sm:$0xf]  ;;  %v4923_v60 = vld [vmem:[#allocation8 + $0x110] sm:$0xf0]  ;;  %v4898_v8 = vld [vmem:[#allocation8 + $0x4c] sm:$0xf] }
 0x178   : > { %1781 = vmatpush.bf16.msra.mxu0 %v4224_v54  ;;  %5073 = vmatpush.bf16.msra.mxu1 %v4224_v54  ;;  %v1246_v62 = vld [vmem:[#allocation2 + $0xf0] sm:$0xff]  ;;  %v1249_v63 = vld [vmem:[#allocation2 + $0x108] sm:$0xff]  ;;  %v4332_v5 = vor.u32 %v4923_v60, %v4331_v59  ;;  %v4237_v11 = vld [vmem:[#allocation8 + $0x54] sm:$0xf0]  ;;  %s3808_s1 = sshll.u32 %s3805_s30, 4  ;;  %s5436_s23 = scalar_lea.hbm %s7055_s15, 256  ;;  %s3809_s1 = int_to_ptr.hbm [resolvable:$true] %s3808_s1 }
 0x179   : > { %5074 = vmatpush.bf16.msra.mxu2 %v4224_v54  ;;  %5075 = vmatpush.bf16.msra.mxu3 %v4224_v54  ;;  %v1222_v54 = vld [vmem:[#allocation2 + $0x30] sm:$0xff]  ;;  %v4427_v0 = vld [vmem:[#allocation8 + $0x1c8] sm:$0xf]  ;;  %v4920_v13 = vld [vmem:[#allocation8 + $0xf8] sm:$0xf0]  ;;  %v6123_v16 = vpack.c.bf16 %v1249_v63, %v1246_v62  ;;  %v4240_v24 = vor.u32 %v4898_v8, %v4237_v11  ;;  %s5430_s7 = sshra.s32 %s3809_s1, 4  ;;  %s5431_s7 = int_to_ptr.hbm [resolvable:$true] %s5430_s7 }
 0x17a   : > { %v4947_v1 = vld [vmem:[#allocation8 + $0x1d0] sm:$0xf0]  ;;  %v1261_v7 = vld [vmem:[#allocation2 + $0x168] sm:$0xff]  ;;  %v4319_v12 = vld [vmem:[#allocation8 + $0xf0] sm:$0xf]  ;;  %s5432_s24 = scalar_lea.hbm %s5431_s7, 128  ;;  %p5437_p3 = scmp.lt.s32.totalorder %s5431_s7, %s7055_s15 }
 0x17b   : > { %v1258_v6 = vld [vmem:[#allocation2 + $0x150] sm:$0xff]  ;;  %v4428_v18 = vor.u32 %v4947_v1, %v4427_v0  ;;  %v4321_v22 = vld [vmem:[#allocation8 + $0xfc] sm:$0xf0]  ;;  %v4320_v25 = vor.u32 %v4920_v13, %v4319_v12  ;;  %v4307_v30 = vld [vmem:[#allocation8 + $0xd8] sm:$0xf]  ;;  %p5433_p0 = scmp.ne.s32.totalorder %s5431_s7, %s5432_s24  ;;  %p5438_p4 = scmp.lt.s32.totalorder %s5436_s23, %s5432_s24 }
 0x17c   : > { %1782 = vmatpush.bf16.msra.mxu0 %v4212_v57  ;;  %5076 = vmatpush.bf16.msra.mxu1 %v4212_v57  ;;  %v4919_v21 = vld [vmem:[#allocation8 + $0xf4] sm:$0xf]  ;;  %v4917_v31 = vld [vmem:[#allocation8 + $0xe0] sm:$0xf0]  ;;  %v4916_v34 = vld [vmem:[#allocation8 + $0xdc] sm:$0xf] }
 0x17d   : > { %5077 = vmatpush.bf16.msra.mxu2 %v4212_v57  ;;  %5078 = vmatpush.bf16.msra.mxu3 %v4212_v57  ;;  %v4440_v57 = vor.u32 %v4950_v47, %v4439_v46  ;;  %v4895_v28 = vld [vmem:[#allocation8 + $0x34] sm:$0xf]  ;;  %v4324_v32 = vor.u32 %v4919_v21, %v4321_v22  ;;  %v4309_v35 = vld [vmem:[#allocation8 + $0xe4] sm:$0xf0]  ;;  %v4308_v37 = vor.u32 %v4917_v31, %v4307_v30  ;;  %v4892_v40 = vld [vmem:[#allocation8 + $0x1c] sm:$0xf]  ;;  %p5434_p1 = pnand %p5433_p0, %p5602_p5  ;;  %p5439_p7 = por %p5438_p4, %p5437_p3 }
 0x17e   : > { %v4295_v42 = vld [vmem:[#allocation8 + $0xc0] sm:$0xf]  ;;  %v4914_v43 = vld [vmem:[#allocation8 + $0xc8] sm:$0xf0]  ;;  %v4312_v44 = vor.u32 %v4916_v34, %v4309_v35  ;;  %v4477_v46 = vld [vmem:[#allocation8 + $0x234] sm:$0xf0] }
 0x17f   : > { %v4913_v48 = vld [vmem:[#allocation8 + $0xc4] sm:$0xf]  ;;  %v4297_v49 = vld [vmem:[#allocation8 + $0xcc] sm:$0xf0]  ;;  %v4296_v51 = vor.u32 %v4914_v43, %v4295_v42  ;;  %v1221_v62 = vld [vmem:[#allocation2 + $0x28] sm:$0xff]  ;;  %p5435_p2 = pneg %p5434_p1 }
 0x180   : > { %1783 = vmatpush.bf16.msra.mxu0 %v4200_v2  ;;  %5079 = vmatpush.bf16.msra.mxu1 %v4200_v2  ;;  %v1220_v59 = vld [vmem:[#allocation2 + $0x20] sm:$0xff]  ;;  %v1218_v60 = vld [vmem:[#allocation2 + $0x10] sm:$0xff]  ;;  %v1223_v8 = vld [vmem:[#allocation2 + $0x38] sm:$0xff] }
 0x181   : > { %5080 = vmatpush.bf16.msra.mxu2 %v4200_v2  ;;  %5081 = vmatpush.bf16.msra.mxu3 %v4200_v2  ;;  %v4922_v2 = vld [vmem:[#allocation8 + $0x10c] sm:$0xf]  ;;  %v4955_v63 = vld [vmem:[#allocation8 + $0x214] sm:$0xf]  ;;  %v4465_v0 = vld [vmem:[#allocation8 + $0x21c] sm:$0xf0]  ;;  %p5440_p8 = pnand %p5439_p7, %p5435_p2 }
 0x182   : > { %v4336_v17 = vor.u32 %v4922_v2, %v4333_v3  ;;  %v6133_v3 = vpack.c.bf16 %v1221_v62, %v1218_v60  ;;  %v1226_v11 = vld [vmem:[#allocation2 + $0x50] sm:$0xff]  ;;  %v1224_v12 = vld [vmem:[#allocation2 + $0x40] sm:$0xff]  ;;  %v1227_v13 = vld [vmem:[#allocation2 + $0x58] sm:$0xff] }
 0x183   : > { %1784 = vmatmul.bf16.vlgmr.msra.gmra.mxu0 %v6107_v14  ;;  %1794 = vmatmul.bf16.vlgmr.msra.gmra.mxu1 %v6109_v15  ;;  %v4949_v21 = vld [vmem:[#allocation8 + $0x1e4] sm:$0xf]  ;;  %v4441_v22 = vld [vmem:[#allocation8 + $0x1ec] sm:$0xf0]  ;;  %v4946_v31 = vld [vmem:[#allocation8 + $0x1cc] sm:$0xf] }
 0x184   : > { %1825 = vmatpush.bf16.msrb.mxu1 %v4380_v9  ;;  %1804 = vmatmul.bf16.vlgmr.msra.gmra.mxu2 %v6111_v19  ;;  %v6119_v9 = vpack.c.bf16 %v1225_v55, %v1222_v54  ;;  %v4889_v54 = vld [vmem:[#allocation8 + $0x4] sm:$0xf]  ;;  %v4201_v55 = vld [vmem:[#allocation8 + $0xc] sm:$0xf0]  ;;  %v1235_v34 = vld [vmem:[#allocation2 + $0x98] sm:$0xff] }
 0x185   : > { %1874 = vmatpush.bf16.msrb.mxu2 %v4476_v10  ;;  %1972 = vmatpush.bf16.msrb.mxu0 %v4384_v20  ;;  %v6121_v10 = vpack.c.bf16 %v1237_v58, %v1234_v56  ;;  %v6125_v20 = vpack.c.bf16 %v1261_v7, %v1258_v6  ;;  %v1217_v58 = vld [vmem:[#allocation2 + $0x8] sm:$0xff]  ;;  %v4204_v1 = vor.u32 %v4889_v54, %v4201_v55  ;;  %v1238_v35 = vld [vmem:[#allocation2 + $0xb0] sm:$0xff]  ;;  %v4940_v54 = vld [vmem:[#allocation8 + $0x19c] sm:$0xf] }
 0x186   : > { %1814 = vmatmul.bf16.vlgmr.msra.gmra.mxu3 %v6113_v23  ;;  %v6131_v2 = vpack.c.bf16 %v1220_v59, %v1217_v58  ;;  %v4453_v6 = vld [vmem:[#allocation8 + $0x204] sm:$0xf0]  ;;  %v4936_v59 = vld [vmem:[#allocation8 + $0x178] sm:$0xf0]  ;;  %v4909_v62 = vld [vmem:[#allocation8 + $0xa0] sm:$0xf0] }
 0x187   : > { %1923 = vmatpush.bf16.msrb.mxu3 %v4288_v26  ;;  %v4415_v26 = vld [vmem:[#allocation8 + $0x1b0] sm:$0xf]  ;;  %v1241_v43 = vld [vmem:[#allocation2 + $0xc8] sm:$0xff] }
 0x188   : > { %1826 = vmatpush.bf16.msrb.mxu1 %v4368_v27  ;;  %v4944_v27 = vld [vmem:[#allocation8 + $0x1b8] sm:$0xf0]  ;;  %v4405_v55 = vld [vmem:[#allocation8 + $0x1a4] sm:$0xf0] }
 0x189   : > { %1875 = vmatpush.bf16.msrb.mxu2 %v4464_v29  ;;  %1973 = vmatpush.bf16.msrb.mxu0 %v4372_v33  ;;  %v4225_v29 = vld [vmem:[#allocation8 + $0x3c] sm:$0xf0]  ;;  %v4416_v33 = vor.u32 %v4944_v27, %v4415_v26  ;;  %v1230_v27 = vld [vmem:[#allocation2 + $0x70] sm:$0xff]  ;;  %v4408_v58 = vor.u32 %v4940_v54, %v4405_v55 }
 0x18a   : > { %v4228_v36 = vor.u32 %v4895_v28, %v4225_v29  ;;  %v1232_v26 = vld [vmem:[#allocation2 + $0x80] sm:$0xff]  ;;  %v1233_v28 = vld [vmem:[#allocation2 + $0x88] sm:$0xff]  ;;  %v4393_v54 = vld [vmem:[#allocation8 + $0x18c] sm:$0xf0] }
 0x18b   : > { %1924 = vmatpush.bf16.msrb.mxu3 %v4276_v38  ;;  %v4403_v38 = vld [vmem:[#allocation8 + $0x198] sm:$0xf]  ;;  %v6149_v30 = vpack.c.bf16 %v1233_v28, %v1230_v27  ;;  %v4930_v27 = vld [vmem:[#allocation8 + $0x148] sm:$0xf0]  ;;  %v1248_v28 = vld [vmem:[#allocation2 + $0x100] sm:$0xff] }
 0x18c   : > { %1827 = vmatpush.bf16.msrb.mxu1 %v4356_v39  ;;  %v4941_v39 = vld [vmem:[#allocation8 + $0x1a0] sm:$0xf0] }
 0x18d   : > { %1876 = vmatpush.bf16.msrb.mxu2 %v4452_v41  ;;  %1974 = vmatpush.bf16.msrb.mxu0 %v4360_v45  ;;  %v4213_v41 = vld [vmem:[#allocation8 + $0x24] sm:$0xf0]  ;;  %v4958_v45 = vld [vmem:[#allocation8 + $0x22c] sm:$0xf]  ;;  %v4404_v47 = vor.u32 %v4941_v39, %v4403_v38  ;;  %v6155_v38 = vpack.c.bf16 %v1238_v35, %v1235_v34  ;;  %v4903_v34 = vld [vmem:[#allocation8 + $0x70] sm:$0xf0] }
 0x18e   : > { %v4216_v50 = vor.u32 %v4892_v40, %v4213_v41  ;;  %v4480_v56 = vor.u32 %v4958_v45, %v4477_v46  ;;  %v4943_v40 = vld [vmem:[#allocation8 + $0x1b4] sm:$0xf]  ;;  %v4417_v41 = vld [vmem:[#allocation8 + $0x1bc] sm:$0xf0]  ;;  %v1245_v46 = vld [vmem:[#allocation2 + $0xe8] sm:$0xff] }
 0x18f   : > { %1925 = vmatpush.bf16.msrb.mxu3 %v4264_v52  ;;  %v4391_v52 = vld [vmem:[#allocation8 + $0x180] sm:$0xf]  ;;  %v4420_v42 = vor.u32 %v4943_v40, %v4417_v41  ;;  %v1242_v45 = vld [vmem:[#allocation2 + $0xd0] sm:$0xff]  ;;  %v4447_v35 = vld [vmem:[#allocation8 + $0x1e8] sm:$0xf] }
 0x190   : > { %1828 = vmatpush.bf16.msrb.mxu1 %v4344_v53  ;;  %v4938_v53 = vld [vmem:[#allocation8 + $0x188] sm:$0xf0]  ;;  %v4951_v40 = vld [vmem:[#allocation8 + $0x1f0] sm:$0xf0] }
 0x191   : > { %1877 = vmatpush.bf16.msrb.mxu2 %v4440_v57  ;;  %1975 = vmatpush.bf16.msrb.mxu0 %v4348_v61  ;;  %v4300_v57 = vor.u32 %v4913_v48, %v4297_v49  ;;  %v4392_v61 = vor.u32 %v4938_v53, %v4391_v52  ;;  %v6165_v48 = vpack.c.bf16 %v1245_v46, %v1242_v45  ;;  %v4291_v49 = vld [vmem:[#allocation8 + $0xb0] sm:$0xf]  ;;  %v4960_v53 = vld [vmem:[#allocation8 + $0x238] sm:$0xf0] }
 0x192   : > { %v4483_v52 = vld [vmem:[#allocation8 + $0x230] sm:$0xf] }
 0x193   : > { %1926 = vmatpush.bf16.msrb.mxu3 %v4252_v4  ;;  %1789 = vmatmul.bf16.gmra.mxu0 %v6119_v9  ;;  %v4468_v4 = vor.u32 %v4955_v63, %v4465_v0  ;;  %v4471_v63 = vld [vmem:[#allocation8 + $0x218] sm:$0xf]  ;;  %v4243_v46 = vld [vmem:[#allocation8 + $0x50] sm:$0xf] }
 0x194   : > { %1829 = vmatpush.bf16.msrb.mxu1 %v4332_v5  ;;  %1809 = vmatmul.bf16.gmra.mxu2 %v6123_v16  ;;  %v4952_v5 = vld [vmem:[#allocation8 + $0x1fc] sm:$0xf] }
 0x195   : > { %1799 = vmatmul.bf16.gmra.mxu1 %v6121_v10  ;;  %1976 = vmatpush.bf16.msrb.mxu0 %v4336_v17  ;;  %v4456_v7 = vor.u32 %v4952_v5, %v4453_v6  ;;  %v6139_v17 = vpack.c.bf16 %v1226_v11, %v1223_v8  ;;  %v4375_v5 = vld [vmem:[#allocation8 + $0x158] sm:$0xf]  ;;  %v4933_v6 = vld [vmem:[#allocation8 + $0x160] sm:$0xf0]  ;;  %v4267_v8 = vld [vmem:[#allocation8 + $0x80] sm:$0xf] }
 0x196   : > { %1878 = vmatpush.bf16.msrb.mxu2 %v4428_v18  ;;  %1819 = vmatmul.bf16.gmra.mxu3 %v6125_v20  ;;  %v6141_v18 = vpack.c.bf16 %v1227_v13, %v1224_v12  ;;  %v4906_v11 = vld [vmem:[#allocation8 + $0x88] sm:$0xf0]  ;;  %v4459_v12 = vld [vmem:[#allocation8 + $0x200] sm:$0xf]  ;;  %v1247_v13 = vld [vmem:[#allocation2 + $0xf8] sm:$0xff] }
 0x197   : > { %1927 = vmatpush.bf16.msrb.mxu3 %v4240_v24  ;;  %v4444_v24 = vor.u32 %v4949_v21, %v4441_v22  ;;  %v4268_v21 = vor.u32 %v4906_v11, %v4267_v8  ;;  %v4954_v22 = vld [vmem:[#allocation8 + $0x208] sm:$0xf0]  ;;  %v4411_v11 = vld [vmem:[#allocation8 + $0x1a0] sm:$0xf] }
 0x198   : > { %1830 = vmatpush.bf16.msrb.mxu1 %v4320_v25  ;;  %v1229_v25 = vld [vmem:[#allocation2 + $0x68] sm:$0xff] }
 0x199   : > { %1977 = vmatpush.bf16.msrb.mxu0 %v4324_v32  ;;  %v6147_v29 = vpack.c.bf16 %v1232_v26, %v1229_v25  ;;  %v4429_v32 = vld [vmem:[#allocation8 + $0x1d4] sm:$0xf0]  ;;  %v4460_v25 = vor.u32 %v4954_v22, %v4459_v12  ;;  %v4363_v26 = vld [vmem:[#allocation8 + $0x140] sm:$0xf]  ;;  %v4894_v8 = vld [vmem:[#allocation8 + $0x28] sm:$0xf0] }
 0x19a   : > { %1879 = vmatpush.bf16.msrb.mxu2 %v4416_v33  ;;  %v4432_v33 = vor.u32 %v4946_v31, %v4429_v32  ;;  %v1251_v31 = vld [vmem:[#allocation2 + $0x118] sm:$0xff]  ;;  %v4364_v32 = vor.u32 %v4930_v27, %v4363_v26  ;;  %v1253_v12 = vld [vmem:[#allocation2 + $0x128] sm:$0xff]  ;;  %v1256_v22 = vld [vmem:[#allocation2 + $0x140] sm:$0xff] }
 0x19b   : > { %1928 = vmatpush.bf16.msrb.mxu3 %v4228_v36  ;;  %v1236_v36 = vld [vmem:[#allocation2 + $0xa0] sm:$0xff]  ;;  %v6173_v41 = vpack.c.bf16 %v1251_v31, %v1248_v28  ;;  %v4918_v26 = vld [vmem:[#allocation8 + $0xe8] sm:$0xf0]  ;;  %v1254_v27 = vld [vmem:[#allocation2 + $0x130] sm:$0xff] }
 0x19c   : > { %1831 = vmatpush.bf16.msrb.mxu1 %v4308_v37  ;;  %v1239_v37 = vld [vmem:[#allocation2 + $0xb8] sm:$0xff]  ;;  %v1257_v28 = vld [vmem:[#allocation2 + $0x148] sm:$0xff] }
 0x19d   : > { %1978 = vmatpush.bf16.msrb.mxu0 %v4312_v44  ;;  %v6157_v39 = vpack.c.bf16 %v1239_v37, %v1236_v36  ;;  %v1244_v44 = vld [vmem:[#allocation2 + $0xe0] sm:$0xff] }
 0x19e   : > { %1880 = vmatpush.bf16.msrb.mxu2 %v4404_v47  ;;  %v6163_v47 = vpack.c.bf16 %v1244_v44, %v1241_v43  ;;  %v4351_v43 = vld [vmem:[#allocation8 + $0x128] sm:$0xf]  ;;  %v4927_v44 = vld [vmem:[#allocation8 + $0x130] sm:$0xf0] }
 0x19f   : > { %1929 = vmatpush.bf16.msrb.mxu3 %v4216_v50  ;;  %v4912_v50 = vld [vmem:[#allocation8 + $0xb8] sm:$0xf0]  ;;  %v4352_v45 = vor.u32 %v4927_v44, %v4351_v43  ;;  %v6183_v44 = vpack.c.bf16 %v1257_v28, %v1254_v27 }
 0x1a0   : > { %1832 = vmatpush.bf16.msrb.mxu1 %v4296_v51  ;;  %v4292_v51 = vor.u32 %v4912_v50, %v4291_v49  ;;  %v4900_v49 = vld [vmem:[#allocation8 + $0x58] sm:$0xf0] }
 0x1a1   : > { %1979 = vmatpush.bf16.msrb.mxu0 %v4300_v57  ;;  %v4387_v57 = vld [vmem:[#allocation8 + $0x170] sm:$0xf]  ;;  %v4244_v50 = vor.u32 %v4900_v49, %v4243_v46  ;;  %v4303_v46 = vld [vmem:[#allocation8 + $0xc8] sm:$0xf]  ;;  %v4915_v49 = vld [vmem:[#allocation8 + $0xd0] sm:$0xf0] }
 0x1a2   : > { %1881 = vmatpush.bf16.msrb.mxu2 %v4392_v61  ;;  %v4388_v60 = vor.u32 %v4936_v59, %v4387_v57  ;;  %v4279_v61 = vld [vmem:[#allocation8 + $0x98] sm:$0xf] }
 0x1a3   : > { %1930 = vmatpush.bf16.msrb.mxu3 %v4204_v1  ;;  %v4280_v0 = vor.u32 %v4909_v62, %v4279_v61  ;;  %v4957_v1 = vld [vmem:[#allocation8 + $0x220] sm:$0xf0]  ;;  %v4423_v62 = vld [vmem:[#allocation8 + $0x1b8] sm:$0xf] }
 0x1a4   : > { %2021 = vmatpush.bf16.msra.mxu1 %v4480_v56  ;;  %1980 = vmatmul.bf16.vlgmr.msrb.gmra.mxu0 %v6131_v2  ;;  %v4484_v56 = vor.u32 %v4960_v53, %v4483_v52  ;;  %v4948_v52 = vld [vmem:[#allocation8 + $0x1d8] sm:$0xf0]  ;;  %v4937_v53 = vld [vmem:[#allocation8 + $0x184] sm:$0xf] }
 0x1a5   : > { %1833 = vmatmul.bf16.vlgmr.msrb.gmra.mxu1 %v6131_v2  ;;  %1882 = vmatmul.bf16.vlgmr.msrb.gmra.mxu2 %v6133_v3  ;;  %v4396_v57 = vor.u32 %v4937_v53, %v4393_v54  ;;  %v4897_v61 = vld [vmem:[#allocation8 + $0x40] sm:$0xf0]  ;;  %v4983_v53 = vld [vmem:[#allocation11 + $0xb0] sm:$0xf0] }
 0x1a6   : > { %1931 = vmatmul.bf16.vlgmr.msrb.gmra.mxu3 %v6107_v14  ;;  %2070 = vmatpush.bf16.msra.mxu2 %v4292_v51  ;;  %v4435_v51 = vld [vmem:[#allocation8 + $0x1d0] sm:$0xf] }
 0x1a7   : > { %2168 = vmatpush.bf16.msra.mxu0 %v4484_v56  ;;  %2119 = vmatpush.bf16.msra.mxu3 %v4388_v60  ;;  %v4436_v55 = vor.u32 %v4948_v52, %v4435_v51  ;;  %v4339_v56 = vld [vmem:[#allocation8 + $0x110] sm:$0xf]  ;;  %v4231_v60 = vld [vmem:[#allocation8 + $0x38] sm:$0xf]  ;;  %v6185_v51 = vld [vmem:[#allocation10] sm:$0x7] }
 0x1a8   : > { %2022 = vmatpush.bf16.msra.mxu1 %v4468_v4  ;;  %v4472_v4 = vor.u32 %v4957_v1, %v4471_v63  ;;  %v4232_v63 = vor.u32 %v4897_v61, %v4231_v60  ;;  %v4571_v52 = vld [vmem:[#allocation11 + $0xa8] sm:$0xf] }
 0x1a9   : > { %v4572_v54 = vor.u32 %v4983_v53, %v4571_v52  ;;  %v4547_v52 = vld [vmem:[#allocation11 + $0x78] sm:$0xf] }
 0x1aa   : > { %2071 = vmatpush.bf16.msra.mxu2 %v4280_v0  ;;  %v4945_v0 = vld [vmem:[#allocation8 + $0x1c0] sm:$0xf0] }
 0x1ab   : > { %2169 = vmatpush.bf16.msra.mxu0 %v4472_v4  ;;  %v4424_v1 = vor.u32 %v4945_v0, %v4423_v62  ;;  %v4327_v4 = vld [vmem:[#allocation8 + $0xf8] sm:$0xf]  ;;  %v1260_v0 = vld [vmem:[#allocation2 + $0x160] sm:$0xff] }
 0x1ac   : > { %2023 = vmatpush.bf16.msra.mxu1 %v4456_v7  ;;  %v4376_v7 = vor.u32 %v4933_v6, %v4375_v5  ;;  %v4921_v5 = vld [vmem:[#allocation8 + $0x100] sm:$0xf0]  ;;  %v1259_v62 = vld [vmem:[#allocation2 + $0x158] sm:$0xff] }
 0x1ad   : > { %v4328_v6 = vor.u32 %v4921_v5, %v4327_v4 }
 0x1ae   : > { %2120 = vmatpush.bf16.msra.mxu3 %v4376_v7  ;;  %2072 = vmatpush.bf16.msra.mxu2 %v4268_v21  ;;  %v4219_v7 = vld [vmem:[#allocation8 + $0x20] sm:$0xf]  ;;  %v4942_v21 = vld [vmem:[#allocation8 + $0x1a8] sm:$0xf0] }
 0x1af   : > { %2170 = vmatpush.bf16.msra.mxu0 %v4460_v25  ;;  %v4315_v25 = vld [vmem:[#allocation8 + $0xe0] sm:$0xf] }
 0x1b0   : > { %2024 = vmatpush.bf16.msra.mxu1 %v4444_v24  ;;  %v1250_v24 = vld [vmem:[#allocation2 + $0x110] sm:$0xff]  ;;  %v4316_v31 = vor.u32 %v4918_v26, %v4315_v25 }
 0x1b1   : > { %v6171_v36 = vpack.c.bf16 %v1250_v24, %v1247_v13  ;;  %v4220_v13 = vor.u32 %v4894_v8, %v4219_v7  ;;  %v4412_v24 = vor.u32 %v4942_v21, %v4411_v11  ;;  %v4559_v21 = vld [vmem:[#allocation11 + $0x90] sm:$0xf] }
 0x1b2   : > { %2121 = vmatpush.bf16.msra.mxu3 %v4364_v32  ;;  %v4207_v32 = vld [vmem:[#allocation8 + $0x8] sm:$0xf] }
 0x1b4   : > { %1985 = vmatmul.bf16.gmra.mxu0 %v6139_v17  ;;  %2025 = vmatpush.bf16.msra.mxu1 %v4432_v33  ;;  %v4255_v33 = vld [vmem:[#allocation8 + $0x68] sm:$0xf] }
 0x1b5   : > { %1838 = vmatmul.bf16.gmra.mxu1 %v6139_v17  ;;  %1887 = vmatmul.bf16.gmra.mxu2 %v6141_v18  ;;  %v4256_v37 = vor.u32 %v4903_v34, %v4255_v33  ;;  %v4891_v33 = vld [vmem:[#allocation8 + $0x10] sm:$0xf0]  ;;  %v4399_v34 = vld [vmem:[#allocation8 + $0x188] sm:$0xf] }
 0x1b6   : > { %1936 = vmatmul.bf16.gmra.mxu3 %v6119_v9 }
 0x1b7   : > { %2073 = vmatpush.bf16.msra.mxu2 %v4256_v37  ;;  %2122 = vmatpush.bf16.msra.mxu3 %v4352_v45  ;;  %v4208_v37 = vor.u32 %v4891_v33, %v4207_v32 }
 0x1b8   : > { %2026 = vmatpush.bf16.msra.mxu1 %v4420_v42  ;;  %v4448_v42 = vor.u32 %v4951_v40, %v4447_v35  ;;  %v6179_v35 = vpack.c.bf16 %v1256_v22, %v1253_v12  ;;  %v4939_v40 = vld [vmem:[#allocation8 + $0x190] sm:$0xf0]  ;;  %v4980_v22 = vld [vmem:[#allocation11 + $0x98] sm:$0xf0] }
 0x1b9   : > { %v4400_v45 = vor.u32 %v4939_v40, %v4399_v34 }
 0x1ba   : > { %2171 = vmatpush.bf16.msra.mxu0 %v4448_v42 }
 0x1bb   : > { %2074 = vmatpush.bf16.msra.mxu2 %v4244_v50  ;;  %v4304_v50 = vor.u32 %v4915_v49, %v4303_v46 }
 0x1bc   : > { %2027 = vmatpush.bf16.msra.mxu1 %v4408_v58  ;;  %v4924_v58 = vld [vmem:[#allocation8 + $0x118] sm:$0xf0] }
 0x1bd   : > { %v4340_v59 = vor.u32 %v4924_v58, %v4339_v56 }
 0x1be   : > { %2172 = vmatpush.bf16.msra.mxu0 %v4436_v55  ;;  %v6192_v55 = vperm.slane %v6185_v51, 0 }
 0x1bf   : > { %2123 = vmatpush.bf16.msra.mxu3 %v4340_v59  ;;  %2075 = vmatpush.bf16.msra.mxu2 %v4232_v63  ;;  %v1262_v63 = vld [vmem:[#allocation2 + $0x170] sm:$0xff] }
 0x1c0   : > { %2028 = vmatpush.bf16.msra.mxu1 %v4396_v57  ;;  %v6202_v5 = vpack.c.bf16 %v1262_v63, %v1259_v62 }
 0x1c2   : > { %2173 = vmatpush.bf16.msra.mxu0 %v4424_v1  ;;  %v1263_v1 = vld [vmem:[#allocation2 + $0x178] sm:$0xff] }
 0x1c3   : > { %2124 = vmatpush.bf16.msra.mxu3 %v4328_v6  ;;  %2076 = vmatpush.bf16.msra.mxu2 %v4220_v13  ;;  %v6209_v11 = vpack.c.bf16 %v1263_v1, %v1260_v0 }
 0x1c4   : > { %1990 = vmatmul.bf16.gmra.mxu0 %v6147_v29  ;;  %2777 = vmatpush.bf16.msrb.mxu1 %v4572_v54 }
 0x1c5   : > { %1843 = vmatmul.bf16.gmra.mxu1 %v6147_v29  ;;  %1892 = vmatmul.bf16.gmra.mxu2 %v6149_v30 }
 0x1c6   : > { %1941 = vmatmul.bf16.gmra.mxu3 %v6109_v15  ;;  %2174 = vmatpush.bf16.msra.mxu0 %v4412_v24  ;;  %v4560_v24 = vor.u32 %v4980_v22, %v4559_v21 }
 0x1c7   : > { %2125 = vmatpush.bf16.msra.mxu3 %v4316_v31  ;;  %2077 = vmatpush.bf16.msra.mxu2 %v4208_v37 }
 0x1c8   : > { %2778 = vmatpush.bf16.msrb.mxu1 %v4560_v24 }
 0x1ca   : > { %2175 = vmatpush.bf16.msra.mxu0 %v4400_v45 }
 0x1cb   : > { %2126 = vmatpush.bf16.msra.mxu3 %v4304_v50 }
 0x1d4   : > { %1995 = vmatmul.bf16.gmra.mxu0 %v6155_v38 }
 0x1d5   : > { %1848 = vmatmul.bf16.gmra.mxu1 %v6155_v38  ;;  %1897 = vmatmul.bf16.gmra.mxu2 %v6157_v39 }
 0x1d6   : > { %1946 = vmatmul.bf16.gmra.mxu3 %v6121_v10 }
 0x1e4   : > { %2000 = vmatmul.bf16.gmra.mxu0 %v6163_v47 }
 0x1e5   : > { %1853 = vmatmul.bf16.gmra.mxu1 %v6163_v47  ;;  %1902 = vmatmul.bf16.gmra.mxu2 %v6165_v48 }
 0x1e6   : > { %1951 = vmatmul.bf16.gmra.mxu3 %v6111_v19 }
 0x1f4   : > { %2005 = vmatmul.bf16.gmra.mxu0 %v6171_v36 }
 0x1f5   : > { %1858 = vmatmul.bf16.gmra.mxu1 %v6171_v36  ;;  %1907 = vmatmul.bf16.gmra.mxu2 %v6173_v41 }
 0x1f6   : > { %1956 = vmatmul.bf16.gmra.mxu3 %v6123_v16 }
 0x200   : > { %v1785_v42 = vpop.f32.mrf.mxu0  ;;  %v6181_v43 = vpop.f32.mrf.mxu1 }
 0x201   : > { %v1786_v33 = vadd.f32 %v1785_v42, %v6192_v55  ;;  %v4977_v42 = vld [vmem:[#allocation11 + $0x80] sm:$0xf0] }
 0x202   : > { %v4548_v54 = vor.u32 %v4977_v42, %v4547_v52 }
 0x204   : > { %2010 = vmatmul.bf16.gmra.mxu0 %v6179_v35  ;;  %2779 = vmatpush.bf16.msrb.mxu1 %v4548_v54 }
 0x205   : > { %1863 = vmatmul.bf16.gmra.mxu1 %v6179_v35  ;;  %1912 = vmatmul.bf16.gmra.mxu2 %v6183_v44 }
 0x206   : > { %1961 = vmatmul.bf16.gmra.mxu3 %v6113_v23 }
 0x207   : > { %v1805_v56 = vpop.f32.mrf.mxu2 }
 0x208   : > { %v6195_v57 = vadd.f32 %v1805_v56, %v6192_v55  ;;  %v1787_v58 = vpop.f32.mrf.mxu0  ;;  %v6197_v59 = vpop.f32.mrf.mxu1 }
 0x209   : > { %v1815_v60 = vpop.f32.mrf.mxu3  ;;  %v1788_v53 = vadd.f32 %v1787_v58, %v6192_v55 }
 0x20a   : > { %v6200_v61 = vadd.f32 %v1815_v60, %v6192_v55 }
 0x20f   : > { %v1807_v4 = vpop.f32.mrf.mxu2 }
 0x210   : > { %v6205_v6 = vadd.f32 %v1807_v4, %v6192_v55  ;;  %v1790_v7 = vpop.f32.mrf.mxu0 }
 0x211   : > { %v1817_v12 = vpop.f32.mrf.mxu3 }
 0x212   : > { %v6207_v8 = vpop.f32.mrf.mxu1  ;;  %v6212_v13 = vadd.f32 %v1817_v12, %v6192_v55 }
 0x214   : > { %2015 = vmatmul.bf16.gmra.mxu0 %v6202_v5 }
 0x215   : > { %1868 = vmatmul.bf16.gmra.mxu1 %v6202_v5  ;;  %1917 = vmatmul.bf16.gmra.mxu2 %v6209_v11 }
 0x216   : > { %1966 = vmatmul.bf16.gmra.mxu3 %v6125_v20 }
 0x217   : > { %v1810_v25 = vpop.f32.mrf.mxu2 }
 0x218   : > { %v6219_v26 = vadd.f32 %v1810_v25, %v6192_v55  ;;  %v1792_v27 = vpop.f32.mrf.mxu0 }
 0x219   : > { %v1820_v31 = vpop.f32.mrf.mxu3 }
 0x21a   : > { %v6221_v28 = vpop.f32.mrf.mxu1  ;;  %v6224_v32 = vadd.f32 %v1820_v31, %v6192_v55  ;;  %v4535_v31 = vld [vmem:[#allocation11 + $0x60] sm:$0xf] }
 0x21f   : > { %v1812_v34 = vpop.f32.mrf.mxu2 }
 0x220   : > { %v6228_v37 = vadd.f32 %v1812_v34, %v6192_v55 }
 0x221   : > { %v6230_v45 = vpop.f32.mrf.mxu0  ;;  %v1822_v46 = vpop.f32.mrf.mxu3 }
 0x222   : > { %v1834_v40 = vpop.f32.mrf.mxu1  ;;  %v6233_v50 = vadd.f32 %v1822_v46, %v6192_v55 }
 0x223   : > { %v1835_v49 = vadd.f32 %v1834_v40, %v1786_v33  ;;  %v1793_v33 = vadd.f32 %v1792_v27, %v6192_v55 }
 0x224   : > { %2176 = vmatmul.bf16.vlgmr.msra.gmra.mxu0 %v6133_v3 }
 0x225   : > { %2029 = vmatmul.bf16.vlgmr.msra.gmra.mxu1 %v6133_v3  ;;  %2078 = vmatmul.bf16.vlgmr.msra.gmra.mxu2 %v6107_v14  ;;  %v1791_v3 = vadd.f32 %v1790_v7, %v6192_v55  ;;  %v4974_v7 = vld [vmem:[#allocation11 + $0x68] sm:$0xf0] }
 0x226   : > { %2127 = vmatmul.bf16.vlgmr.msra.gmra.mxu3 %v6131_v2  ;;  %v4536_v34 = vor.u32 %v4974_v7, %v4535_v31 }
 0x228   : > { %v1883_v56 = vpop.f32.mrf.mxu2  ;;  %2780 = vmatpush.bf16.msrb.mxu1 %v4536_v34 }
 0x229   : > { %v1884_v60 = vadd.f32 %v1883_v56, %v1835_v49  ;;  %v6240_v63 = vpop.f32.mrf.mxu0  ;;  %v6242_v1 = vpop.f32.mrf.mxu3 }
 0x22a   : > { %v1836_v62 = vpop.f32.mrf.mxu1 }
 0x22b   : > { %v1837_v0 = vadd.f32 %v1836_v62, %v1788_v53  ;;  %v2217_v2 = vmax.f32 %v1884_v60, 0.0 }
 0x230   : > { %v1885_v4 = vpop.f32.mrf.mxu2 }
 0x231   : > { %v1886_v14 = vadd.f32 %v1885_v4, %v1837_v0  ;;  %v6245_v21 = vpop.f32.mrf.mxu0  ;;  %v6247_v22 = vpop.f32.mrf.mxu3  ;;  %v4971_v4 = vld [vmem:[#allocation11 + $0x50] sm:$0xf0] }
 0x232   : > { %v1839_v12 = vpop.f32.mrf.mxu1 }
 0x233   : > { %v1840_v58 = vadd.f32 %v1839_v12, %v1791_v3  ;;  %v2220_v24 = vmax.f32 %v1886_v14, 0.0  ;;  %v4523_v3 = vld [vmem:[#allocation11 + $0x48] sm:$0xf]  ;;  %v1798_v12 = vadd.f32 %v6197_v59, %v6192_v55 }
 0x234   : > { %2181 = vmatmul.bf16.gmra.mxu0 %v6141_v18 }
 0x235   : > { %2034 = vmatmul.bf16.gmra.mxu1 %v6141_v18  ;;  %v6251_v25 = vpack.c.bf16 %v2220_v24, %v2217_v2  ;;  %2083 = vmatmul.bf16.gmra.mxu2 %v6119_v9  ;;  %v1796_v18 = vadd.f32 %v6181_v43, %v6192_v55  ;;  %v4524_v43 = vor.u32 %v4971_v4, %v4523_v3 }
 0x236   : > { %2132 = vmatmul.bf16.gmra.mxu3 %v6139_v17 }
 0x237   : > { %2781 = vmatpush.bf16.msrb.mxu1 %v4524_v43 }
 0x238   : > { %v1888_v40 = vpop.f32.mrf.mxu2 }
 0x239   : > { %v1889_v46 = vadd.f32 %v1888_v40, %v1840_v58  ;;  %v6256_v52 = vpop.f32.mrf.mxu0  ;;  %v6258_v53 = vpop.f32.mrf.mxu3 }
 0x23a   : > { %v1841_v49 = vpop.f32.mrf.mxu1 }
 0x23b   : > { %v1842_v42 = vadd.f32 %v1841_v49, %v1793_v33  ;;  %v2223_v62 = vmax.f32 %v1889_v46, 0.0 }
 0x240   : > { %v1890_v9 = vpop.f32.mrf.mxu2 }
 0x241   : > { %v1891_v54 = vadd.f32 %v1890_v9, %v1842_v42  ;;  %v6262_v60 = vpop.f32.mrf.mxu0  ;;  %v6264_v17 = vpop.f32.mrf.mxu3  ;;  %v4968_v9 = vld [vmem:[#allocation11 + $0x38] sm:$0xf0] }
 0x242   : > { %v1844_v56 = vpop.f32.mrf.mxu1 }
 0x243   : > { %v1845_v27 = vadd.f32 %v1844_v56, %v1796_v18  ;;  %v2226_v0 = vmax.f32 %v1891_v54, 0.0  ;;  %v4511_v18 = vld [vmem:[#allocation11 + $0x30] sm:$0xf]  ;;  %v1803_v56 = vadd.f32 %v6221_v28, %v6192_v55  ;;  %v4982_v28 = vld [vmem:[#allocation11 + $0xac] sm:$0xf] }
 0x244   : > { %2186 = vmatmul.bf16.gmra.mxu0 %v6149_v30 }
 0x245   : > { %2039 = vmatmul.bf16.gmra.mxu1 %v6149_v30  ;;  %2088 = vmatmul.bf16.gmra.mxu2 %v6109_v15  ;;  %v6269_v14 = vpack.c.bf16 %v2226_v0, %v2223_v62  ;;  %v1801_v15 = vadd.f32 %v6207_v8, %v6192_v55  ;;  %v4512_v8 = vor.u32 %v4968_v9, %v4511_v18 }
 0x246   : > { %2137 = vmatmul.bf16.gmra.mxu3 %v6147_v29 }
 0x247   : > { %2782 = vmatpush.bf16.msrb.mxu1 %v4512_v8 }
 0x248   : > { %v1893_v58 = vpop.f32.mrf.mxu2 }
 0x249   : > { %v1894_v2 = vadd.f32 %v1893_v58, %v1845_v27  ;;  %v6274_v31 = vpop.f32.mrf.mxu0  ;;  %v6276_v30 = vpop.f32.mrf.mxu3 }
 0x24a   : > { %v1846_v24 = vpop.f32.mrf.mxu1 }
 0x24b   : > { %v1847_v7 = vadd.f32 %v1846_v24, %v1798_v12  ;;  %v2229_v59 = vmax.f32 %v1894_v2, 0.0 }
 0x250   : > { %v1895_v33 = vpop.f32.mrf.mxu2 }
 0x251   : > { %v1896_v34 = vadd.f32 %v1895_v33, %v1847_v7  ;;  %v6280_v29 = vpop.f32.mrf.mxu0  ;;  %v6282_v49 = vpop.f32.mrf.mxu3  ;;  %v4573_v7 = vld [vmem:[#allocation11 + $0xb4] sm:$0xf0]  ;;  %v6304_v33 = vperm.slane %v6185_v51, 1 }
 0x252   : > { %v1849_v40 = vpop.f32.mrf.mxu1 }
 0x253   : > { %v1850_v46 = vadd.f32 %v1849_v40, %v1801_v15  ;;  %v2232_v42 = vmax.f32 %v1896_v34, 0.0  ;;  %v4576_v15 = vor.u32 %v4982_v28, %v4573_v7  ;;  %v4499_v34 = vld [vmem:[#allocation11 + $0x18] sm:$0xf]  ;;  %v4965_v40 = vld [vmem:[#allocation11 + $0x20] sm:$0xf0] }
 0x254   : > { %2191 = vmatmul.bf16.gmra.mxu0 %v6157_v39 }
 0x255   : > { %2044 = vmatmul.bf16.gmra.mxu1 %v6157_v39  ;;  %2093 = vmatmul.bf16.gmra.mxu2 %v6121_v10  ;;  %v6287_v54 = vpack.c.bf16 %v2232_v42, %v2229_v59  ;;  %v4979_v59 = vld [vmem:[#allocation11 + $0x94] sm:$0xf]  ;;  %v4561_v42 = vld [vmem:[#allocation11 + $0x9c] sm:$0xf0] }
 0x256   : > { %2142 = vmatmul.bf16.gmra.mxu3 %v6155_v38  ;;  %2924 = vmatpush.bf16.msrb.mxu0 %v4576_v15  ;;  %v4564_v9 = vor.u32 %v4979_v59, %v4561_v42  ;;  %v4655_v59 = vld [vmem:[#allocation11 + $0x150] sm:$0xf]  ;;  %v5004_v42 = vld [vmem:[#allocation11 + $0x158] sm:$0xf0] }
 0x258   : > { %v1898_v27 = vpop.f32.mrf.mxu2 }
 0x259   : > { %v1899_v62 = vadd.f32 %v1898_v27, %v1850_v46  ;;  %v6292_v3 = vpop.f32.mrf.mxu0  ;;  %v6294_v39 = vpop.f32.mrf.mxu3 }
 0x25a   : > { %v1851_v0 = vpop.f32.mrf.mxu1  ;;  %2925 = vmatpush.bf16.msrb.mxu0 %v4564_v9  ;;  %v4970_v9 = vld [vmem:[#allocation11 + $0x4c] sm:$0xf] }
 0x25b   : > { %v1852_v4 = vadd.f32 %v1851_v0, %v1803_v56  ;;  %v2235_v24 = vmax.f32 %v1899_v62, 0.0  ;;  %v4549_v0 = vld [vmem:[#allocation11 + $0x84] sm:$0xf0] }
 0x260   : > { %v1900_v10 = vpop.f32.mrf.mxu2 }
 0x261   : > { %v1901_v43 = vadd.f32 %v1900_v10, %v1852_v4  ;;  %v6296_v58 = vpop.f32.mrf.mxu0  ;;  %v6299_v2 = vpop.f32.mrf.mxu3 }
 0x262   : > { %v1854_v12 = vpop.f32.mrf.mxu1 }
 0x263   : > { %v1855_v38 = vadd.f32 %v1854_v12, %v6195_v57  ;;  %v2238_v55 = vmax.f32 %v1901_v43, 0.0  ;;  %v4500_v57 = vor.u32 %v4965_v40, %v4499_v34  ;;  %v4667_v43 = vld [vmem:[#allocation11 + $0x168] sm:$0xf]  ;;  %v5007_v12 = vld [vmem:[#allocation11 + $0x170] sm:$0xf0] }
 0x264   : > { %2196 = vmatmul.bf16.gmra.mxu0 %v6165_v48 }
 0x265   : > { %2049 = vmatmul.bf16.gmra.mxu1 %v6165_v48  ;;  %2098 = vmatmul.bf16.gmra.mxu2 %v6111_v19  ;;  %v6307_v46 = vpack.c.bf16 %v2238_v55, %v2235_v24  ;;  %v1935_v48 = vadd.f32 %v6247_v22, %v6304_v33  ;;  %v4973_v24 = vld [vmem:[#allocation11 + $0x64] sm:$0xf]  ;;  %v4537_v55 = vld [vmem:[#allocation11 + $0x6c] sm:$0xf0] }
 0x266   : > { %2147 = vmatmul.bf16.gmra.mxu3 %v6163_v47  ;;  %2783 = vmatpush.bf16.msrb.mxu1 %v4500_v57  ;;  %v4976_v47 = vld [vmem:[#allocation11 + $0x7c] sm:$0xf] }
 0x267   : > { %v4552_v4 = vor.u32 %v4976_v47, %v4549_v0  ;;  %v6318_v10 = vadd.f32 %v6240_v63, %v1935_v48  ;;  %v4525_v48 = vld [vmem:[#allocation11 + $0x54] sm:$0xf0] }
 0x268   : > { %v1903_v18 = vpop.f32.mrf.mxu2  ;;  %v4643_v0 = vld [vmem:[#allocation11 + $0x138] sm:$0xf] }
 0x269   : > { %v1904_v8 = vadd.f32 %v1903_v18, %v1855_v38  ;;  %v6312_v27 = vpop.f32.mrf.mxu0  ;;  %v6315_v62 = vpop.f32.mrf.mxu3  ;;  %2926 = vmatpush.bf16.msrb.mxu0 %v4552_v4  ;;  %v4668_v38 = vor.u32 %v5007_v12, %v4667_v43  ;;  %v4656_v18 = vor.u32 %v5004_v42, %v4655_v59  ;;  %v5001_v4 = vld [vmem:[#allocation11 + $0x140] sm:$0xf0]  ;;  %v4967_v43 = vld [vmem:[#allocation11 + $0x34] sm:$0xf]  ;;  %v4631_v59 = vld [vmem:[#allocation11 + $0x120] sm:$0xf] }
 0x26a   : > { %v1856_v56 = vpop.f32.mrf.mxu1  ;;  %v4998_v42 = vld [vmem:[#allocation11 + $0x128] sm:$0xf0] }
 0x26b   : > { %v1857_v19 = vadd.f32 %v1856_v56, %v6205_v6  ;;  %v4540_v6 = vor.u32 %v4973_v24, %v4537_v55  ;;  %2826 = vmatpush.bf16.msrb.mxu2 %v4668_v38  ;;  %v2241_v57 = vmax.f32 %v1904_v8, 0.0  ;;  %v4487_v56 = vld [vmem:[#allocation11] sm:$0xf] }
 0x26c   : > { %v4513_v24 = vld [vmem:[#allocation11 + $0x3c] sm:$0xf0] }
 0x26d   : > { %2927 = vmatpush.bf16.msrb.mxu0 %v4540_v6 }
 0x26f   : > { %2827 = vmatpush.bf16.msrb.mxu2 %v4656_v18  ;;  %v4632_v18 = vor.u32 %v4998_v42, %v4631_v59 }
 0x270   : > { %v1905_v22 = vpop.f32.mrf.mxu2 }
 0x271   : > { %v1906_v28 = vadd.f32 %v1905_v22, %v1857_v19  ;;  %v6320_v15 = vpop.f32.mrf.mxu0  ;;  %v6323_v40 = vpop.f32.mrf.mxu3  ;;  %v4962_v19 = vld [vmem:[#allocation11 + $0x8] sm:$0xf0] }
 0x272   : > { %v1859_v7 = vpop.f32.mrf.mxu1  ;;  %v4488_v8 = vor.u32 %v4962_v19, %v4487_v56  ;;  %v5028_v56 = vld [vmem:[#allocation11 + $0x218] sm:$0xf0] }
 0x273   : > { %v1860_v34 = vadd.f32 %v1859_v7, %v6219_v26  ;;  %v2244_v63 = vmax.f32 %v1906_v28, 0.0  ;;  %v4528_v26 = vor.u32 %v4970_v9, %v4525_v48  ;;  %v4516_v28 = vor.u32 %v4967_v43, %v4513_v24  ;;  %v4763_v7 = vld [vmem:[#allocation11 + $0x228] sm:$0xf]  ;;  %v4964_v9 = vld [vmem:[#allocation11 + $0x1c] sm:$0xf] }
 0x274   : > { %2201 = vmatmul.bf16.gmra.mxu0 %v6173_v41  ;;  %2784 = vmatpush.bf16.msrb.mxu1 %v4488_v8  ;;  %v4751_v48 = vld [vmem:[#allocation11 + $0x210] sm:$0xf]  ;;  %v4995_v8 = vld [vmem:[#allocation11 + $0x110] sm:$0xf0] }
 0x275   : > { %2054 = vmatmul.bf16.gmra.mxu1 %v6173_v41  ;;  %2103 = vmatmul.bf16.gmra.mxu2 %v6123_v16  ;;  %v6328_v47 = vpack.c.bf16 %v2244_v63, %v2241_v57  ;;  %v4644_v41 = vor.u32 %v5001_v4, %v4643_v0  ;;  %v1940_v16 = vadd.f32 %v6264_v17, %v6304_v33  ;;  %v4501_v17 = vld [vmem:[#allocation11 + $0x24] sm:$0xf0]  ;;  %v4961_v0 = vld [vmem:[#allocation11 + $0x4] sm:$0xf] }
 0x276   : > { %2152 = vmatmul.bf16.gmra.mxu3 %v6171_v36  ;;  %2928 = vmatpush.bf16.msrb.mxu0 %v4528_v26  ;;  %v5031_v36 = vld [vmem:[#allocation11 + $0x230] sm:$0xf0]  ;;  %v4752_v26 = vor.u32 %v5028_v56, %v4751_v48  ;;  %v4727_v48 = vld [vmem:[#allocation11 + $0x1e0] sm:$0xf]  ;;  %v5022_v56 = vld [vmem:[#allocation11 + $0x1e8] sm:$0xf0] }
 0x277   : > { %2828 = vmatpush.bf16.msrb.mxu2 %v4644_v41  ;;  %v4764_v63 = vor.u32 %v5031_v36, %v4763_v7  ;;  %v6339_v19 = vadd.f32 %v6256_v52, %v1940_v16  ;;  %v4739_v7 = vld [vmem:[#allocation11 + $0x1f8] sm:$0xf]  ;;  %v5025_v36 = vld [vmem:[#allocation11 + $0x200] sm:$0xf0] }
 0x278   : > { %v1908_v12 = vpop.f32.mrf.mxu2 }
 0x279   : > { %v1909_v22 = vadd.f32 %v1908_v12, %v1860_v34  ;;  %v6333_v55 = vpop.f32.mrf.mxu0  ;;  %v6336_v57 = vpop.f32.mrf.mxu3  ;;  %2875 = vmatpush.bf16.msrb.mxu3 %v4764_v63  ;;  %v4504_v34 = vor.u32 %v4964_v9, %v4501_v17  ;;  %v4489_v12 = vld [vmem:[#allocation11 + $0xc] sm:$0xf0]  ;;  %v4740_v63 = vor.u32 %v5025_v36, %v4739_v7  ;;  %v4992_v9 = vld [vmem:[#allocation11 + $0xf8] sm:$0xf0]  ;;  %v4669_v17 = vld [vmem:[#allocation11 + $0x174] sm:$0xf0] }
 0x27a   : > { %v1861_v38 = vpop.f32.mrf.mxu1  ;;  %2929 = vmatpush.bf16.msrb.mxu0 %v4516_v28  ;;  %v4492_v28 = vor.u32 %v4961_v0, %v4489_v12  ;;  %v4583_v36 = vld [vmem:[#allocation11 + $0xc0] sm:$0xf] }
 0x27b   : > { %v1862_v6 = vadd.f32 %v1861_v38, %v6228_v37  ;;  %2829 = vmatpush.bf16.msrb.mxu2 %v4632_v18  ;;  %v4619_v37 = vld [vmem:[#allocation11 + $0x108] sm:$0xf]  ;;  %v2247_v59 = vmax.f32 %v1909_v22, 0.0  ;;  %v4607_v18 = vld [vmem:[#allocation11 + $0xf0] sm:$0xf]  ;;  %v4728_v22 = vor.u32 %v5022_v56, %v4727_v48 }
 0x27c   : > { %v4620_v43 = vor.u32 %v4995_v8, %v4619_v37  ;;  %v4595_v37 = vld [vmem:[#allocation11 + $0xd8] sm:$0xf]  ;;  %v4989_v8 = vld [vmem:[#allocation11 + $0xe0] sm:$0xf0] }
 0x27d   : > { %2876 = vmatpush.bf16.msrb.mxu3 %v4752_v26 }
 0x27e   : > { %2930 = vmatpush.bf16.msrb.mxu0 %v4504_v34  ;;  %v4608_v34 = vor.u32 %v4992_v9, %v4607_v18  ;;  %v5016_v18 = vld [vmem:[#allocation11 + $0x1b8] sm:$0xf0] }
 0x27f   : > { %2830 = vmatpush.bf16.msrb.mxu2 %v4620_v43 }
 0x280   : > { %v1910_v4 = vpop.f32.mrf.mxu2 }
 0x281   : > { %v1911_v41 = vadd.f32 %v1910_v4, %v1862_v6  ;;  %v6341_v38 = vpop.f32.mrf.mxu0  ;;  %v6344_v16 = vpop.f32.mrf.mxu3  ;;  %v5006_v6 = vld [vmem:[#allocation11 + $0x16c] sm:$0xf]  ;;  %2877 = vmatpush.bf16.msrb.mxu3 %v4740_v63  ;;  %v1945_v4 = vadd.f32 %v6282_v49, %v6304_v33 }
 0x282   : > { %v1864_v24 = vpop.f32.mrf.mxu1  ;;  %2931 = vmatpush.bf16.msrb.mxu0 %v4492_v28  ;;  %v4986_v63 = vld [vmem:[#allocation11 + $0xc8] sm:$0xf0] }
 0x283   : > { %v1865_v52 = vadd.f32 %v1864_v24, %v6200_v61  ;;  %v2250_v42 = vmax.f32 %v1911_v41, 0.0  ;;  %v4672_v61 = vor.u32 %v5006_v6, %v4669_v17  ;;  %2831 = vmatpush.bf16.msrb.mxu2 %v4608_v34  ;;  %v4715_v41 = vld [vmem:[#allocation11 + $0x1c8] sm:$0xf]  ;;  %v5019_v24 = vld [vmem:[#allocation11 + $0x1d0] sm:$0xf0]  ;;  %v6360_v49 = vadd.f32 %v6274_v31, %v1945_v4 }
 0x284   : > { %2206 = vmatmul.bf16.gmra.mxu0 %v6183_v44  ;;  %v4716_v7 = vor.u32 %v5019_v24, %v4715_v41  ;;  %v4679_v31 = vld [vmem:[#allocation11 + $0x180] sm:$0xf] }
 0x285   : > { %2059 = vmatmul.bf16.gmra.mxu1 %v6183_v44  ;;  %2108 = vmatmul.bf16.gmra.mxu2 %v6113_v23  ;;  %v6349_v26 = vpack.c.bf16 %v2250_v42, %v2247_v59  ;;  %v4596_v44 = vor.u32 %v4989_v8, %v4595_v37  ;;  %v4584_v59 = vor.u32 %v4986_v63, %v4583_v36  ;;  %v4703_v42 = vld [vmem:[#allocation11 + $0x1b0] sm:$0xf] }
 0x286   : > { %2157 = vmatmul.bf16.gmra.mxu3 %v6179_v35  ;;  %2973 = vmatpush.bf16.msra.mxu1 %v4672_v61  ;;  %v5013_v61 = vld [vmem:[#allocation11 + $0x1a0] sm:$0xf0] }
 0x287   : > { %2878 = vmatpush.bf16.msrb.mxu3 %v4728_v22  ;;  %2832 = vmatpush.bf16.msrb.mxu2 %v4596_v44 }
 0x288   : > { %v1913_v0 = vpop.f32.mrf.mxu2 }
 0x289   : > { %v1914_v43 = vadd.f32 %v1913_v0, %v1865_v52  ;;  %v6354_v12 = vpop.f32.mrf.mxu0  ;;  %v6357_v35 = vpop.f32.mrf.mxu3  ;;  %v4704_v52 = vor.u32 %v5016_v18, %v4703_v42  ;;  %v5010_v0 = vld [vmem:[#allocation11 + $0x188] sm:$0xf0]  ;;  %v1933_v18 = vadd.f32 %v6242_v1, %v6304_v33 }
 0x28a   : > { %v1866_v23 = vpop.f32.mrf.mxu1  ;;  %v4680_v4 = vor.u32 %v5010_v0, %v4679_v31 }
 0x28b   : > { %v1867_v28 = vadd.f32 %v1866_v23, %v6212_v13  ;;  %2879 = vmatpush.bf16.msrb.mxu3 %v4716_v7  ;;  %2833 = vmatpush.bf16.msrb.mxu2 %v4584_v59  ;;  %v4691_v13 = vld [vmem:[#allocation11 + $0x198] sm:$0xf]  ;;  %v2253_v37 = vmax.f32 %v1914_v43, 0.0  ;;  %v1950_v23 = vadd.f32 %v6299_v2, %v6304_v33 }
 0x28c   : > { %v4692_v22 = vor.u32 %v5013_v61, %v4691_v13  ;;  %v5000_v13 = vld [vmem:[#allocation11 + $0x13c] sm:$0xf]  ;;  %v4645_v61 = vld [vmem:[#allocation11 + $0x144] sm:$0xf0] }
 0x28d   : > { %v4648_v1 = vor.u32 %v5000_v13, %v4645_v61 }
 0x28f   : > { %2880 = vmatpush.bf16.msrb.mxu3 %v4704_v52 }
 0x290   : > { %v1915_v9 = vpop.f32.mrf.mxu2 }
 0x291   : > { %v1916_v6 = vadd.f32 %v1915_v9, %v1867_v28  ;;  %v6362_v34 = vpop.f32.mrf.mxu0  ;;  %v6365_v56 = vpop.f32.mrf.mxu3  ;;  %v5003_v28 = vld [vmem:[#allocation11 + $0x154] sm:$0xf] }
 0x292   : > { %v1869_v17 = vpop.f32.mrf.mxu1 }
 0x293   : > { %v1870_v48 = vadd.f32 %v1869_v17, %v6224_v32  ;;  %v2256_v8 = vmax.f32 %v1916_v6, 0.0  ;;  %2881 = vmatpush.bf16.msrb.mxu3 %v4692_v22  ;;  %v1982_v17 = vadd.f32 %v6230_v45, %v1933_v18 }
 0x294   : > { %2211 = vmatmul.bf16.gmra.mxu0 %v6209_v11 }
 0x295   : > { %2064 = vmatmul.bf16.gmra.mxu1 %v6209_v11  ;;  %2113 = vmatmul.bf16.gmra.mxu2 %v6125_v20  ;;  %v6370_v44 = vpack.c.bf16 %v2256_v8, %v2253_v37  ;;  %v4657_v11 = vld [vmem:[#allocation11 + $0x15c] sm:$0xf0] }
 0x296   : > { %2162 = vmatmul.bf16.gmra.mxu3 %v6202_v5  ;;  %v4660_v36 = vor.u32 %v5003_v28, %v4657_v11  ;;  %v6381_v5 = vadd.f32 %v6292_v3, %v1950_v23 }
 0x297   : > { %2882 = vmatpush.bf16.msrb.mxu3 %v4680_v4 }
 0x298   : > { %v1918_v32 = vpop.f32.mrf.mxu2  ;;  %2974 = vmatpush.bf16.msra.mxu1 %v4660_v36  ;;  %v1938_v36 = vadd.f32 %v6258_v53, %v6304_v33 }
 0x299   : > { %v1919_v43 = vadd.f32 %v1918_v32, %v1870_v48  ;;  %v6375_v24 = vpop.f32.mrf.mxu0  ;;  %v6378_v7 = vpop.f32.mrf.mxu3 }
 0x29a   : > { %v1871_v41 = vpop.f32.mrf.mxu1  ;;  %v1987_v18 = vadd.f32 %v6245_v21, %v1938_v36 }
 0x29b   : > { %v1872_v20 = vadd.f32 %v1871_v41, %v6233_v50  ;;  %v2259_v9 = vmax.f32 %v1919_v43, 0.0  ;;  %v6390_v50 = vperm.slane %v6185_v51, 2 }
 0x29c   : > { %2975 = vmatpush.bf16.msra.mxu1 %v4648_v1 }
 0x2a0   : > { %v1920_v63 = vpop.f32.mrf.mxu2 }
 0x2a1   : > { %v1921_v59 = vadd.f32 %v1920_v63, %v1872_v20  ;;  %v2177_v2 = vpop.f32.mrf.mxu0  ;;  %v6385_v52 = vpop.f32.mrf.mxu3 }
 0x2a2   : > { %v2030_v42 = vpop.f32.mrf.mxu1 }
 0x2a3   : > { %v2262_v6 = vmax.f32 %v1921_v59, 0.0  ;;  %v2031_v48 = vadd.f32 %v2030_v42, %v1982_v17 }
 0x2a4   : > { %2932 = vmatmul.bf16.vlgmr.msrb.gmra.mxu0 %v6251_v25 }
 0x2a5   : > { %2785 = vmatmul.bf16.vlgmr.msrb.gmra.mxu1 %v6251_v25  ;;  %v6392_v3 = vpack.c.bf16 %v2262_v6, %v2259_v9  ;;  %v2218_v32 = vmax.f32 %v2031_v48, 0.0  ;;  %v4997_v6 = vld [vmem:[#allocation11 + $0x124] sm:$0xf] }
 0x2a8   : > { %v2079_v22 = vpop.f32.mrf.mxu2 }
 0x2a9   : > { %v2080_v37 = vadd.f32 %v2079_v22, %v6390_v50  ;;  %v2179_v31 = vpop.f32.mrf.mxu0  ;;  %v2128_v4 = vpop.f32.mrf.mxu3 }
 0x2aa   : > { %v2032_v8 = vpop.f32.mrf.mxu1 }
 0x2ab   : > { %v2033_v0 = vadd.f32 %v2032_v8, %v6318_v10  ;;  %v2129_v23 = vadd.f32 %v2128_v4, %v2080_v37 }
 0x2ad   : > { %v2221_v51 = vmax.f32 %v2033_v0, 0.0  ;;  %v2178_v45 = vadd.f32 %v2177_v2, %v2129_v23  ;;  %v4633_v2 = vld [vmem:[#allocation11 + $0x12c] sm:$0xf0] }
 0x2ae   : > { %v4636_v61 = vor.u32 %v4997_v6, %v4633_v2 }
 0x2af   : > { %v6397_v43 = vpack.c.bf16 %v2221_v51, %v2218_v32  ;;  %v2219_v59 = vmax.f32 %v2178_v45, 0.0 }
 0x2b0   : > { %v2081_v41 = vpop.f32.mrf.mxu2  ;;  %2976 = vmatpush.bf16.msra.mxu1 %v4636_v61 }
 0x2b1   : > { %2834 = vmatmul.bf16.vlgmr.msrb.gmra.mxu2 %v6397_v43  ;;  %v2082_v28 = vadd.f32 %v2081_v41, %v6390_v50  ;;  %v2182_v20 = vpop.f32.mrf.mxu0  ;;  %v2130_v63 = vpop.f32.mrf.mxu3 }
 0x2b2   : > { %v2035_v11 = vpop.f32.mrf.mxu1 }
 0x2b3   : > { %v2131_v10 = vadd.f32 %v2130_v63, %v2082_v28  ;;  %v2036_v17 = vadd.f32 %v2035_v11, %v1987_v18 }
 0x2b4   : > { %2937 = vmatmul.bf16.gmra.mxu0 %v6269_v14 }
 0x2b5   : > { %2790 = vmatmul.bf16.gmra.mxu1 %v6269_v14  ;;  %v2180_v42 = vadd.f32 %v2179_v31, %v2131_v10  ;;  %v2224_v31 = vmax.f32 %v2036_v17, 0.0 }
 0x2b7   : > { %v2222_v9 = vmax.f32 %v2180_v42, 0.0  ;;  %v4994_v42 = vld [vmem:[#allocation11 + $0x10c] sm:$0xf] }
 0x2b8   : > { %v2084_v13 = vpop.f32.mrf.mxu2 }
 0x2b9   : > { %v6406_v48 = vpack.c.bf16 %v2222_v9, %v2219_v59  ;;  %v2085_v53 = vadd.f32 %v2084_v13, %v6390_v50  ;;  %v2184_v1 = vpop.f32.mrf.mxu0  ;;  %v2133_v8 = vpop.f32.mrf.mxu3 }
 0x2ba   : > { %v2037_v22 = vpop.f32.mrf.mxu1 }
 0x2bb   : > { %v2038_v37 = vadd.f32 %v2037_v22, %v6339_v19  ;;  %2883 = vmatmul.bf16.vlgmr.msrb.gmra.mxu3 %v6406_v48  ;;  %v2134_v0 = vadd.f32 %v2133_v8, %v2085_v53  ;;  %v1943_v19 = vadd.f32 %v6276_v30, %v6304_v33 }
 0x2bd   : > { %v2227_v21 = vmax.f32 %v2038_v37, 0.0  ;;  %v2183_v51 = vadd.f32 %v2182_v20, %v2134_v0  ;;  %v1992_v10 = vadd.f32 %v6262_v60, %v1943_v19  ;;  %v4621_v20 = vld [vmem:[#allocation11 + $0x114] sm:$0xf0] }
 0x2be   : > { %v4624_v6 = vor.u32 %v4994_v42, %v4621_v20 }
 0x2bf   : > { %v6411_v4 = vpack.c.bf16 %v2227_v21, %v2224_v31  ;;  %v2225_v36 = vmax.f32 %v2183_v51, 0.0 }
 0x2c0   : > { %v2086_v32 = vpop.f32.mrf.mxu2  ;;  %2977 = vmatpush.bf16.msra.mxu1 %v4624_v6 }
 0x2c1   : > { %2839 = vmatmul.bf16.gmra.mxu2 %v6411_v4  ;;  %v2087_v23 = vadd.f32 %v2086_v32, %v6390_v50  ;;  %v2187_v45 = vpop.f32.mrf.mxu0  ;;  %v2135_v28 = vpop.f32.mrf.mxu3 }
 0x2c2   : > { %v2040_v41 = vpop.f32.mrf.mxu1 }
 0x2c3   : > { %v2136_v11 = vadd.f32 %v2135_v28, %v2087_v23  ;;  %v2041_v18 = vadd.f32 %v2040_v41, %v1992_v10 }
 0x2c4   : > { %2942 = vmatmul.bf16.gmra.mxu0 %v6287_v54 }
 0x2c5   : > { %2795 = vmatmul.bf16.gmra.mxu1 %v6287_v54  ;;  %v2185_v63 = vadd.f32 %v2184_v1, %v2136_v11  ;;  %v2230_v22 = vmax.f32 %v2041_v18, 0.0 }
 0x2c7   : > { %v2228_v59 = vmax.f32 %v2185_v63, 0.0 }
 0x2c8   : > { %v2089_v9 = vpop.f32.mrf.mxu2 }
 0x2c9   : > { %v2090_v2 = vadd.f32 %v2089_v9, %v6390_v50  ;;  %v2189_v30 = vpop.f32.mrf.mxu0  ;;  %v6421_v13 = vpack.c.bf16 %v2228_v59, %v2225_v36  ;;  %v2138_v53 = vpop.f32.mrf.mxu3  ;;  %v4991_v36 = vld [vmem:[#allocation11 + $0xf4] sm:$0xf] }
 0x2ca   : > { %v2042_v17 = vpop.f32.mrf.mxu1 }
 0x2cb   : > { %v2043_v61 = vadd.f32 %v2042_v17, %v6360_v49  ;;  %2888 = vmatmul.bf16.gmra.mxu3 %v6421_v13  ;;  %v2139_v1 = vadd.f32 %v2138_v53, %v2090_v2  ;;  %v1948_v49 = vadd.f32 %v6294_v39, %v6304_v33 }
 0x2cd   : > { %v2233_v60 = vmax.f32 %v2043_v61, 0.0  ;;  %v2188_v31 = vadd.f32 %v2187_v45, %v2139_v1  ;;  %v1997_v28 = vadd.f32 %v6280_v29, %v1948_v49  ;;  %v4609_v45 = vld [vmem:[#allocation11 + $0xfc] sm:$0xf0]  ;;  %v1955_v49 = vadd.f32 %v6323_v40, %v6304_v33  ;;  %v5005_v40 = vld [vmem:[#allocation11 + $0x160] sm:$0xf0] }
 0x2ce   : > { %v4612_v59 = vor.u32 %v4991_v36, %v4609_v45 }
 0x2cf   : > { %v6425_v37 = vpack.c.bf16 %v2233_v60, %v2230_v22  ;;  %v2231_v41 = vmax.f32 %v2188_v31, 0.0  ;;  %v2004_v45 = vadd.f32 %v6312_v27, %v1955_v49 }
 0x2d0   : > { %v2091_v8 = vpop.f32.mrf.mxu2  ;;  %2978 = vmatpush.bf16.msra.mxu1 %v4612_v59 }
 0x2d1   : > { %2844 = vmatmul.bf16.gmra.mxu2 %v6425_v37  ;;  %v2092_v21 = vadd.f32 %v2091_v8, %v6390_v50  ;;  %v2192_v32 = vpop.f32.mrf.mxu0  ;;  %v2140_v51 = vpop.f32.mrf.mxu3 }
 0x2d2   : > { %v2045_v0 = vpop.f32.mrf.mxu1 }
 0x2d3   : > { %v2141_v23 = vadd.f32 %v2140_v51, %v2092_v21  ;;  %v2046_v63 = vadd.f32 %v2045_v0, %v1997_v28  ;;  %v4675_v21 = vld [vmem:[#allocation11 + $0x170] sm:$0xf]  ;;  %v5008_v0 = vld [vmem:[#allocation11 + $0x178] sm:$0xf0] }
 0x2d4   : > { %2947 = vmatmul.bf16.gmra.mxu0 %v6307_v46  ;;  %v4676_v51 = vor.u32 %v5008_v0, %v4675_v21  ;;  %v4988_v28 = vld [vmem:[#allocation11 + $0xdc] sm:$0xf]  ;;  %v4639_v21 = vld [vmem:[#allocation11 + $0x128] sm:$0xf]  ;;  %v4999_v0 = vld [vmem:[#allocation11 + $0x130] sm:$0xf0] }
 0x2d5   : > { %2800 = vmatmul.bf16.gmra.mxu1 %v6307_v46  ;;  %v2190_v19 = vadd.f32 %v2189_v30, %v2141_v23  ;;  %v2236_v2 = vmax.f32 %v2046_v63, 0.0 }
 0x2d6   : > { %3120 = vmatpush.bf16.msra.mxu0 %v4676_v51 }
 0x2d7   : > { %v2234_v11 = vmax.f32 %v2190_v19, 0.0 }
 0x2d8   : > { %v2094_v10 = vpop.f32.mrf.mxu2 }
 0x2d9   : > { %v2095_v42 = vadd.f32 %v2094_v10, %v6390_v50  ;;  %v2194_v39 = vpop.f32.mrf.mxu0  ;;  %v6435_v18 = vpack.c.bf16 %v2234_v11, %v2231_v41  ;;  %v2143_v6 = vpop.f32.mrf.mxu3  ;;  %v4663_v10 = vld [vmem:[#allocation11 + $0x158] sm:$0xf] }
 0x2da   : > { %v2047_v20 = vpop.f32.mrf.mxu1 }
 0x2db   : > { %v2048_v9 = vadd.f32 %v2047_v20, %v6381_v5  ;;  %2893 = vmatmul.bf16.gmra.mxu3 %v6435_v18  ;;  %v2144_v17 = vadd.f32 %v2143_v6, %v2095_v42  ;;  %v1953_v5 = vadd.f32 %v6315_v62, %v6304_v33  ;;  %v4597_v62 = vld [vmem:[#allocation11 + $0xe4] sm:$0xf0] }
 0x2dc   : > { %v4600_v63 = vor.u32 %v4988_v28, %v4597_v62 }
 0x2dd   : > { %v2239_v29 = vmax.f32 %v2048_v9, 0.0  ;;  %v2193_v53 = vadd.f32 %v2192_v32, %v2144_v17  ;;  %v2002_v41 = vadd.f32 %v6296_v58, %v1953_v5  ;;  %v4765_v5 = vld [vmem:[#allocation11 + $0x234] sm:$0xf0] }
 0x2de   : > { %2979 = vmatpush.bf16.msra.mxu1 %v4600_v63  ;;  %v1960_v63 = vadd.f32 %v6344_v16, %v6304_v33 }
 0x2df   : > { %v6439_v30 = vpack.c.bf16 %v2239_v29, %v2236_v2  ;;  %v2237_v32 = vmax.f32 %v2193_v53, 0.0  ;;  %v4651_v2 = vld [vmem:[#allocation11 + $0x140] sm:$0xf]  ;;  %v5002_v29 = vld [vmem:[#allocation11 + $0x148] sm:$0xf0] }
 0x2e0   : > { %v2096_v61 = vpop.f32.mrf.mxu2  ;;  %v2009_v16 = vadd.f32 %v6333_v55, %v1960_v63  ;;  %v5021_v55 = vld [vmem:[#allocation11 + $0x1e4] sm:$0xf] }
 0x2e1   : > { %2849 = vmatmul.bf16.gmra.mxu2 %v6439_v30  ;;  %v2097_v22 = vadd.f32 %v2096_v61, %v6390_v50  ;;  %v2197_v1 = vpop.f32.mrf.mxu0  ;;  %v2145_v8 = vpop.f32.mrf.mxu3  ;;  %v4652_v61 = vor.u32 %v5002_v29, %v4651_v2 }
 0x2e2   : > { %v2050_v60 = vpop.f32.mrf.mxu1 }
 0x2e3   : > { %v2146_v31 = vadd.f32 %v2145_v8, %v2097_v22  ;;  %v2051_v11 = vadd.f32 %v2050_v60, %v2002_v41  ;;  %v5030_v60 = vld [vmem:[#allocation11 + $0x22c] sm:$0xf]  ;;  %v1958_v41 = vadd.f32 %v6336_v57, %v6304_v33 }
 0x2e4   : > { %2952 = vmatmul.bf16.gmra.mxu0 %v6328_v47 }
 0x2e5   : > { %2805 = vmatmul.bf16.gmra.mxu1 %v6328_v47  ;;  %v2195_v23 = vadd.f32 %v2194_v39, %v2146_v31  ;;  %v4664_v39 = vor.u32 %v5005_v40, %v4663_v10  ;;  %v2242_v17 = vmax.f32 %v2051_v11, 0.0  ;;  %v4768_v31 = vor.u32 %v5030_v60, %v4765_v5  ;;  %v5027_v11 = vld [vmem:[#allocation11 + $0x214] sm:$0xf]  ;;  %v4996_v10 = vld [vmem:[#allocation11 + $0x118] sm:$0xf0] }
 0x2e7   : > { %v2240_v19 = vmax.f32 %v2195_v23, 0.0  ;;  %3121 = vmatpush.bf16.msra.mxu0 %v4664_v39  ;;  %v4640_v23 = vor.u32 %v4999_v0, %v4639_v21  ;;  %3022 = vmatpush.bf16.msra.mxu2 %v4768_v31  ;;  %v4579_v31 = vld [vmem:[#allocation11 + $0xb0] sm:$0xf]  ;;  %v4984_v21 = vld [vmem:[#allocation11 + $0xb8] sm:$0xf0] }
 0x2e8   : > { %v2099_v36 = vpop.f32.mrf.mxu2 }
 0x2e9   : > { %v2100_v59 = vadd.f32 %v2099_v36, %v6390_v50  ;;  %v2199_v20 = vpop.f32.mrf.mxu0  ;;  %v6452_v9 = vpack.c.bf16 %v2240_v19, %v2237_v32  ;;  %v2148_v58 = vpop.f32.mrf.mxu3  ;;  %v4753_v36 = vld [vmem:[#allocation11 + $0x21c] sm:$0xf0] }
 0x2ea   : > { %v2052_v42 = vpop.f32.mrf.mxu1 }
 0x2eb   : > { %v2053_v6 = vadd.f32 %v2052_v42, %v2004_v45  ;;  %2898 = vmatmul.bf16.gmra.mxu3 %v6452_v9  ;;  %v2149_v53 = vadd.f32 %v2148_v58, %v2100_v59  ;;  %3122 = vmatpush.bf16.msra.mxu0 %v4652_v61  ;;  %v4627_v45 = vld [vmem:[#allocation11 + $0x110] sm:$0xf]  ;;  %v2007_v42 = vadd.f32 %v6320_v15, %v1958_v41  ;;  %v4741_v61 = vld [vmem:[#allocation11 + $0x204] sm:$0xf0]  ;;  %v4993_v15 = vld [vmem:[#allocation11 + $0x100] sm:$0xf0] }
 0x2ec   : > { %v4628_v59 = vor.u32 %v4996_v10, %v4627_v45  ;;  %v4585_v58 = vld [vmem:[#allocation11 + $0xcc] sm:$0xf0]  ;;  %v4603_v41 = vld [vmem:[#allocation11 + $0xe0] sm:$0xf]  ;;  %v4990_v45 = vld [vmem:[#allocation11 + $0xe8] sm:$0xf0] }
 0x2ed   : > { %v2245_v27 = vmax.f32 %v2053_v6, 0.0  ;;  %v2198_v49 = vadd.f32 %v2197_v1, %v2149_v53  ;;  %v4756_v1 = vor.u32 %v5027_v11, %v4753_v36  ;;  %v4985_v6 = vld [vmem:[#allocation11 + $0xc4] sm:$0xf]  ;;  %v4615_v53 = vld [vmem:[#allocation11 + $0xf8] sm:$0xf] }
 0x2ee   : > { %v4567_v10 = vld [vmem:[#allocation11 + $0x98] sm:$0xf] }
 0x2ef   : > { %v6455_v22 = vpack.c.bf16 %v2245_v27, %v2242_v17  ;;  %3123 = vmatpush.bf16.msra.mxu0 %v4640_v23  ;;  %v2243_v40 = vmax.f32 %v2198_v49, 0.0  ;;  %3023 = vmatpush.bf16.msra.mxu2 %v4756_v1  ;;  %v4588_v17 = vor.u32 %v4985_v6, %v4585_v58  ;;  %v5024_v27 = vld [vmem:[#allocation11 + $0x1fc] sm:$0xf]  ;;  %v4729_v23 = vld [vmem:[#allocation11 + $0x1ec] sm:$0xf0]  ;;  %v4604_v1 = vor.u32 %v4990_v45, %v4603_v41 }
 0x2f0   : > { %v2101_v8 = vpop.f32.mrf.mxu2  ;;  %v4732_v36 = vor.u32 %v5021_v55, %v4729_v23  ;;  %v4543_v55 = vld [vmem:[#allocation11 + $0x68] sm:$0xf]  ;;  %v5032_v45 = vld [vmem:[#allocation11 + $0x238] sm:$0xf0] }
 0x2f1   : > { %2854 = vmatmul.bf16.gmra.mxu2 %v6455_v22  ;;  %v2102_v51 = vadd.f32 %v2101_v8, %v6390_v50  ;;  %v2150_v19 = vpop.f32.mrf.mxu3  ;;  %v6461_v28 = vpop.f32.mrf.mxu0  ;;  %v4744_v8 = vor.u32 %v5024_v27, %v4741_v61  ;;  %2980 = vmatpush.bf16.msra.mxu1 %v4588_v17 }
 0x2f2   : > { %v2055_v32 = vpop.f32.mrf.mxu1 }
 0x2f3   : > { %v2151_v62 = vadd.f32 %v2150_v19, %v2102_v51  ;;  %3124 = vmatpush.bf16.msra.mxu0 %v4628_v59  ;;  %v2056_v2 = vadd.f32 %v2055_v32, %v2007_v42  ;;  %v4616_v51 = vor.u32 %v4993_v15, %v4615_v53  ;;  %v4580_v32 = vor.u32 %v4984_v21, %v4579_v31  ;;  %v5018_v42 = vld [vmem:[#allocation11 + $0x1cc] sm:$0xf]  ;;  %v4555_v53 = vld [vmem:[#allocation11 + $0x80] sm:$0xf]  ;;  %v5015_v21 = vld [vmem:[#allocation11 + $0x1b4] sm:$0xf] }
 0x2f4   : > { %2957 = vmatmul.bf16.gmra.mxu0 %v6349_v26  ;;  %3024 = vmatpush.bf16.msra.mxu2 %v4744_v8 }
 0x2f5   : > { %2810 = vmatmul.bf16.gmra.mxu1 %v6349_v26  ;;  %v2200_v57 = vadd.f32 %v2199_v20, %v2151_v62  ;;  %v2248_v19 = vmax.f32 %v2056_v2, 0.0  ;;  %3071 = vmatpush.bf16.msra.mxu3 %v4580_v32  ;;  %v4591_v2 = vld [vmem:[#allocation11 + $0xc8] sm:$0xf] }
 0x2f7   : > { %v2246_v39 = vmax.f32 %v2200_v57, 0.0  ;;  %3125 = vmatpush.bf16.msra.mxu0 %v4616_v51 }
 0x2f8   : > { %v2104_v29 = vpop.f32.mrf.mxu2  ;;  %3025 = vmatpush.bf16.msra.mxu2 %v4732_v36  ;;  %v4771_v36 = vld [vmem:[#allocation11 + $0x230] sm:$0xf] }
 0x2f9   : > { %v2105_v60 = vadd.f32 %v2104_v29, %v6390_v50  ;;  %v6470_v20 = vpack.c.bf16 %v2246_v39, %v2243_v40  ;;  %v2153_v49 = vpop.f32.mrf.mxu3  ;;  %v2204_v11 = vpop.f32.mrf.mxu0  ;;  %v4981_v40 = vld [vmem:[#allocation11 + $0xa0] sm:$0xf0]  ;;  %v4717_v39 = vld [vmem:[#allocation11 + $0x1d4] sm:$0xf0]  ;;  %v4987_v29 = vld [vmem:[#allocation11 + $0xd0] sm:$0xf0] }
 0x2fa   : > { %v2057_v5 = vpop.f32.mrf.mxu1  ;;  %v4568_v59 = vor.u32 %v4981_v40, %v4567_v10  ;;  %v4720_v58 = vor.u32 %v5018_v42, %v4717_v39  ;;  %v4592_v61 = vor.u32 %v4987_v29, %v4591_v2  ;;  %v4772_v10 = vor.u32 %v5032_v45, %v4771_v36  ;;  %v5012_v40 = vld [vmem:[#allocation11 + $0x19c] sm:$0xf]  ;;  %v5029_v45 = vld [vmem:[#allocation11 + $0x220] sm:$0xf0] }
 0x2fb   : > { %v2058_v0 = vadd.f32 %v2057_v5, %v2009_v16  ;;  %2903 = vmatmul.bf16.gmra.mxu3 %v6470_v20  ;;  %v2154_v63 = vadd.f32 %v2153_v49, %v2105_v60  ;;  %3126 = vmatpush.bf16.msra.mxu0 %v4604_v1  ;;  %v4978_v60 = vld [vmem:[#allocation11 + $0x88] sm:$0xf0]  ;;  %v1963_v5 = vadd.f32 %v6357_v35, %v6304_v33  ;;  %v4975_v35 = vld [vmem:[#allocation11 + $0x70] sm:$0xf0] }
 0x2fc   : > { %3072 = vmatpush.bf16.msra.mxu3 %v4568_v59  ;;  %v4556_v15 = vor.u32 %v4978_v60, %v4555_v53  ;;  %3026 = vmatpush.bf16.msra.mxu2 %v4720_v58  ;;  %v1965_v49 = vadd.f32 %v6365_v56, %v6304_v33  ;;  %v4693_v59 = vld [vmem:[#allocation11 + $0x1a4] sm:$0xf0]  ;;  %v4972_v58 = vld [vmem:[#allocation11 + $0x58] sm:$0xf0]  ;;  %v1970_v36 = vadd.f32 %v6385_v52, %v6304_v33 }
 0x2fd   : > { %v2251_v62 = vmax.f32 %v2058_v0, 0.0  ;;  %v2203_v16 = vadd.f32 %v6461_v28, %v2154_v63  ;;  %v4705_v0 = vld [vmem:[#allocation11 + $0x1bc] sm:$0xf0]  ;;  %v2012_v23 = vadd.f32 %v6341_v38, %v1963_v5  ;;  %v4696_v38 = vor.u32 %v5012_v40, %v4693_v59  ;;  %3169 = vmatpush.bf16.msrb.mxu1 %v4772_v10  ;;  %v4969_v5 = vld [vmem:[#allocation11 + $0x40] sm:$0xf0] }
 0x2fe   : > { %v4708_v28 = vor.u32 %v5015_v21, %v4705_v0  ;;  %v2014_v1 = vadd.f32 %v6354_v12, %v1965_v49  ;;  %v5009_v12 = vld [vmem:[#allocation11 + $0x184] sm:$0xf]  ;;  %v4495_v10 = vld [vmem:[#allocation11 + $0x8] sm:$0xf]  ;;  %v4963_v40 = vld [vmem:[#allocation11 + $0x10] sm:$0xf0] }
 0x2ff   : > { %v6473_v57 = vpack.c.bf16 %v2251_v62, %v2248_v19  ;;  %v2249_v51 = vmax.f32 %v2203_v16, 0.0  ;;  %3127 = vmatpush.bf16.msra.mxu0 %v4592_v61  ;;  %v4544_v19 = vor.u32 %v4975_v35, %v4543_v55  ;;  %v4966_v55 = vld [vmem:[#allocation11 + $0x28] sm:$0xf0]  ;;  %v1968_v35 = vadd.f32 %v6378_v7, %v6304_v33 }
 0x300   : > { %v2106_v6 = vpop.f32.mrf.mxu2  ;;  %3073 = vmatpush.bf16.msra.mxu3 %v4556_v15  ;;  %3027 = vmatpush.bf16.msra.mxu2 %v4708_v28  ;;  %v4496_v59 = vor.u32 %v4963_v40, %v4495_v10  ;;  %v2019_v33 = vadd.f32 %v6375_v24, %v1970_v36 }
 0x301   : > { %2859 = vmatmul.bf16.gmra.mxu2 %v6473_v57  ;;  %v2107_v17 = vadd.f32 %v2106_v6, %v6390_v50  ;;  %v2155_v8 = vpop.f32.mrf.mxu3  ;;  %v2207_v41 = vpop.f32.mrf.mxu0  ;;  %v4531_v6 = vld [vmem:[#allocation11 + $0x50] sm:$0xf]  ;;  %v2017_v7 = vadd.f32 %v6362_v34, %v1968_v35 }
 0x302   : > { %v2060_v27 = vpop.f32.mrf.mxu1  ;;  %v4532_v16 = vor.u32 %v4972_v58, %v4531_v6 }
 0x303   : > { %v2156_v31 = vadd.f32 %v2155_v8, %v2107_v17  ;;  %v2061_v56 = vadd.f32 %v2060_v27, %v2012_v23  ;;  %v4681_v17 = vld [vmem:[#allocation11 + $0x18c] sm:$0xf0]  ;;  %v4519_v27 = vld [vmem:[#allocation11 + $0x38] sm:$0xf] }
 0x304   : > { %2962 = vmatmul.bf16.gmra.mxu0 %v6370_v44  ;;  %3074 = vmatpush.bf16.msra.mxu3 %v4544_v19  ;;  %v4684_v60 = vor.u32 %v5009_v12, %v4681_v17  ;;  %v4520_v15 = vor.u32 %v4969_v5, %v4519_v27 }
 0x305   : > { %2815 = vmatmul.bf16.gmra.mxu1 %v6370_v44  ;;  %v2205_v32 = vadd.f32 %v2204_v11, %v2156_v31  ;;  %3028 = vmatpush.bf16.msra.mxu2 %v4696_v38  ;;  %v2254_v61 = vmax.f32 %v2061_v56, 0.0 }
 0x307   : > { %v2252_v62 = vmax.f32 %v2205_v32, 0.0  ;;  %v4507_v32 = vld [vmem:[#allocation11 + $0x20] sm:$0xf] }
 0x308   : > { %v2109_v63 = vpop.f32.mrf.mxu2  ;;  %3075 = vmatpush.bf16.msra.mxu3 %v4532_v16  ;;  %v4508_v19 = vor.u32 %v4966_v55, %v4507_v32 }
 0x309   : > { %v2110_v11 = vadd.f32 %v2109_v63, %v6390_v50  ;;  %v6487_v39 = vpack.c.bf16 %v2252_v62, %v2249_v51  ;;  %v2158_v29 = vpop.f32.mrf.mxu3  ;;  %3029 = vmatpush.bf16.msra.mxu2 %v4684_v60  ;;  %v2209_v21 = vpop.f32.mrf.mxu0 }
 0x30a   : > { %v2062_v42 = vpop.f32.mrf.mxu1 }
 0x30b   : > { %v2063_v2 = vadd.f32 %v2062_v42, %v2014_v1  ;;  %2908 = vmatmul.bf16.gmra.mxu3 %v6487_v39  ;;  %v2159_v8 = vadd.f32 %v2158_v29, %v2110_v11 }
 0x30c   : > { %3076 = vmatpush.bf16.msra.mxu3 %v4520_v15 }
 0x30d   : > { %v2257_v53 = vmax.f32 %v2063_v2, 0.0  ;;  %v2208_v49 = vadd.f32 %v2207_v41, %v2159_v8  ;;  %v4759_v41 = vld [vmem:[#allocation11 + $0x218] sm:$0xf] }
 0x30e   : > { %v4760_v1 = vor.u32 %v5029_v45, %v4759_v41  ;;  %v4735_v41 = vld [vmem:[#allocation11 + $0x1e8] sm:$0xf]  ;;  %v5023_v45 = vld [vmem:[#allocation11 + $0x1f0] sm:$0xf0] }
 0x30f   : > { %v6490_v31 = vpack.c.bf16 %v2257_v53, %v2254_v61  ;;  %v2255_v56 = vmax.f32 %v2208_v49, 0.0 }
 0x310   : > { %v2111_v0 = vpop.f32.mrf.mxu2  ;;  %3077 = vmatpush.bf16.msra.mxu3 %v4508_v19  ;;  %3170 = vmatpush.bf16.msrb.mxu1 %v4760_v1 }
 0x311   : > { %2864 = vmatmul.bf16.gmra.mxu2 %v6490_v31  ;;  %v2112_v28 = vadd.f32 %v2111_v0, %v6390_v50  ;;  %v2160_v23 = vpop.f32.mrf.mxu3  ;;  %v2212_v2 = vpop.f32.mrf.mxu0  ;;  %v5026_v0 = vld [vmem:[#allocation11 + $0x208] sm:$0xf0] }
 0x312   : > { %v2065_v51 = vpop.f32.mrf.mxu1 }
 0x313   : > { %v2161_v62 = vadd.f32 %v2160_v23, %v2112_v28  ;;  %v2066_v42 = vadd.f32 %v2065_v51, %v2017_v7 }
 0x314   : > { %2967 = vmatmul.bf16.gmra.mxu0 %v6392_v3  ;;  %3078 = vmatpush.bf16.msra.mxu3 %v4496_v59 }
 0x315   : > { %2820 = vmatmul.bf16.gmra.mxu1 %v6392_v3  ;;  %v2210_v63 = vadd.f32 %v2209_v21, %v2161_v62  ;;  %v2260_v12 = vmax.f32 %v2066_v42, 0.0  ;;  %v4747_v21 = vld [vmem:[#allocation11 + $0x200] sm:$0xf] }
 0x316   : > { %v4748_v51 = vor.u32 %v5026_v0, %v4747_v21  ;;  %v4711_v21 = vld [vmem:[#allocation11 + $0x1b8] sm:$0xf]  ;;  %v5017_v0 = vld [vmem:[#allocation11 + $0x1c0] sm:$0xf0] }
 0x317   : > { %v2258_v11 = vmax.f32 %v2210_v63, 0.0 }
 0x318   : > { %v2114_v38 = vpop.f32.mrf.mxu2  ;;  %3171 = vmatpush.bf16.msrb.mxu1 %v4748_v51 }
 0x319   : > { %v2115_v52 = vadd.f32 %v2114_v38, %v6390_v50  ;;  %v6503_v58 = vpack.c.bf16 %v2258_v11, %v2255_v56  ;;  %v2163_v16 = vpop.f32.mrf.mxu3  ;;  %v2214_v15 = vpop.f32.mrf.mxu0  ;;  %v4736_v56 = vor.u32 %v5023_v45, %v4735_v41 }
 0x31a   : > { %v2067_v6 = vpop.f32.mrf.mxu1 }
 0x31b   : > { %v2068_v29 = vadd.f32 %v2067_v6, %v2019_v33  ;;  %2913 = vmatmul.bf16.gmra.mxu3 %v6503_v58  ;;  %v2164_v17 = vadd.f32 %v2163_v16, %v2115_v52  ;;  %v5020_v33 = vld [vmem:[#allocation11 + $0x1d8] sm:$0xf0] }
 0x31c   : > { %3172 = vmatpush.bf16.msrb.mxu1 %v4736_v56 }
 0x31d   : > { %v2263_v34 = vmax.f32 %v2068_v29, 0.0  ;;  %v2213_v24 = vadd.f32 %v2212_v2, %v2164_v17 }
 0x31f   : > { %v6506_v27 = vpack.c.bf16 %v2263_v34, %v2260_v12  ;;  %v2261_v49 = vmax.f32 %v2213_v24, 0.0 }
 0x320   : > { %v2116_v61 = vpop.f32.mrf.mxu2 }
 0x321   : > { %2869 = vmatmul.bf16.gmra.mxu2 %v6506_v27  ;;  %v2117_v53 = vadd.f32 %v2116_v61, %v6390_v50  ;;  %v2165_v5 = vpop.f32.mrf.mxu3  ;;  %v6517_v50 = vld [vmem:[%s7048_s29] sm:$0x7] }
 0x322   : > { %v2786_v60 = vpop.f32.mrf.mxu1  ;;  %v6521_v23 = vperm.slane %v6517_v50, 0 }
 0x323   : > { %v2166_v8 = vadd.f32 %v2165_v5, %v2117_v53  ;;  %v6537_v53 = vpop.f32.mrf.mxu0 }
 0x324   : > { %3128 = vmatmul.bf16.vlgmr.msra.gmra.mxu0 %v6397_v43  ;;  %v2787_v19 = vadd.f32 %v2786_v60, %v6521_v23 }
 0x325   : > { %2981 = vmatmul.bf16.vlgmr.msra.gmra.mxu1 %v6397_v43  ;;  %v2215_v28 = vadd.f32 %v2214_v15, %v2166_v8 }
 0x327   : > { %v2264_v32 = vmax.f32 %v2215_v28, 0.0 }
 0x329   : > { %v6512_v35 = vpack.c.bf16 %v2264_v32, %v2261_v49 }
 0x32a   : > { %v2788_v55 = vpop.f32.mrf.mxu1 }
 0x32b   : > { %2918 = vmatmul.bf16.gmra.mxu3 %v6512_v35  ;;  %v2789_v1 = vadd.f32 %v2788_v55, %v6521_v23  ;;  %v6543_v32 = vpop.f32.mrf.mxu0 }
 0x331   : > { %3030 = vmatmul.bf16.vlgmr.msra.gmra.mxu2 %v6406_v48 }
 0x332   : > { %v2791_v43 = vpop.f32.mrf.mxu1 }
 0x333   : > { %v2792_v11 = vadd.f32 %v2791_v43, %v6521_v23 }
 0x334   : > { %v2835_v62 = vpop.f32.mrf.mxu2  ;;  %3133 = vmatmul.bf16.gmra.mxu0 %v6411_v4 }
 0x335   : > { %v2836_v36 = vadd.f32 %v2835_v62, %v2787_v19  ;;  %2986 = vmatmul.bf16.gmra.mxu1 %v6411_v4  ;;  %v4723_v4 = vld [vmem:[#allocation11 + $0x1d0] sm:$0xf] }
 0x336   : > { %v4724_v6 = vor.u32 %v5020_v33, %v4723_v4 }
 0x338   : > { %3173 = vmatpush.bf16.msrb.mxu1 %v4724_v6 }
 0x33a   : > { %v2793_v63 = vpop.f32.mrf.mxu1 }
 0x33b   : > { %3079 = vmatmul.bf16.vlgmr.msra.gmra.mxu3 %v6251_v25  ;;  %v2794_v34 = vadd.f32 %v2793_v63, %v6521_v23  ;;  %v6550_v63 = vpop.f32.mrf.mxu0 }
 0x33c   : > { %v2837_v10 = vpop.f32.mrf.mxu2 }
 0x33d   : > { %v2838_v40 = vadd.f32 %v2837_v10, %v2789_v1 }
 0x33e   : > { %v2884_v7 = vpop.f32.mrf.mxu3 }
 0x33f   : > { %v2885_v52 = vadd.f32 %v2884_v7, %v2836_v36  ;;  %v4699_v7 = vld [vmem:[#allocation11 + $0x1a0] sm:$0xf] }
 0x341   : > { %3035 = vmatmul.bf16.gmra.mxu2 %v6421_v13  ;;  %v3218_v29 = vmax.f32 %v2885_v52, 0.0 }
 0x342   : > { %v2796_v59 = vpop.f32.mrf.mxu1 }
 0x343   : > { %v2797_v5 = vadd.f32 %v2796_v59, %v6521_v23 }
 0x344   : > { %v2840_v42 = vpop.f32.mrf.mxu2  ;;  %3138 = vmatmul.bf16.gmra.mxu0 %v6425_v37 }
 0x345   : > { %v2841_v38 = vadd.f32 %v2840_v42, %v2792_v11  ;;  %2991 = vmatmul.bf16.gmra.mxu1 %v6425_v37 }
 0x346   : > { %v2886_v2 = vpop.f32.mrf.mxu3 }
 0x347   : > { %v2887_v25 = vadd.f32 %v2886_v2, %v2838_v40 }
 0x349   : > { %v3221_v16 = vmax.f32 %v2887_v25, 0.0 }
 0x34a   : > { %v2798_v12 = vpop.f32.mrf.mxu1 }
 0x34b   : > { %v6534_v17 = vpack.c.bf16 %v3221_v16, %v3218_v29  ;;  %3084 = vmatmul.bf16.gmra.mxu3 %v6269_v14  ;;  %v4712_v14 = vor.u32 %v5017_v0, %v4711_v21  ;;  %v2799_v62 = vadd.f32 %v2798_v12, %v6521_v23  ;;  %v6559_v29 = vpop.f32.mrf.mxu0  ;;  %v5040_v12 = vld [vmem:[#allocation13 + $0x38] sm:$0xff] }
 0x34c   : > { %v2842_v61 = vpop.f32.mrf.mxu2  ;;  %3486 = vmatpush.bf16.msrb.mxu2 %v5040_v12 }
 0x34d   : > { %v2843_v24 = vadd.f32 %v2842_v61, %v2794_v34  ;;  %3174 = vmatpush.bf16.msrb.mxu1 %v4712_v14  ;;  %v5038_v14 = vld [vmem:[#allocation13 + $0x28] sm:$0xff] }
 0x34e   : > { %v2889_v37 = vpop.f32.mrf.mxu3 }
 0x34f   : > { %v2890_v49 = vadd.f32 %v2889_v37, %v2841_v38 }
 0x351   : > { %3040 = vmatmul.bf16.gmra.mxu2 %v6435_v18  ;;  %v3224_v55 = vmax.f32 %v2890_v49, 0.0 }
 0x352   : > { %v2801_v60 = vpop.f32.mrf.mxu1 }
 0x353   : > { %v2802_v1 = vadd.f32 %v2801_v60, %v6521_v23  ;;  %v5011_v60 = vld [vmem:[#allocation11 + $0x190] sm:$0xf0]  ;;  %v6565_v21 = vpop.f32.mrf.mxu0 }
 0x354   : > { %v2845_v8 = vpop.f32.mrf.mxu2  ;;  %3143 = vmatmul.bf16.gmra.mxu0 %v6439_v30 }
 0x355   : > { %v2846_v15 = vadd.f32 %v2845_v8, %v2797_v5  ;;  %2996 = vmatmul.bf16.gmra.mxu1 %v6439_v30  ;;  %v5039_v5 = vld [vmem:[#allocation13 + $0x30] sm:$0xff] }
 0x356   : > { %v2891_v28 = vpop.f32.mrf.mxu3  ;;  %3487 = vmatpush.bf16.msrb.mxu2 %v5039_v5 }
 0x357   : > { %v2892_v51 = vadd.f32 %v2891_v28, %v2843_v24 }
 0x359   : > { %v3227_v43 = vmax.f32 %v2892_v51, 0.0 }
 0x35a   : > { %v2803_v19 = vpop.f32.mrf.mxu1  ;;  %3488 = vmatpush.bf16.msrb.mxu2 %v5038_v14 }
 0x35b   : > { %3089 = vmatmul.bf16.gmra.mxu3 %v6287_v54  ;;  %v6547_v41 = vpack.c.bf16 %v3227_v43, %v3224_v55  ;;  %v5014_v54 = vld [vmem:[#allocation11 + $0x1a8] sm:$0xf0]  ;;  %v2804_v6 = vadd.f32 %v2803_v19, %v6521_v23 }
 0x35c   : > { %v2847_v36 = vpop.f32.mrf.mxu2  ;;  %v4700_v11 = vor.u32 %v5014_v54, %v4699_v7 }
 0x35d   : > { %v2848_v30 = vadd.f32 %v2847_v36, %v2799_v62  ;;  %v5037_v36 = vld [vmem:[#allocation13 + $0x20] sm:$0xff] }
 0x35e   : > { %v2894_v45 = vpop.f32.mrf.mxu3  ;;  %3175 = vmatpush.bf16.msrb.mxu1 %v4700_v11  ;;  %3489 = vmatpush.bf16.msrb.mxu2 %v5037_v36  ;;  %v5042_v36 = vld [vmem:[#allocation13 + $0x48] sm:$0xff] }
 0x35f   : > { %v2895_v59 = vadd.f32 %v2894_v45, %v2846_v15  ;;  %v6571_v45 = vpop.f32.mrf.mxu0 }
 0x361   : > { %3045 = vmatmul.bf16.gmra.mxu2 %v6452_v9  ;;  %v3230_v4 = vmax.f32 %v2895_v59, 0.0 }
 0x362   : > { %v2806_v56 = vpop.f32.mrf.mxu1 }
 0x363   : > { %v2807_v61 = vadd.f32 %v2806_v56, %v6521_v23  ;;  %v5036_v56 = vld [vmem:[#allocation13 + $0x18] sm:$0xff] }
 0x364   : > { %v2850_v10 = vpop.f32.mrf.mxu2  ;;  %3148 = vmatmul.bf16.gmra.mxu0 %v6455_v22  ;;  %3490 = vmatpush.bf16.msrb.mxu2 %v5036_v56 }
 0x365   : > { %v2851_v40 = vadd.f32 %v2850_v10, %v2802_v1  ;;  %3001 = vmatmul.bf16.gmra.mxu1 %v6455_v22 }
 0x366   : > { %v2896_v42 = vpop.f32.mrf.mxu3 }
 0x367   : > { %v2897_v38 = vadd.f32 %v2896_v42, %v2848_v30  ;;  %v5047_v42 = vld [vmem:[#allocation13 + $0x70] sm:$0xff] }
 0x369   : > { %v3233_v33 = vmax.f32 %v2897_v38, 0.0 }
 0x36a   : > { %v2808_v52 = vpop.f32.mrf.mxu1 }
 0x36b   : > { %3094 = vmatmul.bf16.gmra.mxu3 %v6307_v46  ;;  %v6557_v25 = vpack.c.bf16 %v3233_v33, %v3230_v4  ;;  %v4687_v46 = vld [vmem:[#allocation11 + $0x188] sm:$0xf]  ;;  %v2809_v43 = vadd.f32 %v2808_v52, %v6521_v23 }
 0x36c   : > { %v2852_v2 = vpop.f32.mrf.mxu2  ;;  %v4688_v15 = vor.u32 %v5011_v60, %v4687_v46  ;;  %v5034_v4 = vld [vmem:[#allocation13 + $0x8] sm:$0xff]  ;;  %v5056_v60 = vld [vmem:[#allocation13 + $0xb8] sm:$0xff] }
 0x36d   : > { %v2853_v22 = vadd.f32 %v2852_v2, %v2804_v6  ;;  %v6577_v2 = vpop.f32.mrf.mxu0  ;;  %3584 = vmatpush.bf16.msrb.mxu0 %v5056_v60 }
 0x36e   : > { %v2899_v16 = vpop.f32.mrf.mxu3  ;;  %3176 = vmatpush.bf16.msrb.mxu1 %v4688_v15 }
 0x36f   : > { %v2900_v8 = vadd.f32 %v2899_v16, %v2851_v40  ;;  %v5048_v40 = vld [vmem:[#allocation13 + $0x78] sm:$0xff]  ;;  %v5046_v16 = vld [vmem:[#allocation13 + $0x68] sm:$0xff] }
 0x370   : > { %3535 = vmatpush.bf16.msrb.mxu3 %v5048_v40  ;;  %v5055_v40 = vld [vmem:[#allocation13 + $0xb0] sm:$0xff] }
 0x371   : > { %3050 = vmatmul.bf16.gmra.mxu2 %v6470_v20  ;;  %v3236_v28 = vmax.f32 %v2900_v8, 0.0  ;;  %v5044_v8 = vld [vmem:[#allocation13 + $0x58] sm:$0xff]  ;;  %3585 = vmatpush.bf16.msrb.mxu0 %v5055_v40 }
 0x372   : > { %v2811_v34 = vpop.f32.mrf.mxu1 }
 0x373   : > { %v2812_v10 = vadd.f32 %v2811_v34, %v6521_v23 }
 0x374   : > { %v2855_v24 = vpop.f32.mrf.mxu2  ;;  %3153 = vmatmul.bf16.gmra.mxu0 %v6473_v57  ;;  %3536 = vmatpush.bf16.msrb.mxu3 %v5047_v42 }
 0x375   : > { %v2856_v37 = vadd.f32 %v2855_v24, %v2807_v61  ;;  %3006 = vmatmul.bf16.gmra.mxu1 %v6473_v57  ;;  %v5033_v61 = vld [vmem:[#allocation13] sm:$0xff] }
 0x376   : > { %v2901_v0 = vpop.f32.mrf.mxu3 }
 0x377   : > { %v2902_v49 = vadd.f32 %v2901_v0, %v2853_v22 }
 0x378   : > { %3537 = vmatpush.bf16.msrb.mxu3 %v5046_v16 }
 0x379   : > { %v3239_v51 = vmax.f32 %v2902_v49, 0.0 }
 0x37a   : > { %v2813_v55 = vpop.f32.mrf.mxu1 }
 0x37b   : > { %3099 = vmatmul.bf16.gmra.mxu3 %v6328_v47  ;;  %v6569_v19 = vpack.c.bf16 %v3239_v51, %v3236_v28  ;;  %v5035_v47 = vld [vmem:[#allocation13 + $0x10] sm:$0xff]  ;;  %v2814_v22 = vadd.f32 %v2813_v55, %v6521_v23 }
 0x37c   : > { %v2857_v57 = vpop.f32.mrf.mxu2  ;;  %3491 = vmatpush.bf16.msrb.mxu2 %v5035_v47  ;;  %v5043_v28 = vld [vmem:[#allocation13 + $0x50] sm:$0xff] }
 0x37d   : > { %v2858_v62 = vadd.f32 %v2857_v57, %v2809_v43 }
 0x37e   : > { %v2904_v30 = vpop.f32.mrf.mxu3 }
 0x37f   : > { %v2905_v59 = vadd.f32 %v2904_v30, %v2856_v37  ;;  %v5045_v37 = vld [vmem:[#allocation13 + $0x60] sm:$0xff] }
 0x380   : > { %3492 = vmatpush.bf16.msrb.mxu2 %v5034_v4  ;;  %3538 = vmatpush.bf16.msrb.mxu3 %v5045_v37 }
 0x381   : > { %3055 = vmatmul.bf16.gmra.mxu2 %v6487_v39  ;;  %v3242_v33 = vmax.f32 %v2905_v59, 0.0 }
 0x382   : > { %v2816_v1 = vpop.f32.mrf.mxu1 }
 0x383   : > { %v2817_v5 = vadd.f32 %v2816_v1, %v6521_v23 }
 0x384   : > { %v2860_v7 = vpop.f32.mrf.mxu2  ;;  %3158 = vmatmul.bf16.gmra.mxu0 %v6490_v31  ;;  %3493 = vmatpush.bf16.msrb.mxu2 %v5033_v61 }
 0x385   : > { %v2861_v54 = vadd.f32 %v2860_v7, %v2812_v10  ;;  %3011 = vmatmul.bf16.gmra.mxu1 %v6490_v31  ;;  %3539 = vmatpush.bf16.msrb.mxu3 %v5044_v8  ;;  %v5041_v10 = vld [vmem:[#allocation13 + $0x40] sm:$0xff] }
 0x386   : > { %v2906_v11 = vpop.f32.mrf.mxu3 }
 0x387   : > { %v2907_v38 = vadd.f32 %v2906_v11, %v2858_v62 }
 0x389   : > { %v3245_v52 = vmax.f32 %v2907_v38, 0.0  ;;  %3540 = vmatpush.bf16.msrb.mxu3 %v5043_v28 }
 0x38a   : > { %v2818_v6 = vpop.f32.mrf.mxu1 }
 0x38b   : > { %3104 = vmatmul.bf16.gmra.mxu3 %v6349_v26  ;;  %v6581_v12 = vpack.c.bf16 %v3245_v52, %v3242_v33  ;;  %v6585_v26 = vpop.f32.mrf.mxu0  ;;  %v2819_v62 = vadd.f32 %v2818_v6, %v6521_v23 }
 0x38c   : > { %v2862_v31 = vpop.f32.mrf.mxu2 }
 0x38d   : > { %v2863_v34 = vadd.f32 %v2862_v31, %v2814_v22  ;;  %3541 = vmatpush.bf16.msrb.mxu3 %v5042_v36 }
 0x38e   : > { %v2909_v24 = vpop.f32.mrf.mxu3 }
 0x38f   : > { %v2910_v49 = vadd.f32 %v2909_v24, %v2861_v54  ;;  %v6604_v24 = vperm.slane %v6517_v50, 1 }
 0x391   : > { %3060 = vmatmul.bf16.gmra.mxu2 %v6503_v58  ;;  %v3248_v55 = vmax.f32 %v2910_v49, 0.0  ;;  %3542 = vmatpush.bf16.msrb.mxu3 %v5041_v10 }
 0x392   : > { %v2821_v46 = vpop.f32.mrf.mxu1 }
 0x393   : > { %v2822_v54 = vadd.f32 %v2821_v46, %v6521_v23 }
 0x394   : > { %v2865_v15 = vpop.f32.mrf.mxu2  ;;  %3163 = vmatmul.bf16.gmra.mxu0 %v6506_v27 }
 0x395   : > { %v2866_v0 = vadd.f32 %v2865_v15, %v2817_v5  ;;  %3016 = vmatmul.bf16.gmra.mxu1 %v6506_v27  ;;  %v2936_v5 = vadd.f32 %v6543_v32, %v6604_v24 }
 0x396   : > { %v2911_v14 = vpop.f32.mrf.mxu3 }
 0x397   : > { %v2912_v51 = vadd.f32 %v2911_v14, %v2863_v34  ;;  %v6600_v34 = vpop.f32.mrf.mxu0 }
 0x399   : > { %v3251_v43 = vmax.f32 %v2912_v51, 0.0 }
 0x39a   : > { %v2823_v57 = vpop.f32.mrf.mxu1 }
 0x39b   : > { %3109 = vmatmul.bf16.gmra.mxu3 %v6370_v44  ;;  %v6591_v56 = vpack.c.bf16 %v3251_v43, %v3248_v55  ;;  %v2824_v52 = vadd.f32 %v2823_v57, %v6521_v23 }
 0x39c   : > { %v2867_v30 = vpop.f32.mrf.mxu2 }
 0x39d   : > { %v2868_v1 = vadd.f32 %v2867_v30, %v2819_v62  ;;  %v5053_v62 = vld [vmem:[#allocation13 + $0xa0] sm:$0xff] }
 0x39e   : > { %v2914_v27 = vpop.f32.mrf.mxu3 }
 0x39f   : > { %v2915_v44 = vadd.f32 %v2914_v27, %v2866_v0  ;;  %v6611_v49 = vpop.f32.mrf.mxu0  ;;  %v2941_v27 = vadd.f32 %v6559_v29, %v6604_v24  ;;  %v2944_v29 = vadd.f32 %v6565_v21, %v6604_v24 }
 0x3a1   : > { %3065 = vmatmul.bf16.gmra.mxu2 %v6512_v35  ;;  %v3254_v38 = vmax.f32 %v2915_v44, 0.0 }
 0x3a2   : > { %v2982_v7 = vpop.f32.mrf.mxu1 }
 0x3a4   : > { %v2870_v47 = vpop.f32.mrf.mxu2 }
 0x3a5   : > { %v2871_v59 = vadd.f32 %v2870_v47, %v2822_v54  ;;  %3177 = vmatmul.bf16.vlgmr.msrb.gmra.mxu1 %v6406_v48  ;;  %v5054_v48 = vld [vmem:[#allocation13 + $0xa8] sm:$0xff] }
 0x3a6   : > { %v2916_v11 = vpop.f32.mrf.mxu3  ;;  %3586 = vmatpush.bf16.msrb.mxu0 %v5054_v48 }
 0x3a7   : > { %v2917_v42 = vadd.f32 %v2916_v11, %v2868_v1  ;;  %v6616_v30 = vpop.f32.mrf.mxu0  ;;  %v2939_v1 = vadd.f32 %v6550_v63, %v6604_v24 }
 0x3a9   : > { %v3257_v4 = vmax.f32 %v2917_v42, 0.0 }
 0x3aa   : > { %v2984_v33 = vpop.f32.mrf.mxu1  ;;  %3587 = vmatpush.bf16.msrb.mxu0 %v5053_v62 }
 0x3ab   : > { %3114 = vmatmul.bf16.gmra.mxu3 %v6392_v3  ;;  %v6598_v22 = vpack.c.bf16 %v3257_v4, %v3254_v38  ;;  %v2934_v3 = vadd.f32 %v6537_v53, %v6604_v24  ;;  %v2985_v14 = vadd.f32 %v2984_v33, %v2936_v5  ;;  %v2946_v4 = vadd.f32 %v6571_v45, %v6604_v24 }
 0x3ac   : > { %v2872_v6 = vpop.f32.mrf.mxu2  ;;  %v2949_v45 = vadd.f32 %v6577_v2, %v6604_v24 }
 0x3ad   : > { %v2873_v16 = vadd.f32 %v2872_v6, %v2824_v52  ;;  %v2983_v8 = vadd.f32 %v2982_v7, %v2934_v3 }
 0x3ae   : > { %v2919_v31 = vpop.f32.mrf.mxu3 }
 0x3af   : > { %v2920_v23 = vadd.f32 %v2919_v31, %v2871_v59  ;;  %v6623_v59 = vpop.f32.mrf.mxu0 }
 0x3b1   : > { %3494 = vmatmul.bf16.vlgmr.msrb.gmra.mxu2 %v6534_v17  ;;  %v3260_v17 = vmax.f32 %v2920_v23, 0.0 }
 0x3b2   : > { %v2987_v61 = vpop.f32.mrf.mxu1 }
 0x3b3   : > { %v2988_v10 = vadd.f32 %v2987_v61, %v2939_v1 }
 0x3b4   : > { %v3031_v37 = vpop.f32.mrf.mxu2 }
 0x3b5   : > { %3182 = vmatmul.bf16.gmra.mxu1 %v6421_v13  ;;  %v3032_v28 = vadd.f32 %v3031_v37, %v2983_v8 }
 0x3b6   : > { %v2921_v46 = vpop.f32.mrf.mxu3 }
 0x3b7   : > { %v2922_v60 = vadd.f32 %v2921_v46, %v2873_v16  ;;  %v3219_v43 = vmax.f32 %v3032_v28, 0.0  ;;  %v6631_v33 = vpop.f32.mrf.mxu0 }
 0x3b9   : > { %v3263_v15 = vmax.f32 %v2922_v60, 0.0  ;;  %v2951_v60 = vadd.f32 %v6585_v26, %v6604_v24 }
 0x3ba   : > { %v2989_v0 = vpop.f32.mrf.mxu1 }
 0x3bb   : > { %v6613_v55 = vpack.c.bf16 %v3263_v15, %v3260_v17  ;;  %v2990_v7 = vadd.f32 %v2989_v0, %v2941_v27 }
 0x3bc   : > { %v3033_v51 = vpop.f32.mrf.mxu2 }
 0x3bd   : > { %v3034_v13 = vadd.f32 %v3033_v51, %v2985_v14 }
 0x3be   : > { %v6643_v14 = vpop.f32.mrf.mxu3 }
 0x3bf   : > { %v3222_v57 = vmax.f32 %v3034_v13, 0.0  ;;  %v6634_v46 = vpop.f32.mrf.mxu0 }
 0x3c1   : > { %v3267_v53 = vpack.c.bf16 %v3222_v57, %v3219_v43  ;;  %3499 = vmatmul.bf16.gmra.mxu2 %v6547_v41  ;;  %v5050_v43 = vld [vmem:[#allocation13 + $0x88] sm:$0xff]  ;;  %v2954_v57 = vadd.f32 %v6600_v34, %v6604_v24  ;;  %v5049_v34 = vld [vmem:[#allocation13 + $0x80] sm:$0xff] }
 0x3c2   : > { %v2992_v36 = vpop.f32.mrf.mxu1 }
 0x3c3   : > { %3543 = vmatmul.bf16.vlgmr.msrb.gmra.mxu3 %v3267_v53  ;;  %v2993_v52 = vadd.f32 %v2992_v36, %v2944_v29  ;;  %v2956_v36 = vadd.f32 %v6611_v49, %v6604_v24  ;;  %v2959_v49 = vadd.f32 %v6616_v30, %v6604_v24 }
 0x3c4   : > { %v3036_v32 = vpop.f32.mrf.mxu2 }
 0x3c5   : > { %3187 = vmatmul.bf16.gmra.mxu1 %v6435_v18  ;;  %v3037_v54 = vadd.f32 %v3036_v32, %v2988_v10  ;;  %v5052_v18 = vld [vmem:[#allocation13 + $0x98] sm:$0xff] }
 0x3c6   : > { %3588 = vmatpush.bf16.msrb.mxu0 %v5052_v18  ;;  %v3082_v62 = vpop.f32.mrf.mxu3 }
 0x3c7   : > { %v3225_v44 = vmax.f32 %v3037_v54, 0.0  ;;  %v6641_v0 = vpop.f32.mrf.mxu0 }
 0x3ca   : > { %v2994_v40 = vpop.f32.mrf.mxu1 }
 0x3cb   : > { %v2995_v16 = vadd.f32 %v2994_v40, %v2946_v4 }
 0x3cc   : > { %v3038_v41 = vpop.f32.mrf.mxu2 }
 0x3cd   : > { %v3039_v47 = vadd.f32 %v3038_v41, %v2990_v7 }
 0x3cf   : > { %v3228_v11 = vmax.f32 %v3039_v47, 0.0  ;;  %v6649_v53 = vpop.f32.mrf.mxu0  ;;  %v6653_v47 = vpop.f32.mrf.mxu3 }
 0x3d1   : > { %3504 = vmatmul.bf16.gmra.mxu2 %v6557_v25  ;;  %v3270_v42 = vpack.c.bf16 %v3228_v11, %v3225_v44 }
 0x3d2   : > { %v2997_v38 = vpop.f32.mrf.mxu1 }
 0x3d3   : > { %3548 = vmatmul.bf16.gmra.mxu3 %v3270_v42  ;;  %v2998_v5 = vadd.f32 %v2997_v38, %v2949_v45  ;;  %v2961_v42 = vadd.f32 %v6623_v59, %v6604_v24  ;;  %v2964_v59 = vadd.f32 %v6631_v33, %v6604_v24 }
 0x3d4   : > { %v3041_v63 = vpop.f32.mrf.mxu2 }
 0x3d5   : > { %3192 = vmatmul.bf16.gmra.mxu1 %v6452_v9  ;;  %v3042_v25 = vadd.f32 %v3041_v63, %v2993_v52  ;;  %v5051_v9 = vld [vmem:[#allocation13 + $0x90] sm:$0xff] }
 0x3d6   : > { %3589 = vmatpush.bf16.msrb.mxu0 %v5051_v9 }
 0x3d7   : > { %v3231_v61 = vmax.f32 %v3042_v25, 0.0  ;;  %v3129_v41 = vpop.f32.mrf.mxu0  ;;  %v3087_v29 = vpop.f32.mrf.mxu3 }
 0x3da   : > { %v2999_v6 = vpop.f32.mrf.mxu1  ;;  %3590 = vmatpush.bf16.msrb.mxu0 %v5050_v43 }
 0x3db   : > { %v3000_v17 = vadd.f32 %v2999_v6, %v2951_v60 }
 0x3dc   : > { %v3043_v31 = vpop.f32.mrf.mxu2 }
 0x3dd   : > { %v3044_v48 = vadd.f32 %v3043_v31, %v2995_v16 }
 0x3de   : > { %3591 = vmatpush.bf16.msrb.mxu0 %v5049_v34 }
 0x3df   : > { %v3234_v37 = vmax.f32 %v3044_v48, 0.0  ;;  %v3131_v63 = vpop.f32.mrf.mxu0 }
 0x3e1   : > { %3509 = vmatmul.bf16.gmra.mxu2 %v6569_v19  ;;  %v3273_v23 = vpack.c.bf16 %v3234_v37, %v3231_v61  ;;  %v3090_v61 = vpop.f32.mrf.mxu3  ;;  %v2966_v37 = vadd.f32 %v6634_v46, %v6604_v24 }
 0x3e2   : > { %v3002_v3 = vpop.f32.mrf.mxu1 }
 0x3e3   : > { %3553 = vmatmul.bf16.gmra.mxu3 %v3273_v23  ;;  %v3003_v32 = vadd.f32 %v3002_v3, %v2954_v57 }
 0x3e4   : > { %v3046_v21 = vpop.f32.mrf.mxu2 }
 0x3e5   : > { %3197 = vmatmul.bf16.gmra.mxu1 %v6470_v20  ;;  %v3047_v19 = vadd.f32 %v3046_v21, %v2998_v5  ;;  %v6668_v5 = vperm.slane %v6517_v50, 2  ;;  %v2971_v50 = vadd.f32 %v6649_v53, %v6604_v24 }
 0x3e7   : > { %v3237_v51 = vmax.f32 %v3047_v19, 0.0  ;;  %v3134_v30 = vpop.f32.mrf.mxu0  ;;  %v3081_v46 = vadd.f32 %v6643_v14, %v6668_v5  ;;  %v3086_v53 = vadd.f32 %v6653_v47, %v6668_v5 }
 0x3e9   : > { %v3135_v34 = vadd.f32 %v3134_v30, %v3086_v53 }
 0x3ea   : > { %v3004_v8 = vpop.f32.mrf.mxu1 }
 0x3ec   : > { %v3048_v15 = vpop.f32.mrf.mxu2 }
 0x3ed   : > { %v3049_v28 = vadd.f32 %v3048_v15, %v3000_v17 }
 0x3ef   : > { %v3240_v13 = vmax.f32 %v3049_v28, 0.0  ;;  %v3083_v28 = vadd.f32 %v3082_v62, %v6668_v5 }
 0x3f1   : > { %3514 = vmatmul.bf16.gmra.mxu2 %v6581_v12  ;;  %v3276_v20 = vpack.c.bf16 %v3240_v13, %v3237_v51  ;;  %v3005_v12 = vadd.f32 %v3004_v8, %v2956_v36  ;;  %v3092_v8 = vpop.f32.mrf.mxu3  ;;  %v2969_v51 = vadd.f32 %v6641_v0, %v6604_v24  ;;  %v3130_v13 = vadd.f32 %v3129_v41, %v3081_v46 }
 0x3f2   : > { %v3007_v2 = vpop.f32.mrf.mxu1  ;;  %v3093_v47 = vadd.f32 %v3092_v8, %v6668_v5 }
 0x3f3   : > { %3558 = vmatmul.bf16.gmra.mxu3 %v3276_v20  ;;  %v3008_v18 = vadd.f32 %v3007_v2, %v2959_v49 }
 0x3f4   : > { %v3051_v26 = vpop.f32.mrf.mxu2 }
 0x3f5   : > { %3202 = vmatmul.bf16.gmra.mxu1 %v6487_v39  ;;  %v3052_v27 = vadd.f32 %v3051_v26, %v3003_v32 }
 0x3f7   : > { %v3243_v7 = vmax.f32 %v3052_v27, 0.0 }
 0x3f9   : > { %v3095_v43 = vpop.f32.mrf.mxu3 }
 0x3fa   : > { %v3009_v1 = vpop.f32.mrf.mxu1 }
 0x3fb   : > { %v3010_v4 = vadd.f32 %v3009_v1, %v2961_v42 }
 0x3fc   : > { %v3053_v10 = vpop.f32.mrf.mxu2 }
 0x3fd   : > { %v3054_v40 = vadd.f32 %v3053_v10, %v3005_v12 }
 0x3ff   : > { %v3246_v54 = vmax.f32 %v3054_v40, 0.0 }
 0x401   : > { %v3279_v39 = vpack.c.bf16 %v3246_v54, %v3243_v7  ;;  %3519 = vmatmul.bf16.gmra.mxu2 %v6591_v56  ;;  %v3097_v41 = vpop.f32.mrf.mxu3 }
 0x402   : > { %v3012_v44 = vpop.f32.mrf.mxu1 }
 0x403   : > { %3563 = vmatmul.bf16.gmra.mxu3 %v3279_v39  ;;  %v3013_v23 = vadd.f32 %v3012_v44, %v2964_v59  ;;  %v3088_v39 = vadd.f32 %v3087_v29, %v6668_v5 }
 0x404   : > { %v3056_v11 = vpop.f32.mrf.mxu2 }
 0x405   : > { %3207 = vmatmul.bf16.gmra.mxu1 %v6503_v58  ;;  %v3057_v52 = vadd.f32 %v3056_v11, %v3008_v18 }
 0x407   : > { %v3249_v16 = vmax.f32 %v3057_v52, 0.0 }
 0x40a   : > { %v3014_v38 = vpop.f32.mrf.mxu1 }
 0x40b   : > { %v3015_v3 = vadd.f32 %v3014_v38, %v2966_v37 }
 0x40c   : > { %v3058_v56 = vpop.f32.mrf.mxu2 }
 0x40d   : > { %v3059_v6 = vadd.f32 %v3058_v56, %v3010_v4  ;;  %v3100_v4 = vpop.f32.mrf.mxu3 }
 0x40f   : > { %v3252_v25 = vmax.f32 %v3059_v6, 0.0  ;;  %v3091_v6 = vadd.f32 %v3090_v61, %v6668_v5  ;;  %v3098_v61 = vadd.f32 %v3097_v41, %v6668_v5 }
 0x411   : > { %v3282_v31 = vpack.c.bf16 %v3252_v25, %v3249_v16  ;;  %3524 = vmatmul.bf16.gmra.mxu2 %v6598_v22  ;;  %v3136_v22 = vpop.f32.mrf.mxu0 }
 0x412   : > { %v3017_v58 = vpop.f32.mrf.mxu1  ;;  %v3137_v11 = vadd.f32 %v3136_v22, %v3088_v39 }
 0x413   : > { %3568 = vmatmul.bf16.gmra.mxu3 %v3282_v31  ;;  %v3018_v2 = vadd.f32 %v3017_v58, %v2969_v51 }
 0x414   : > { %v3061_v48 = vpop.f32.mrf.mxu2 }
 0x415   : > { %3212 = vmatmul.bf16.gmra.mxu1 %v6512_v35  ;;  %v3062_v21 = vadd.f32 %v3061_v48, %v3013_v23  ;;  %v3102_v31 = vpop.f32.mrf.mxu3 }
 0x417   : > { %v3255_v17 = vmax.f32 %v3062_v21, 0.0 }
 0x419   : > { %v3139_v20 = vpop.f32.mrf.mxu0 }
 0x41a   : > { %v3019_v9 = vpop.f32.mrf.mxu1  ;;  %v3140_v25 = vadd.f32 %v3139_v20, %v3091_v6  ;;  %v3103_v20 = vadd.f32 %v3102_v31, %v6668_v5 }
 0x41b   : > { %v3020_v36 = vadd.f32 %v3019_v9, %v2971_v50 }
 0x41c   : > { %v3063_v45 = vpop.f32.mrf.mxu2 }
 0x41d   : > { %v3064_v60 = vadd.f32 %v3063_v45, %v3015_v3  ;;  %v3105_v3 = vpop.f32.mrf.mxu3  ;;  %v3096_v45 = vadd.f32 %v3095_v43, %v6668_v5 }
 0x41f   : > { %v3258_v19 = vmax.f32 %v3064_v60, 0.0 }
 0x421   : > { %v3285_v35 = vpack.c.bf16 %v3258_v19, %v3255_v17  ;;  %3529 = vmatmul.bf16.gmra.mxu2 %v6613_v55  ;;  %v3132_v55 = vadd.f32 %v3131_v63, %v3083_v28  ;;  %v3141_v24 = vpop.f32.mrf.mxu0 }
 0x422   : > { %v3178_v33 = vpop.f32.mrf.mxu1  ;;  %v3142_v58 = vadd.f32 %v3141_v24, %v3093_v47 }
 0x423   : > { %3573 = vmatmul.bf16.gmra.mxu3 %v3285_v35  ;;  %v3179_v26 = vadd.f32 %v3178_v33, %v3130_v13  ;;  %v3101_v13 = vadd.f32 %v3100_v4, %v6668_v5 }
 0x424   : > { %v3066_v15 = vpop.f32.mrf.mxu2 }
 0x425   : > { %v3067_v32 = vadd.f32 %v3066_v15, %v3018_v2  ;;  %v3220_v12 = vmax.f32 %v3179_v26, 0.0  ;;  %v3107_v33 = vpop.f32.mrf.mxu3 }
 0x427   : > { %v3261_v10 = vmax.f32 %v3067_v32, 0.0 }
 0x429   : > { %v3144_v18 = vpop.f32.mrf.mxu0 }
 0x42a   : > { %v3180_v57 = vpop.f32.mrf.mxu1  ;;  %v3145_v60 = vadd.f32 %v3144_v18, %v3096_v45 }
 0x42b   : > { %v3181_v14 = vadd.f32 %v3180_v57, %v3132_v55 }
 0x42c   : > { %v3068_v1 = vpop.f32.mrf.mxu2 }
 0x42d   : > { %v3223_v27 = vmax.f32 %v3181_v14, 0.0  ;;  %v3069_v62 = vadd.f32 %v3068_v1, %v3020_v36  ;;  %v3110_v43 = vpop.f32.mrf.mxu3 }
 0x42f   : > { %v3268_v40 = vpack.c.bf16 %v3223_v27, %v3220_v12  ;;  %v3264_v0 = vmax.f32 %v3069_v62, 0.0 }
 0x431   : > { %v3288_v7 = vpack.c.bf16 %v3264_v0, %v3261_v10  ;;  %3592 = vmatmul.bf16.vlgmr.msrb.gmra.mxu0 %v3268_v40  ;;  %v3146_v16 = vpop.f32.mrf.mxu0  ;;  %v3106_v10 = vadd.f32 %v3105_v3, %v6668_v5  ;;  %v3108_v40 = vadd.f32 %v3107_v33, %v6668_v5 }
 0x432   : > { %v3183_v54 = vpop.f32.mrf.mxu1  ;;  %v3147_v8 = vadd.f32 %v3146_v16, %v3098_v61 }
 0x433   : > { %3578 = vmatmul.bf16.gmra.mxu3 %v3288_v7  ;;  %v3184_v44 = vadd.f32 %v3183_v54, %v3135_v34 }
 0x434   : > { %v3495_v6 = vpop.f32.mrf.mxu2 }
 0x435   : > { %v3226_v38 = vmax.f32 %v3184_v44, 0.0  ;;  %v3112_v27 = vpop.f32.mrf.mxu3 }
 0x439   : > { %v3149_v9 = vpop.f32.mrf.mxu0 }
 0x43a   : > { %v3185_v49 = vpop.f32.mrf.mxu1  ;;  %v3150_v2 = vadd.f32 %v3149_v9, %v3101_v13 }
 0x43b   : > { %v3186_v42 = vadd.f32 %v3185_v49, %v3137_v11 }
 0x43d   : > { %v3229_v63 = vmax.f32 %v3186_v42, 0.0  ;;  %v3115_v53 = vpop.f32.mrf.mxu3  ;;  %v3111_v42 = vadd.f32 %v3110_v43, %v6668_v5 }
 0x43f   : > { %v3271_v52 = vpack.c.bf16 %v3229_v63, %v3226_v38  ;;  %v3113_v63 = vadd.f32 %v3112_v27, %v6668_v5 }
 0x441   : > { %3597 = vmatmul.bf16.gmra.mxu0 %v3271_v52  ;;  %v3151_v19 = vpop.f32.mrf.mxu0 }
 0x442   : > { %v3188_v56 = vpop.f32.mrf.mxu1  ;;  %v3152_v55 = vadd.f32 %v3151_v19, %v3103_v20 }
 0x443   : > { %v3189_v29 = vadd.f32 %v3188_v56, %v3140_v25 }
 0x445   : > { %v3232_v59 = vmax.f32 %v3189_v29, 0.0  ;;  %v3117_v38 = vpop.f32.mrf.mxu3 }
 0x449   : > { %v3154_v50 = vpop.f32.mrf.mxu0 }
 0x44a   : > { %v3190_v48 = vpop.f32.mrf.mxu1  ;;  %v3155_v0 = vadd.f32 %v3154_v50, %v3106_v10 }
 0x44b   : > { %v3191_v30 = vadd.f32 %v3190_v48, %v3142_v58 }
 0x44d   : > { %v3235_v37 = vmax.f32 %v3191_v30, 0.0  ;;  %v3544_v25 = vpop.f32.mrf.mxu3 }
 0x44f   : > { %v3274_v23 = vpack.c.bf16 %v3235_v37, %v3232_v59  ;;  %v3116_v59 = vadd.f32 %v3115_v53, %v6668_v5  ;;  %v3497_v37 = vpop.f32.mrf.mxu2 }
 0x451   : > { %3602 = vmatmul.bf16.gmra.mxu0 %v3274_v23  ;;  %v3156_v1 = vpop.f32.mrf.mxu0  ;;  %v3118_v23 = vadd.f32 %v3117_v38, %v6668_v5 }
 0x452   : > { %v3193_v21 = vpop.f32.mrf.mxu1  ;;  %v3157_v24 = vadd.f32 %v3156_v1, %v3108_v40 }
 0x453   : > { %v3194_v22 = vadd.f32 %v3193_v21, %v3145_v60 }
 0x455   : > { %v3238_v46 = vmax.f32 %v3194_v22, 0.0  ;;  %v3546_v9 = vpop.f32.mrf.mxu3 }
 0x457   : > { %v3500_v19 = vpop.f32.mrf.mxu2 }
 0x459   : > { %v3159_v7 = vpop.f32.mrf.mxu0 }
 0x45a   : > { %v3195_v17 = vpop.f32.mrf.mxu1  ;;  %v3160_v4 = vadd.f32 %v3159_v7, %v3111_v42 }
 0x45b   : > { %v3196_v35 = vadd.f32 %v3195_v17, %v3147_v8 }
 0x45d   : > { %v3241_v15 = vmax.f32 %v3196_v35, 0.0  ;;  %v3549_v33 = vpop.f32.mrf.mxu3 }
 0x45f   : > { %v3277_v28 = vpack.c.bf16 %v3241_v15, %v3238_v46  ;;  %v6696_v46 = vld [vmem:[%s7049_s27] ss:$0 sm:$0xff]  ;;  %v3502_v15 = vpop.f32.mrf.mxu2 }
 0x460   : > { %v3498_v43 = vadd.f32 %v6696_v46, %v3497_v37 }
 0x461   : > { %3607 = vmatmul.bf16.gmra.mxu0 %v3277_v28  ;;  %v3161_v18 = vpop.f32.mrf.mxu0  ;;  %v3496_v28 = vadd.f32 %v6696_v46, %v3495_v6 }
 0x462   : > { %v3198_v51 = vpop.f32.mrf.mxu1  ;;  %v3162_v56 = vadd.f32 %v3161_v18, %v3113_v63 }
 0x463   : > { %v3199_v26 = vadd.f32 %v3198_v51, %v3150_v2  ;;  %v3545_v51 = vadd.f32 %v3544_v25, %v3496_v28 }
 0x465   : > { %v3244_v32 = vmax.f32 %v3199_v26, 0.0  ;;  %v3551_v5 = vpop.f32.mrf.mxu3  ;;  %v3547_v26 = vadd.f32 %v3546_v9, %v3498_v43 }
 0x467   : > { %v3505_v20 = vpop.f32.mrf.mxu2 }
 0x469   : > { %v3164_v58 = vpop.f32.mrf.mxu0 }
 0x46a   : > { %v3200_v57 = vpop.f32.mrf.mxu1  ;;  %v3165_v3 = vadd.f32 %v3164_v58, %v3116_v59 }
 0x46b   : > { %v3201_v36 = vadd.f32 %v3200_v57, %v3152_v55 }
 0x46d   : > { %v3247_v14 = vmax.f32 %v3201_v36, 0.0  ;;  %v3554_v2 = vpop.f32.mrf.mxu3  ;;  %v3501_v36 = vadd.f32 %v6696_v46, %v3500_v19 }
 0x46f   : > { %v3280_v12 = vpack.c.bf16 %v3247_v14, %v3244_v32  ;;  %v3507_v32 = vpop.f32.mrf.mxu2  ;;  %v3550_v14 = vadd.f32 %v3549_v33, %v3501_v36 }
 0x471   : > { %3612 = vmatmul.bf16.gmra.mxu0 %v3280_v12  ;;  %v3166_v21 = vpop.f32.mrf.mxu0 }
 0x472   : > { %v3203_v62 = vpop.f32.mrf.mxu1  ;;  %v3167_v61 = vadd.f32 %v3166_v21, %v3118_v23 }
 0x473   : > { %v3204_v54 = vadd.f32 %v3203_v62, %v3155_v0  ;;  %v3503_v62 = vadd.f32 %v6696_v46, %v3502_v15 }
 0x475   : > { %v3250_v34 = vmax.f32 %v3204_v54, 0.0  ;;  %v3556_v1 = vpop.f32.mrf.mxu3  ;;  %v3552_v10 = vadd.f32 %v3551_v5, %v3503_v62 }
 0x477   : > { %v3510_v40 = vpop.f32.mrf.mxu2 }
 0x478   : > { %v3511_v63 = vadd.f32 %v6696_v46, %v3510_v40 }
 0x47a   : > { %v3205_v41 = vpop.f32.mrf.mxu1 }
 0x47b   : > { %v3206_v39 = vadd.f32 %v3205_v41, %v3157_v24  ;;  %v3506_v24 = vadd.f32 %v6696_v46, %v3505_v20 }
 0x47d   : > { %v3253_v44 = vmax.f32 %v3206_v39, 0.0  ;;  %v3559_v54 = vpop.f32.mrf.mxu3  ;;  %v3555_v53 = vadd.f32 %v3554_v2, %v3506_v24 }
 0x47f   : > { %v3283_v11 = vpack.c.bf16 %v3253_v44, %v3250_v34  ;;  %v3512_v34 = vpop.f32.mrf.mxu2 }
 0x481   : > { %3617 = vmatmul.bf16.gmra.mxu0 %v3283_v11  ;;  %v3508_v11 = vadd.f32 %v6696_v46, %v3507_v32 }
 0x482   : > { %v3208_v49 = vpop.f32.mrf.mxu1 }
 0x483   : > { %v3209_v52 = vadd.f32 %v3208_v49, %v3160_v4  ;;  %v3557_v49 = vadd.f32 %v3556_v1, %v3508_v11 }
 0x485   : > { %v3256_v31 = vmax.f32 %v3209_v52, 0.0  ;;  %v3561_v44 = vpop.f32.mrf.mxu3  ;;  %v3560_v52 = vadd.f32 %v3559_v54, %v3511_v63 }
 0x487   : > { %v3515_v38 = vpop.f32.mrf.mxu2 }
 0x48a   : > { %v3210_v47 = vpop.f32.mrf.mxu1 }
 0x48b   : > { %v3211_v16 = vadd.f32 %v3210_v47, %v3162_v56  ;;  %v3513_v47 = vadd.f32 %v6696_v46, %v3512_v34 }
 0x48d   : > { %v3259_v29 = vmax.f32 %v3211_v16, 0.0  ;;  %v3564_v4 = vpop.f32.mrf.mxu3  ;;  %v3562_v25 = vadd.f32 %v3561_v44, %v3513_v47 }
 0x48f   : > { %v3286_v48 = vpack.c.bf16 %v3259_v29, %v3256_v31  ;;  %v3517_v16 = vpop.f32.mrf.mxu2 }
 0x491   : > { %3622 = vmatmul.bf16.gmra.mxu0 %v3286_v48  ;;  %v3516_v48 = vadd.f32 %v6696_v46, %v3515_v38 }
 0x492   : > { %v3213_v30 = vpop.f32.mrf.mxu1 }
 0x493   : > { %v3214_v45 = vadd.f32 %v3213_v30, %v3165_v3  ;;  %v3565_v30 = vadd.f32 %v3564_v4, %v3516_v48  ;;  %v3518_v3 = vadd.f32 %v6696_v46, %v3517_v16 }
 0x495   : > { %v3262_v8 = vmax.f32 %v3214_v45, 0.0  ;;  %v3566_v31 = vpop.f32.mrf.mxu3 }
 0x496   : > { %v3567_v21 = vadd.f32 %v3566_v31, %v3518_v3 }
 0x497   : > { %v3520_v59 = vpop.f32.mrf.mxu2 }
 0x49a   : > { %v3215_v60 = vpop.f32.mrf.mxu1 }
 0x49b   : > { %v3216_v22 = vadd.f32 %v3215_v60, %v3167_v61 }
 0x49d   : > { %v3265_v17 = vmax.f32 %v3216_v22, 0.0  ;;  %v3569_v9 = vpop.f32.mrf.mxu3 }
 0x49f   : > { %v3289_v35 = vpack.c.bf16 %v3265_v17, %v3262_v8  ;;  %v3522_v60 = vpop.f32.mrf.mxu2  ;;  %v3521_v8 = vadd.f32 %v6696_v46, %v3520_v59 }
 0x4a0   : > { %v3523_v15 = vadd.f32 %v6696_v46, %v3522_v60 }
 0x4a1   : > { %3627 = vmatmul.bf16.gmra.mxu0 %v3289_v35  ;;  %v3570_v17 = vadd.f32 %v3569_v9, %v3521_v8 }
 0x4a5   : > { %v3571_v22 = vpop.f32.mrf.mxu3 }
 0x4a6   : > { %v3572_v28 = vadd.f32 %v3571_v22, %v3523_v15 }
 0x4a7   : > { %v3525_v33 = vpop.f32.mrf.mxu2 }
 0x4a8   : > { %v3526_v20 = vadd.f32 %v6696_v46, %v3525_v33 }
 0x4ad   : > { %v3574_v5 = vpop.f32.mrf.mxu3 }
 0x4ae   : > { %v3593_v13 = vpop.f32.mrf.mxu0  ;;  %v3575_v2 = vadd.f32 %v3574_v5, %v3526_v20 }
 0x4af   : > { %v6699_v50 = vadd.f32 %v3593_v13, %v3545_v51  ;;  %v3527_v43 = vpop.f32.mrf.mxu2 }
 0x4b0   : > { %v3528_v32 = vadd.f32 %v6696_v46, %v3527_v43 }
 0x4b1   : > { %3633 = vmax.xlane.f32.xlu0 %v6699_v50 }
 0x4b6   : > { %v3595_v55 = vpop.f32.mrf.mxu0 }
 0x4b7   : > { %v6703_v57 = vadd.f32 %v3595_v55, %v3547_v26  ;;  %v3576_v26 = vpop.f32.mrf.mxu3  ;;  %v3530_v1 = vpop.f32.mrf.mxu2 }
 0x4b8   : > { %v3531_v40 = vadd.f32 %v6696_v46, %v3530_v1 }
 0x4b9   : > { %3635 = vmax.xlane.f32.xlu0 %v6703_v57 }
 0x4be   : > { %v3598_v12 = vpop.f32.mrf.mxu0 }
 0x4bf   : > { %v6707_v27 = vadd.f32 %v3598_v12, %v3550_v14  ;;  %v3577_v14 = vadd.f32 %v3576_v26, %v3528_v32 }
 0x4c1   : > { %3637 = vmax.xlane.f32.xlu1 %v6707_v27 }
 0x4c6   : > { %v3600_v0 = vpop.f32.mrf.mxu0 }
 0x4c7   : > { %v6711_v7 = vadd.f32 %v3600_v0, %v3552_v10  ;;  %v3579_v10 = vpop.f32.mrf.mxu3 }
 0x4c8   : > { %v3580_v0 = vadd.f32 %v3579_v10, %v3531_v40 }
 0x4c9   : > { %3639 = vmax.xlane.f32.xlu1 %v6711_v7 }
 0x4ce   : > { %v3603_v41 = vpop.f32.mrf.mxu0 }
 0x4cf   : > { %v6715_v39 = vadd.f32 %v3603_v41, %v3555_v53  ;;  %v3532_v53 = vpop.f32.mrf.mxu2  ;;  %v3581_v41 = vpop.f32.mrf.mxu3 }
 0x4d0   : > { %v3533_v34 = vadd.f32 %v6696_v46, %v3532_v53 }
 0x4d1   : > { %3641 = vmax.xlane.f32.xlu2 %v6715_v39 }
 0x4d2   : > { %v3582_v11 = vadd.f32 %v3581_v41, %v3533_v34 }
 0x4d6   : > { %v3605_v42 = vpop.f32.mrf.mxu0 }
 0x4d7   : > { %v6719_v18 = vadd.f32 %v3605_v42, %v3557_v49 }
 0x4d9   : > { %3643 = vmax.xlane.f32.xlu2 %v6719_v18 }
 0x4de   : > { %v3608_v56 = vpop.f32.mrf.mxu0 }
 0x4df   : > { %v6723_v6 = vadd.f32 %v3608_v56, %v3560_v52 }
 0x4e1   : > { %3645 = vmax.xlane.f32.xlu0 %v6723_v6 }
 0x4e6   : > { %v3610_v29 = vpop.f32.mrf.mxu0 }
 0x4e7   : > { %v6727_v58 = vadd.f32 %v3610_v29, %v3562_v25 }
 0x4e9   : > { %3647 = vmax.xlane.f32.xlu1 %v6727_v58 }
 0x4ee   : > { %v3613_v37 = vpop.f32.mrf.mxu0 }
 0x4ef   : > { %v6731_v23 = vadd.f32 %v3613_v37, %v3565_v30 }
 0x4f1   : > { %3649 = vmax.xlane.f32.xlu2 %v6731_v23 }
 0x4f6   : > { %v3615_v45 = vpop.f32.mrf.mxu0 }
 0x4f7   : > { %v6735_v61 = vadd.f32 %v3615_v45, %v3567_v21 }
 0x4f9   : > { %3651 = vmax.xlane.f32.xlu0 %v6735_v61 }
 0x4fe   : > { %v3618_v19 = vpop.f32.mrf.mxu0 }
 0x4ff   : > { %v6739_v35 = vadd.f32 %v3618_v19, %v3570_v17 }
 0x501   : > { %3653 = vmax.xlane.f32.xlu1 %v6739_v35 }
 0x506   : > { %v3620_v51 = vpop.f32.mrf.mxu0 }
 0x507   : > { %v6743_v13 = vadd.f32 %v3620_v51, %v3572_v28 }
 0x509   : > { %3655 = vmax.xlane.f32.xlu2 %v6743_v13 }
 0x50e   : > { %v3623_v55 = vpop.f32.mrf.mxu0 }
 0x50f   : > { %v6747_v36 = vadd.f32 %v3623_v55, %v3575_v2 }
 0x511   : > { %3657 = vmax.xlane.f32.xlu0 %v6747_v36 }
 0x516   : > { %v3625_v12 = vpop.f32.mrf.mxu0 }
 0x517   : > { %v6751_v62 = vadd.f32 %v3625_v12, %v3577_v14 }
 0x519   : > { %3659 = vmax.xlane.f32.xlu1 %v6751_v62 }
 0x51e   : > { %v3628_v54 = vpop.f32.mrf.mxu0 }
 0x51f   : > { %v6755_v24 = vadd.f32 %v3628_v54, %v3580_v0 }
 0x521   : > { %3661 = vmax.xlane.f32.xlu2 %v6755_v24 }
 0x524   : > { %v3634_v44 = vpop.xlane.xlu0 %3633 }
 0x525   : > { %v3665_v49 = vsub.f32 %v6699_v50, %v3634_v44 }
 0x526   : > { %v3630_v42 = vpop.f32.mrf.mxu0 }
 0x527   : > { %v3681_v38 = vmul.f32 1.442695, %v3665_v49  ;;  %v6760_v63 = vadd.f32 %v3630_v42, %v3582_v11 }
 0x529   : > { %5190 = vpow2.f32 %v3681_v38  ;;  %3663 = vmax.xlane.f32.xlu0 %v6760_v63 }
 0x52c   : > { %v3636_v4 = vpop.xlane.xlu0 %3635 }
 0x52d   : > { %v3666_v52 = vsub.f32 %v6703_v57, %v3636_v4 }
 0x52f   : > { %v6764_v56 = vpop.eup %5190  ;;  %v3683_v47 = vmul.f32 1.442695, %v3666_v52 }
 0x530   : > { %3713 = vadd.xlane.f32.xlu1 %v6764_v56 }
 0x531   : > { %5192 = vpow2.f32 %v3683_v47 }
 0x534   : > { %v3638_v46 = vpop.xlane.xlu1 %3637 }
 0x535   : > { %v3667_v16 = vsub.f32 %v6707_v27, %v3638_v46 }
 0x537   : > { %v6768_v50 = vpop.eup %5192  ;;  %v3685_v25 = vmul.f32 1.442695, %v3667_v16 }
 0x538   : > { %3715 = vadd.xlane.f32.xlu2 %v6768_v50 }
 0x539   : > { %5194 = vpow2.f32 %v3685_v25 }
 0x53c   : > { %v3640_v31 = vpop.xlane.xlu1 %3639 }
 0x53d   : > { %v3668_v29 = vsub.f32 %v6711_v7, %v3640_v31 }
 0x53f   : > { %v6772_v48 = vpop.eup %5194  ;;  %v3687_v57 = vmul.f32 1.442695, %v3668_v29 }
 0x540   : > { %3717 = vadd.xlane.f32.xlu0 %v6772_v48 }
 0x541   : > { %5196 = vpow2.f32 %v3687_v57 }
 0x544   : > { %v3642_v30 = vpop.xlane.xlu2 %3641 }
 0x545   : > { %v3669_v59 = vsub.f32 %v6715_v39, %v3642_v30 }
 0x547   : > { %v6776_v37 = vpop.eup %5196  ;;  %v3689_v27 = vmul.f32 1.442695, %v3669_v59 }
 0x548   : > { %3719 = vadd.xlane.f32.xlu1 %v6776_v37 }
 0x549   : > { %5198 = vpow2.f32 %v3689_v27 }
 0x54c   : > { %v3644_v9 = vpop.xlane.xlu2 %3643 }
 0x54d   : > { %v3670_v3 = vsub.f32 %v6719_v18, %v3644_v9 }
 0x54f   : > { %v6780_v21 = vpop.eup %5198  ;;  %v3691_v7 = vmul.f32 1.442695, %v3670_v3 }
 0x550   : > { %3721 = vadd.xlane.f32.xlu2 %v6780_v21 }
 0x551   : > { %5200 = vpow2.f32 %v3691_v7 }
 0x554   : > { %v3646_v45 = vpop.xlane.xlu0 %3645 }
 0x555   : > { %v3671_v60 = vsub.f32 %v6723_v6, %v3646_v45 }
 0x557   : > { %v6784_v22 = vpop.eup %5200  ;;  %v3693_v39 = vmul.f32 1.442695, %v3671_v60 }
 0x558   : > { %3723 = vadd.xlane.f32.xlu0 %v6784_v22 }
 0x559   : > { %5202 = vpow2.f32 %v3693_v39 }
 0x55c   : > { %v3648_v8 = vpop.xlane.xlu1 %3647 }
 0x55d   : > { %v3672_v17 = vsub.f32 %v6727_v58, %v3648_v8 }
 0x55f   : > { %v6788_v19 = vpop.eup %5202  ;;  %v3695_v18 = vmul.f32 1.442695, %v3672_v17 }
 0x560   : > { %3725 = vadd.xlane.f32.xlu1 %v6788_v19 }
 0x561   : > { %5204 = vpow2.f32 %v3695_v18 }
 0x564   : > { %v3650_v33 = vpop.xlane.xlu2 %3649 }
 0x565   : > { %v3673_v15 = vsub.f32 %v6731_v23, %v3650_v33 }
 0x567   : > { %v6792_v5 = vpop.eup %5204  ;;  %v3697_v6 = vmul.f32 1.442695, %v3673_v15 }
 0x568   : > { %3727 = vadd.xlane.f32.xlu2 %v6792_v5 }
 0x569   : > { %5206 = vpow2.f32 %v3697_v6 }
 0x56c   : > { %v3652_v28 = vpop.xlane.xlu0 %3651 }
 0x56d   : > { %v3674_v51 = vsub.f32 %v6735_v61, %v3652_v28 }
 0x56f   : > { %v6796_v20 = vpop.eup %5206  ;;  %v3699_v58 = vmul.f32 1.442695, %v3674_v51 }
 0x570   : > { %3729 = vadd.xlane.f32.xlu0 %v6796_v20 }
 0x571   : > { %5208 = vpow2.f32 %v3699_v58 }
 0x574   : > { %v3654_v43 = vpop.xlane.xlu1 %3653 }
 0x575   : > { %v3675_v2 = vsub.f32 %v6739_v35, %v3654_v43 }
 0x577   : > { %v6800_v26 = vpop.eup %5208  ;;  %v3701_v23 = vmul.f32 1.442695, %v3675_v2 }
 0x578   : > { %3731 = vadd.xlane.f32.xlu1 %v6800_v26 }
 0x579   : > { %5210 = vpow2.f32 %v3701_v23 }
 0x57c   : > { %v3656_v55 = vpop.xlane.xlu2 %3655 }
 0x57d   : > { %v3676_v32 = vsub.f32 %v6743_v13, %v3656_v55 }
 0x57f   : > { %v6804_v14 = vpop.eup %5210  ;;  %v3703_v61 = vmul.f32 1.442695, %v3676_v32 }
 0x580   : > { %3733 = vadd.xlane.f32.xlu2 %v6804_v14 }
 0x581   : > { %5212 = vpow2.f32 %v3703_v61 }
 0x584   : > { %v3658_v1 = vpop.xlane.xlu0 %3657 }
 0x585   : > { %v3677_v12 = vsub.f32 %v6747_v36, %v3658_v1 }
 0x587   : > { %v6808_v10 = vpop.eup %5212  ;;  %v3705_v35 = vmul.f32 1.442695, %v3677_v12 }
 0x588   : > { %3735 = vadd.xlane.f32.xlu0 %v6808_v10 }
 0x589   : > { %5214 = vpow2.f32 %v3705_v35 }
 0x58c   : > { %v3660_v40 = vpop.xlane.xlu1 %3659 }
 0x58d   : > { %v3678_v0 = vsub.f32 %v6751_v62, %v3660_v40 }
 0x58f   : > { %v6812_v54 = vpop.eup %5214  ;;  %v3707_v13 = vmul.f32 1.442695, %v3678_v0 }
 0x590   : > { %3737 = vadd.xlane.f32.xlu1 %v6812_v54 }
 0x591   : > { %5216 = vpow2.f32 %v3707_v13 }
 0x594   : > { %v3662_v53 = vpop.xlane.xlu2 %3661 }
 0x595   : > { %v3679_v41 = vsub.f32 %v6755_v24, %v3662_v53 }
 0x597   : > { %v6816_v34 = vpop.eup %5216  ;;  %v3709_v36 = vmul.f32 1.442695, %v3679_v41 }
 0x598   : > { %3739 = vadd.xlane.f32.xlu2 %v6816_v34 }
 0x599   : > { %5218 = vpow2.f32 %v3709_v36 }
 0x59c   : > { %v3664_v44 = vpop.xlane.xlu0 %3663 }
 0x59d   : > { %v3680_v11 = vsub.f32 %v6760_v63, %v3664_v44 }
 0x59f   : > { %v6820_v62 = vpop.eup %5218  ;;  %v3711_v49 = vmul.f32 1.442695, %v3680_v11 }
 0x5a0   : > { %3741 = vadd.xlane.f32.xlu0 %v6820_v62 }
 0x5a1   : > { %5220 = vpow2.f32 %v3711_v49 }
 0x5a3   : > { %v3714_v42 = vpop.xlane.xlu1 %3713 }
 0x5a4   : > { %5222 = vrcp.f32 %v3714_v42 }
 0x5a7   : > { %v6823_v24 = vpop.eup %5220 }
 0x5a8   : > { %3743 = vadd.xlane.f32.xlu1 %v6823_v24 }
 0x5aa   : > { %v5223_v38 = vpop.eup %5222 }
 0x5ab   : > { %v3761_v4 = vmul.f32 %v5223_v38, %v6764_v56  ;;  %v3716_v52 = vpop.xlane.xlu2 %3715 }
 0x5ac   : > { %5224 = vrcp.f32 %v3716_v52 }
 0x5ad   : > { %3777 = vst [vmem:[%s7050_s12] sm:$0xff] %v3761_v4 }
 0x5b2   : > { %v5225_v63 = vpop.eup %5224 }
 0x5b3   : > { %v3762_v47 = vmul.f32 %v5225_v63, %v6768_v50  ;;  %v3718_v46 = vpop.xlane.xlu0 %3717 }
 0x5b4   : > { %5226 = vrcp.f32 %v3718_v46 }
 0x5b5   : > { %3778 = vst [vmem:[%s7050_s12 + $0x8] sm:$0xff] %v3762_v47 }
 0x5ba   : > { %v5227_v16 = vpop.eup %5226 }
 0x5bb   : > { %v3763_v25 = vmul.f32 %v5227_v16, %v6772_v48  ;;  %v3720_v31 = vpop.xlane.xlu1 %3719 }
 0x5bc   : > { %5228 = vrcp.f32 %v3720_v31 }
 0x5bd   : > { %3779 = vst [vmem:[%s7050_s12 + $0x10] sm:$0xff] %v3763_v25 }
 0x5c2   : > { %v5229_v29 = vpop.eup %5228 }
 0x5c3   : > { %v3764_v56 = vmul.f32 %v5229_v29, %v6776_v37  ;;  %v3722_v57 = vpop.xlane.xlu2 %3721 }
 0x5c4   : > { %5230 = vrcp.f32 %v3722_v57 }
 0x5c5   : > { %3780 = vst [vmem:[%s7050_s12 + $0x18] sm:$0xff] %v3764_v56 }
 0x5ca   : > { %v5231_v30 = vpop.eup %5230 }
 0x5cb   : > { %v3765_v50 = vmul.f32 %v5231_v30, %v6780_v21  ;;  %v3724_v59 = vpop.xlane.xlu0 %3723 }
 0x5cc   : > { %5232 = vrcp.f32 %v3724_v59 }
 0x5cd   : > { %3781 = vst [vmem:[%s7050_s12 + $0x20] sm:$0xff] %v3765_v50 }
 0x5d2   : > { %v5233_v27 = vpop.eup %5232 }
 0x5d3   : > { %v3766_v48 = vmul.f32 %v5233_v27, %v6784_v22  ;;  %v3726_v9 = vpop.xlane.xlu1 %3725 }
 0x5d4   : > { %5234 = vrcp.f32 %v3726_v9 }
 0x5d5   : > { %3782 = vst [vmem:[%s7050_s12 + $0x28] sm:$0xff] %v3766_v48 }
 0x5da   : > { %v5235_v3 = vpop.eup %5234 }
 0x5db   : > { %v3767_v37 = vmul.f32 %v5235_v3, %v6788_v19  ;;  %v3728_v7 = vpop.xlane.xlu2 %3727 }
 0x5dc   : > { %5236 = vrcp.f32 %v3728_v7 }
 0x5dd   : > { %3783 = vst [vmem:[%s7050_s12 + $0x30] sm:$0xff] %v3767_v37 }
 0x5e2   : > { %v5237_v45 = vpop.eup %5236 }
 0x5e3   : > { %v3768_v21 = vmul.f32 %v5237_v45, %v6792_v5  ;;  %v3730_v60 = vpop.xlane.xlu0 %3729 }
 0x5e4   : > { %5238 = vrcp.f32 %v3730_v60 }
 0x5e5   : > { %3784 = vst [vmem:[%s7050_s12 + $0x38] sm:$0xff] %v3768_v21 }
 0x5ea   : > { %v5239_v39 = vpop.eup %5238 }
 0x5eb   : > { %v3769_v22 = vmul.f32 %v5239_v39, %v6796_v20  ;;  %v3732_v8 = vpop.xlane.xlu1 %3731 }
 0x5ec   : > { %5240 = vrcp.f32 %v3732_v8 }
 0x5ed   : > { %3785 = vst [vmem:[%s7050_s12 + $0x40] sm:$0xff] %v3769_v22 }
 0x5f2   : > { %v5241_v17 = vpop.eup %5240 }
 0x5f3   : > { %v3770_v19 = vmul.f32 %v5241_v17, %v6800_v26  ;;  %v3734_v18 = vpop.xlane.xlu2 %3733 }
 0x5f4   : > { %5242 = vrcp.f32 %v3734_v18 }
 0x5f5   : > { %3786 = vst [vmem:[%s7050_s12 + $0x48] sm:$0xff] %v3770_v19 }
 0x5fa   : > { %v5243_v33 = vpop.eup %5242 }
 0x5fb   : > { %v3771_v15 = vmul.f32 %v5243_v33, %v6804_v14  ;;  %v3736_v5 = vpop.xlane.xlu0 %3735 }
 0x5fc   : > { %5244 = vrcp.f32 %v3736_v5 }
 0x5fd   : > { %3787 = vst [vmem:[%s7050_s12 + $0x50] sm:$0xff] %v3771_v15 }
 0x602   : > { %v5245_v6 = vpop.eup %5244 }
 0x603   : > { %v3772_v28 = vmul.f32 %v5245_v6, %v6808_v10  ;;  %v3738_v51 = vpop.xlane.xlu1 %3737 }
 0x604   : > { %5246 = vrcp.f32 %v3738_v51 }
 0x605   : > { %3788 = vst [vmem:[%s7050_s12 + $0x58] sm:$0xff] %v3772_v28 }
 0x60a   : > { %v5247_v20 = vpop.eup %5246 }
 0x60b   : > { %v3773_v58 = vmul.f32 %v5247_v20, %v6812_v54  ;;  %v3740_v43 = vpop.xlane.xlu2 %3739 }
 0x60c   : > { %5248 = vrcp.f32 %v3740_v43 }
 0x60d   : > { %3789 = vst [vmem:[%s7050_s12 + $0x60] sm:$0xff] %v3773_v58 }
 0x612   : > { %v5249_v2 = vpop.eup %5248 }
 0x613   : > { %v3774_v26 = vmul.f32 %v5249_v2, %v6816_v34  ;;  %v3742_v23 = vpop.xlane.xlu0 %3741 }
 0x614   : > { %5250 = vrcp.f32 %v3742_v23 }
 0x615   : > { %3790 = vst [vmem:[%s7050_s12 + $0x68] sm:$0xff] %v3774_v26 }
 0x61a   : > { %v5251_v55 = vpop.eup %5250 }
 0x61b   : > { %v3775_v32 = vmul.f32 %v5251_v55, %v6820_v62  ;;  %v3744_v14 = vpop.xlane.xlu1 %3743 }
 0x61c   : > { %5252 = vrcp.f32 %v3744_v14 }
 0x61d   : > { %3791 = vst [vmem:[%s7050_s12 + $0x70] sm:$0xff] %v3775_v32 }
 0x622   : > { %v5253_v61 = vpop.eup %5252 }
 0x623   : > { %v3776_v1 = vmul.f32 %v5253_v61, %v6823_v24 }
 0x625   : > { %3792 = vst [vmem:[%s7050_s12 + $0x78] sm:$0xff] %v3776_v1 }
 0x626   : > { %5443 = shalt.err (!%p5440_p8)
}
 0x627   : > { %s5514_s13 = smov 128   ;;  %s5515_s10 = smov 8  }
 0x628   : > { %5102 = dma.vmem_to_hbm [thread:$0]  (%p5602_p5), %s3807_s26, 2048, %s3809_s1, %s3794_s20, %s5514_s13, %s5514_s13, %s5515_s10  }
 0x629 PF: > { %s7057_s21 = sld [smem:[#allocation23_spill]] }
 0x62a   : > { %s7058_s18 = sld [smem:[#allocation20_spill]] }
 0x62f   : > { %p5134_p9 = scmp.ge.s32.totalorder %s7057_s21, 2 }
 0x630   : > { %s3823_s28 = sand.u32 1, %s7058_s18  }
 0x631   : > { %p5121_p10 = pnand %p5134_p9, %p5606_p6  ;;  %s3824_s6 = scalar_lea.sflag [#allocation7], %s3823_s28 }
 0x633   : > { %p5122_p11 = pneg %p5121_p10 }
 0x635   : > { %5479 = dma.done.wait (%p5122_p11), %s3824_s6, 2048  }
 0x636   : > { %5481 = vsyncadd (%p5122_p11), %s3824_s6, 4294965248  ;;  %s7060_s12 = sld [smem:[#allocation25_spill]] }
 0x637   : > { %s7061_s9 = sld [smem:[#allocation21_spill]] }
 0x638   : > { %s7062_s10 = sld [smem:[#allocation22_spill]] }
 0x639   : > { %s7063_s11 = sld [smem:[#allocation26_spill]] }
 0x63c   : > { %p29_p12 = scmp.ge.s32.totalorder %s7060_s12, 4  }
 0x63e   :  { %31 = sbr.rel (!%p29_p12) target bundleno = 19 (0x13), region = 184 }
 0x643   :  { %3830 = vsyncpa [#allocation6], 1 }
 0x644   :  { %3832 = vsyncpa [#allocation6 + $0x1], 1 }
 0x645   :  { %3833 = vsyncpa [#allocation9], 1 }
 0x646   :  { %3834 = vsyncpa [#allocation12], 1 }
 0x647   :  { %3835 = vsyncpa [#allocation7], 1 }
 0x648   :  { %3837 = vsyncpa [#allocation7 + $0x1], 1 }

</bundles_post_ra>
